<compile_context>
chip_gen: v7x
topology: tpu7x:2x2x1
jax: 0.10.0
libtpu: 0.0.40
codegen_flags: <defaults>
</compile_context>

<pallas_src>
import math

import jax
import jax.numpy as jnp
from jax.experimental import pallas as pl
from jax.experimental.pallas import tpu as pltpu


# ---------------------------------------------------------------------------
# Helpers
# ---------------------------------------------------------------------------
def _pick_label_tile(label_num, hidden, requested=None, cap=8):
    """Labels processed per grid step.

    The tile must divide label_num; unless it covers the whole label axis,
    tile*hidden must be a multiple of 128 so the output block's last dim
    stays lane-dense (unmasked vst)."""
    if requested is not None:
        if label_num % requested:
            raise ValueError("label_tile must divide label_num")
        if requested != label_num and (requested * hidden) % 128:
            raise ValueError("label_tile * hidden must be a multiple of 128")
        return requested
    if label_num <= cap:
        return label_num
    for t in range(cap, 0, -1):
        if label_num % t == 0 and (t * hidden) % 128 == 0:
            return t
    return label_num  # fall back: all labels in one step (always legal)


def _default_vmem_limit():
    # ~75% of physical per-core VMEM (v5e/v6e: 128 MiB -> 96 MiB, v7x:
    # 64 MiB -> 48 MiB).  Hardware query only; a failure here never masks a
    # kernel/lowering error — we just use the 48 MiB cap safe on every chip.
    try:
        cap = int(pltpu.get_tpu_info().vmem_capacity_bytes)
    except Exception:
        return 48 * 1024 * 1024
    return min(cap * 3 // 4, 110 * 1024 * 1024)


# ---------------------------------------------------------------------------
# Kernel
# ---------------------------------------------------------------------------
def _make_fusion_attn_kernel(num_heads, head_dim, label_tile, hidden,
                             compute_dtype, approx_recip):
    def kernel(qt_ref, kt_ref, vt_ref, ql_ref, kl_ref, vl_ref,
               amt_ref, aml_ref, o_ref):
        # Token-side tensors are shared by every label in this tile: load once.
        qt = qt_ref[...]        # (nh, S_t, hd); 1/sqrt(hd) already folded in
        kt = kt_ref[...]
        vt = vt_ref[...]
        am_tok = amt_ref[...]   # (1, S_t) additive mask (precomputed)

        for j in range(label_tile):
            # Concatenate this label's pre-projected q/k/v with the tokens'.
            q = jnp.concatenate([qt, ql_ref[j]], axis=1)      # (nh, S, hd)
            k = jnp.concatenate([kt, kl_ref[j]], axis=1)
            v = jnp.concatenate([vt, vl_ref[j]], axis=1)
            add_mask = jnp.concatenate([am_tok, aml_ref[j]], axis=-1)  # (1, S)
            col0 = j * hidden
            for h in range(num_heads):
                # scores = q_h @ k_h^T  (contract head_dim)
                s = jax.lax.dot_general(q[h], k[h], (((1,), (1,)), ((), ())),
                                        preferred_element_type=jnp.float32)
                s = s + add_mask
                # Numerically stable softmax in f32; divide goes to the EUP.
                s = s - jnp.max(s, axis=-1, keepdims=True)
                e = jnp.exp(s)
                inv = pl.reciprocal(jnp.sum(e, axis=-1, keepdims=True),
                                    approx=approx_recip)
                p = (e * inv).astype(compute_dtype)
                # TODO(synk): dropout on attention probs == identity (eval).
                ctx = jnp.dot(p, v[h], preferred_element_type=jnp.float32)
                # Write this head's context straight into its output columns
                # (no lane-axis concat of head contexts).
                o_ref[:, col0 + h * head_dim:col0 + (h + 1) * head_dim] = (
                    ctx.astype(o_ref.dtype))

    return kernel


# ---------------------------------------------------------------------------
# Wrapper
# ---------------------------------------------------------------------------
def label_attn_fusion_for_token(token_embs, label_embs, token_mask, label_mask,
                                wq, bq, wk, bk, wv, bv, *, num_heads,
                                compute_dtype=jnp.bfloat16, out_dtype=None,
                                label_tile=None, vmem_limit_bytes=None):
    """token_embs: (B, S_t, H); label_embs: (L, S_l, H);
    token_mask: (B, S_t); label_mask: (L, S_l).
    Weights stored as (in, out) == transpose of torch's nn.Linear.weight.
    Returns (B, S_t+S_l, L, H), matching the PyTorch module.

    compute_dtype=bfloat16 (default) casts matmul inputs/attention probs to
    bf16 with f32 accumulation (~1e-2 rel. deviation vs f32 PyTorch);
    compute_dtype=float32 gives a tight f32 path."""
    B, S_t, H = token_embs.shape
    L, S_l, _ = label_embs.shape
    S = S_t + S_l
    if H % num_heads != 0:
        raise ValueError("hidden size must be a multiple of num_heads")
    head_dim = H // num_heads
    if out_dtype is None:
        out_dtype = token_embs.dtype

    TL = _pick_label_tile(L, H, label_tile)
    n_lt = L // TL

    # --- Q/K/V projections hoisted out of the (B, L) grid -------------------
    # Row projections are label-independent (tokens) / batch-independent
    # (labels), so project once here instead of B*L times inside the kernel.
    scale = 1.0 / math.sqrt(head_dim)
    prec = jax.lax.Precision.HIGHEST if compute_dtype == jnp.float32 else None

    def project(x, w, b, fold_scale):
        y = jnp.einsum("nsh,hc->nsc", x.astype(compute_dtype),
                       w.astype(compute_dtype),
                       preferred_element_type=jnp.float32, precision=prec)
        y = y + b.astype(jnp.float32)
        if fold_scale:                     # fold 1/sqrt(head_dim) into queries
            y = y * scale
        n, s = x.shape[:2]
        y = y.reshape(n, s, num_heads, head_dim).transpose(0, 2, 1, 3)
        return y.astype(compute_dtype)     # (n, nh, s, hd) head-major layout

    qt = project(token_embs, wq, bq, True)
    kt = project(token_embs, wk, bk, False)
    vt = project(token_embs, wv, bv, False)
    ql = project(label_embs, wq, bq, True)
    kl = project(label_embs, wk, bk, False)
    vl = project(label_embs, wv, bv, False)

    # Additive attention masks precomputed in f32 (key positions).
    amt = ((1.0 - token_mask.astype(jnp.float32)) * -10000.0).reshape(B, 1, S_t)
    aml = ((1.0 - label_mask.astype(jnp.float32)) * -10000.0).reshape(L, 1, S_l)

    if vmem_limit_bytes is None:
        vmem_limit_bytes = _default_vmem_limit()

    kernel = _make_fusion_attn_kernel(
        num_heads, head_dim, TL, H, compute_dtype,
        approx_recip=(compute_dtype != jnp.float32))

    grid_spec = pltpu.PrefetchScalarGridSpec(
        num_scalar_prefetch=0,
        grid=(B, n_lt),
        in_specs=[
            pl.BlockSpec((None, num_heads, S_t, head_dim),
                         lambda b, lt: (b, 0, 0, 0)),                 # q tokens
            pl.BlockSpec((None, num_heads, S_t, head_dim),
                         lambda b, lt: (b, 0, 0, 0)),                 # k tokens
            pl.BlockSpec((None, num_heads, S_t, head_dim),
                         lambda b, lt: (b, 0, 0, 0)),                 # v tokens
            pl.BlockSpec((TL, num_heads, S_l, head_dim),
                         lambda b, lt: (lt, 0, 0, 0)),                # q labels
            pl.BlockSpec((TL, num_heads, S_l, head_dim),
                         lambda b, lt: (lt, 0, 0, 0)),                # k labels
            pl.BlockSpec((TL, num_heads, S_l, head_dim),
                         lambda b, lt: (lt, 0, 0, 0)),                # v labels
            pl.BlockSpec((None, 1, S_t), lambda b, lt: (b, 0, 0)),    # tok mask
            pl.BlockSpec((TL, 1, S_l), lambda b, lt: (lt, 0, 0)),     # lab mask
        ],
        out_specs=pl.BlockSpec((None, S, TL * H), lambda b, lt: (b, 0, lt)),
    )

    out = pl.pallas_call(
        kernel,
        out_shape=jax.ShapeDtypeStruct((B, S, L * H), out_dtype),
        grid_spec=grid_spec,
        compiler_params=pltpu.CompilerParams(
            dimension_semantics=("parallel", "parallel"),
            vmem_limit_bytes=vmem_limit_bytes),
    )(qt, kt, vt, ql, kl, vl, amt, aml)

    # Output is written directly in the permuted (B, S, L*H) layout; this
    # reshape is metadata-only (no extra HBM round-trip, no transpose).
    return out.reshape(B, S, L, H)


# ---------------------------------------------------------------------------
# Parameter init + pure-JAX reference (for the built-in self-test)
# ---------------------------------------------------------------------------
def init_params(key, hidden, dtype=jnp.float32):
    """PyTorch-style Kaiming-uniform init for the Q/K/V Linears.
    Weights stored as (in, out) == transpose of torch's (out, in)."""
    ks = jax.random.split(key, 6)
    bound = 1.0 / math.sqrt(hidden)

    def u(k, shape):
        return jax.random.uniform(k, shape, dtype, -bound, bound)

    wq, bq = u(ks[0], (hidden, hidden)), u(ks[1], (hidden,))
    wk, bk = u(ks[2], (hidden, hidden)), u(ks[3], (hidden,))
    wv, bv = u(ks[4], (hidden, hidden)), u(ks[5], (hidden,))
    return wq, bq, wk, bk, wv, bv


def reference_forward(token_embs, label_embs, token_mask, label_mask,
                      wq, bq, wk, bk, wv, bv, num_heads):
    """Pure-JAX port of the PyTorch forward (eval mode)."""
    B, S_t, H = token_embs.shape
    L, S_l, _ = label_embs.shape
    S = S_t + S_l
    hd = H // num_heads
    tok = jnp.broadcast_to(token_embs[:, None], (B, L, S_t, H))
    lab = jnp.broadcast_to(label_embs[None], (B, L, S_l, H))
    x = jnp.concatenate([tok, lab], axis=2).reshape(B * L, S, H)
    m = jnp.concatenate(
        [jnp.broadcast_to(token_mask[:, None], (B, L, S_t)),
         jnp.broadcast_to(label_mask[None], (B, L, S_l))], axis=2
    ).reshape(B * L, S)
    am = (1.0 - m)[:, None, None, :] * -10000.0

    def split(t):
        return t.reshape(B * L, S, num_heads, hd).transpose(0, 2, 1, 3)

    q, k, v = split(x @ wq + bq), split(x @ wk + bk), split(x @ wv + bv)
    s = jnp.einsum('bhqd,bhkd->bhqk', q, k) / math.sqrt(hd) + am
    p = jax.nn.softmax(s, axis=-1)
    ctx = jnp.einsum('bhqk,bhkd->bhqd', p, v)
    ctx = ctx.transpose(0, 2, 1, 3).reshape(B * L, S, H)
    return ctx.reshape(B, L, S, H).transpose(0, 2, 1, 3)   # (B, S, L, H)


if __name__ == "__main__":
    B, S_t, H = 2, 8, 32
    L, S_l = 4, 8
    num_heads = 4

    key = jax.random.PRNGKey(0)
    k_tok, k_lab, k_p = jax.random.split(key, 3)
    token_embs = jax.random.normal(k_tok, (B, S_t, H), jnp.float32)
    label_embs = jax.random.normal(k_lab, (L, S_l, H), jnp.float32)
    # 1 = keep, 0 = padding (exercise the additive attention mask).
    token_mask = jnp.ones((B, S_t), jnp.float32).at[1, 6:].set(0.0)
    label_mask = jnp.ones((L, S_l), jnp.float32).at[2, 5:].set(0.0)

    wq, bq, wk, bk, wv, bv = init_params(k_p, H)

    with jax.default_matmul_precision("highest"):
        ref = reference_forward(token_embs, label_embs, token_mask, label_mask,
                                wq, bq, wk, bk, wv, bv, num_heads)
    ref = jax.block_until_ready(ref)

    # Full-f32 path: tight check against the pure-JAX reference.
    out_f32 = label_attn_fusion_for_token(
        token_embs, label_embs, token_mask, label_mask,
        wq, bq, wk, bk, wv, bv, num_heads=num_heads,
        compute_dtype=jnp.float32)
    out_f32 = jax.block_until_ready(out_f32)
    assert out_f32.shape == (B, S_t + S_l, L, H)
    assert jnp.allclose(out_f32, ref, atol=1e-3, rtol=1e-3)

    # Default fast path: bf16 MXU inputs, f32 accumulation, approx reciprocal.
    out_bf16 = label_attn_fusion_for_token(
        token_embs, label_embs, token_mask, label_mask,
        wq, bq, wk, bk, wv, bv, num_heads=num_heads)
    out_bf16 = jax.block_until_ready(out_bf16)
    assert out_bf16.shape == (B, S_t + S_l, L, H)
    assert jnp.allclose(out_bf16.astype(jnp.float32), ref, atol=5e-2, rtol=5e-2)

    print("KERNEL_OK")
</pallas_src>

<mosaic_0001>
module attributes {stable_mosaic.version = 11 : i64} {
  func.func @kernel(%arg0: i32, %arg1: i32, %arg2: memref<1x4x8x8xf32, #tpu.memory_space<vmem>>, %arg3: memref<1x4x8x8xf32, #tpu.memory_space<vmem>>, %arg4: memref<1x4x8x8xf32, #tpu.memory_space<vmem>>, %arg5: memref<4x4x8x8xf32, #tpu.memory_space<vmem>>, %arg6: memref<4x4x8x8xf32, #tpu.memory_space<vmem>>, %arg7: memref<4x4x8x8xf32, #tpu.memory_space<vmem>>, %arg8: memref<1x1x8xf32, #tpu.memory_space<vmem>>, %arg9: memref<4x1x8xf32, #tpu.memory_space<vmem>>, %arg10: memref<1x16x128xf32, #tpu.memory_space<vmem>>) attributes {dimension_semantics = [#tpu.dimension_semantics<parallel>, #tpu.dimension_semantics<parallel>], iteration_bounds = array<i64: 2, 1>, scalar_prefetch = 0 : i64, scratch_operands = 0 : i64, tpu.core_type = #tpu.core_type<tc>, window_params = [{transform_indices = @transform_0, window_bounds = array<i64: 1, 4, 8, 8>}, {transform_indices = @transform_1, window_bounds = array<i64: 1, 4, 8, 8>}, {transform_indices = @transform_2, window_bounds = array<i64: 1, 4, 8, 8>}, {transform_indices = @transform_3, window_bounds = array<i64: 4, 4, 8, 8>}, {transform_indices = @transform_4, window_bounds = array<i64: 4, 4, 8, 8>}, {transform_indices = @transform_5, window_bounds = array<i64: 4, 4, 8, 8>}, {transform_indices = @transform_6, window_bounds = array<i64: 1, 1, 8>}, {transform_indices = @transform_7, window_bounds = array<i64: 4, 1, 8>}, {transform_indices = @transform_8, window_bounds = array<i64: 1, 16, 128>}]} {
    %c0 = arith.constant 0 : index
    %c0_0 = arith.constant 0 : index
    %c0_1 = arith.constant 0 : index
    %c0_2 = arith.constant 0 : index
    %0 = vector.load %arg2[%c0, %c0_0, %c0_1, %c0_2] : memref<1x4x8x8xf32, #tpu.memory_space<vmem>>, vector<1x4x8x8xf32>
    %1 = vector.shape_cast %0 : vector<1x4x8x8xf32> to vector<4x8x8xf32>
    %c0_3 = arith.constant 0 : index
    %c0_4 = arith.constant 0 : index
    %c0_5 = arith.constant 0 : index
    %c0_6 = arith.constant 0 : index
    %2 = vector.load %arg3[%c0_3, %c0_4, %c0_5, %c0_6] : memref<1x4x8x8xf32, #tpu.memory_space<vmem>>, vector<1x4x8x8xf32>
    %3 = vector.shape_cast %2 : vector<1x4x8x8xf32> to vector<4x8x8xf32>
    %c0_7 = arith.constant 0 : index
    %c0_8 = arith.constant 0 : index
    %c0_9 = arith.constant 0 : index
    %c0_10 = arith.constant 0 : index
    %4 = vector.load %arg4[%c0_7, %c0_8, %c0_9, %c0_10] : memref<1x4x8x8xf32, #tpu.memory_space<vmem>>, vector<1x4x8x8xf32>
    %5 = vector.shape_cast %4 : vector<1x4x8x8xf32> to vector<4x8x8xf32>
    %c0_11 = arith.constant 0 : index
    %c0_12 = arith.constant 0 : index
    %c0_13 = arith.constant 0 : index
    %6 = vector.load %arg8[%c0_11, %c0_12, %c0_13] : memref<1x1x8xf32, #tpu.memory_space<vmem>>, vector<1x1x8xf32>
    %7 = vector.shape_cast %6 : vector<1x1x8xf32> to vector<1x8xf32>
    %c0_14 = arith.constant 0 : index
    %c0_15 = arith.constant 0 : index
    %c0_16 = arith.constant 0 : index
    %c0_17 = arith.constant 0 : index
    %8 = vector.load %arg5[%c0_14, %c0_15, %c0_16, %c0_17] : memref<4x4x8x8xf32, #tpu.memory_space<vmem>>, vector<1x4x8x8xf32>
    %9 = vector.shape_cast %8 : vector<1x4x8x8xf32> to vector<4x8x8xf32>
    %10 = tpu.concatenate %1, %9 in 1 : vector<4x8x8xf32>, vector<4x8x8xf32> -> vector<4x16x8xf32>
    %c0_18 = arith.constant 0 : index
    %c0_19 = arith.constant 0 : index
    %c0_20 = arith.constant 0 : index
    %c0_21 = arith.constant 0 : index
    %11 = vector.load %arg6[%c0_18, %c0_19, %c0_20, %c0_21] : memref<4x4x8x8xf32, #tpu.memory_space<vmem>>, vector<1x4x8x8xf32>
    %12 = vector.shape_cast %11 : vector<1x4x8x8xf32> to vector<4x8x8xf32>
    %13 = tpu.concatenate %3, %12 in 1 : vector<4x8x8xf32>, vector<4x8x8xf32> -> vector<4x16x8xf32>
    %c0_22 = arith.constant 0 : index
    %c0_23 = arith.constant 0 : index
    %c0_24 = arith.constant 0 : index
    %c0_25 = arith.constant 0 : index
    %14 = vector.load %arg7[%c0_22, %c0_23, %c0_24, %c0_25] : memref<4x4x8x8xf32, #tpu.memory_space<vmem>>, vector<1x4x8x8xf32>
    %15 = vector.shape_cast %14 : vector<1x4x8x8xf32> to vector<4x8x8xf32>
    %16 = tpu.concatenate %5, %15 in 1 : vector<4x8x8xf32>, vector<4x8x8xf32> -> vector<4x16x8xf32>
    %c0_26 = arith.constant 0 : index
    %c0_27 = arith.constant 0 : index
    %c0_28 = arith.constant 0 : index
    %17 = vector.load %arg9[%c0_26, %c0_27, %c0_28] : memref<4x1x8xf32, #tpu.memory_space<vmem>>, vector<1x1x8xf32>
    %18 = vector.shape_cast %17 : vector<1x1x8xf32> to vector<1x8xf32>
    %19 = tpu.concatenate %7, %18 in 1 : vector<1x8xf32>, vector<1x8xf32> -> vector<1x16xf32>
    %20 = vector.extract_strided_slice %10 {offsets = [0, 0, 0], sizes = [1, 16, 8], strides = [1, 1, 1]} : vector<4x16x8xf32> to vector<1x16x8xf32>
    %21 = vector.shape_cast %20 : vector<1x16x8xf32> to vector<16x8xf32>
    %22 = vector.extract_strided_slice %13 {offsets = [0, 0, 0], sizes = [1, 16, 8], strides = [1, 1, 1]} : vector<4x16x8xf32> to vector<1x16x8xf32>
    %23 = vector.shape_cast %22 : vector<1x16x8xf32> to vector<16x8xf32>
    %cst = arith.constant dense<0.000000e+00> : vector<16x16xf32>
    %24 = tpu.matmul %21, %23, %cst {dimension_numbers = #tpu.dot_dimension_numbers<[1], [1], [0], [0], [0, 0, 1, 0], [], []>} : vector<16x8xf32>, vector<16x8xf32>, vector<16x16xf32> -> vector<16x16xf32>
    %25 = vector.broadcast %19 : vector<1x16xf32> to vector<16x16xf32>
    %26 = arith.addf %24, %25 : vector<16x16xf32>
    %cst_29 = arith.constant dense<0xFF800000> : vector<16xf32>
    %27 = vector.multi_reduction <maximumf>, %26, %cst_29 [1] : vector<16x16xf32> to vector<16xf32>
    %28 = vector.shape_cast %27 : vector<16xf32> to vector<16x1xf32>
    %29 = vector.broadcast %28 : vector<16x1xf32> to vector<16x16xf32>
    %30 = arith.subf %26, %29 : vector<16x16xf32>
    %31 = math.exp %30 : vector<16x16xf32>
    %cst_30 = arith.constant dense<0.000000e+00> : vector<16xf32>
    %32 = vector.multi_reduction <add>, %31, %cst_30 [1] : vector<16x16xf32> to vector<16xf32>
    %33 = vector.shape_cast %32 : vector<16xf32> to vector<16x1xf32>
    %34 = tpu.reciprocal %33 : vector<16x1xf32> -> vector<16x1xf32>
    %35 = vector.broadcast %34 : vector<16x1xf32> to vector<16x16xf32>
    %36 = arith.mulf %31, %35 : vector<16x16xf32>
    %37 = vector.extract_strided_slice %16 {offsets = [0, 0, 0], sizes = [1, 16, 8], strides = [1, 1, 1]} : vector<4x16x8xf32> to vector<1x16x8xf32>
    %38 = vector.shape_cast %37 : vector<1x16x8xf32> to vector<16x8xf32>
    %cst_31 = arith.constant dense<0.000000e+00> : vector<16x8xf32>
    %39 = tpu.matmul %36, %38, %cst_31 {dimension_numbers = #tpu.dot_dimension_numbers<[1], [0], [0], [1], [0, 0, 1, 1], [], []>} : vector<16x16xf32>, vector<16x8xf32>, vector<16x8xf32> -> vector<16x8xf32>
    %c0_32 = arith.constant 0 : index
    %c0_33 = arith.constant 0 : index
    %c0_34 = arith.constant 0 : index
    %40 = vector.load %arg10[%c0_32, %c0_33, %c0_34] : memref<1x16x128xf32, #tpu.memory_space<vmem>>, vector<1x16x8xf32>
    %41 = vector.shape_cast %40 : vector<1x16x8xf32> to vector<16x8xf32>
    %42 = vector.shape_cast %39 : vector<16x8xf32> to vector<1x16x8xf32>
    tpu.vector_store %arg10[%c0_32, %c0_33, %c0_34], %42 {strides = array<i32>} : memref<1x16x128xf32, #tpu.memory_space<vmem>>, vector<1x16x8xf32>,
    %43 = vector.extract_strided_slice %10 {offsets = [1, 0, 0], sizes = [1, 16, 8], strides = [1, 1, 1]} : vector<4x16x8xf32> to vector<1x16x8xf32>
    %44 = vector.shape_cast %43 : vector<1x16x8xf32> to vector<16x8xf32>
    %45 = vector.extract_strided_slice %13 {offsets = [1, 0, 0], sizes = [1, 16, 8], strides = [1, 1, 1]} : vector<4x16x8xf32> to vector<1x16x8xf32>
    %46 = vector.shape_cast %45 : vector<1x16x8xf32> to vector<16x8xf32>
    %cst_35 = arith.constant dense<0.000000e+00> : vector<16x16xf32>
    %47 = tpu.matmul %44, %46, %cst_35 {dimension_numbers = #tpu.dot_dimension_numbers<[1], [1], [0], [0], [0, 0, 1, 0], [], []>} : vector<16x8xf32>, vector<16x8xf32>, vector<16x16xf32> -> vector<16x16xf32>
    %48 = vector.broadcast %19 : vector<1x16xf32> to vector<16x16xf32>
    %49 = arith.addf %47, %48 : vector<16x16xf32>
    %cst_36 = arith.constant dense<0xFF800000> : vector<16xf32>
    %50 = vector.multi_reduction <maximumf>, %49, %cst_36 [1] : vector<16x16xf32> to vector<16xf32>
    %51 = vector.shape_cast %50 : vector<16xf32> to vector<16x1xf32>
    %52 = vector.broadcast %51 : vector<16x1xf32> to vector<16x16xf32>
    %53 = arith.subf %49, %52 : vector<16x16xf32>
    %54 = math.exp %53 : vector<16x16xf32>
    %cst_37 = arith.constant dense<0.000000e+00> : vector<16xf32>
    %55 = vector.multi_reduction <add>, %54, %cst_37 [1] : vector<16x16xf32> to vector<16xf32>
    %56 = vector.shape_cast %55 : vector<16xf32> to vector<16x1xf32>
    %57 = tpu.reciprocal %56 : vector<16x1xf32> -> vector<16x1xf32>
    %58 = vector.broadcast %57 : vector<16x1xf32> to vector<16x16xf32>
    %59 = arith.mulf %54, %58 : vector<16x16xf32>
    %60 = vector.extract_strided_slice %16 {offsets = [1, 0, 0], sizes = [1, 16, 8], strides = [1, 1, 1]} : vector<4x16x8xf32> to vector<1x16x8xf32>
    %61 = vector.shape_cast %60 : vector<1x16x8xf32> to vector<16x8xf32>
    %cst_38 = arith.constant dense<0.000000e+00> : vector<16x8xf32>
    %62 = tpu.matmul %59, %61, %cst_38 {dimension_numbers = #tpu.dot_dimension_numbers<[1], [0], [0], [1], [0, 0, 1, 1], [], []>} : vector<16x16xf32>, vector<16x8xf32>, vector<16x8xf32> -> vector<16x8xf32>
    %c0_39 = arith.constant 0 : index
    %c0_40 = arith.constant 0 : index
    %c8 = arith.constant 8 : index
    %63 = vector.load %arg10[%c0_39, %c0_40, %c8] : memref<1x16x128xf32, #tpu.memory_space<vmem>>, vector<1x16x8xf32>
    %64 = vector.shape_cast %63 : vector<1x16x8xf32> to vector<16x8xf32>
    %65 = vector.shape_cast %62 : vector<16x8xf32> to vector<1x16x8xf32>
    tpu.vector_store %arg10[%c0_39, %c0_40, %c8], %65 {strides = array<i32>} : memref<1x16x128xf32, #tpu.memory_space<vmem>>, vector<1x16x8xf32>,
    %66 = vector.extract_strided_slice %10 {offsets = [2, 0, 0], sizes = [1, 16, 8], strides = [1, 1, 1]} : vector<4x16x8xf32> to vector<1x16x8xf32>
    %67 = vector.shape_cast %66 : vector<1x16x8xf32> to vector<16x8xf32>
    %68 = vector.extract_strided_slice %13 {offsets = [2, 0, 0], sizes = [1, 16, 8], strides = [1, 1, 1]} : vector<4x16x8xf32> to vector<1x16x8xf32>
    %69 = vector.shape_cast %68 : vector<1x16x8xf32> to vector<16x8xf32>
    %cst_41 = arith.constant dense<0.000000e+00> : vector<16x16xf32>
    %70 = tpu.matmul %67, %69, %cst_41 {dimension_numbers = #tpu.dot_dimension_numbers<[1], [1], [0], [0], [0, 0, 1, 0], [], []>} : vector<16x8xf32>, vector<16x8xf32>, vector<16x16xf32> -> vector<16x16xf32>
    %71 = vector.broadcast %19 : vector<1x16xf32> to vector<16x16xf32>
    %72 = arith.addf %70, %71 : vector<16x16xf32>
    %cst_42 = arith.constant dense<0xFF800000> : vector<16xf32>
    %73 = vector.multi_reduction <maximumf>, %72, %cst_42 [1] : vector<16x16xf32> to vector<16xf32>
    %74 = vector.shape_cast %73 : vector<16xf32> to vector<16x1xf32>
    %75 = vector.broadcast %74 : vector<16x1xf32> to vector<16x16xf32>
    %76 = arith.subf %72, %75 : vector<16x16xf32>
    %77 = math.exp %76 : vector<16x16xf32>
    %cst_43 = arith.constant dense<0.000000e+00> : vector<16xf32>
    %78 = vector.multi_reduction <add>, %77, %cst_43 [1] : vector<16x16xf32> to vector<16xf32>
    %79 = vector.shape_cast %78 : vector<16xf32> to vector<16x1xf32>
    %80 = tpu.reciprocal %79 : vector<16x1xf32> -> vector<16x1xf32>
    %81 = vector.broadcast %80 : vector<16x1xf32> to vector<16x16xf32>
    %82 = arith.mulf %77, %81 : vector<16x16xf32>
    %83 = vector.extract_strided_slice %16 {offsets = [2, 0, 0], sizes = [1, 16, 8], strides = [1, 1, 1]} : vector<4x16x8xf32> to vector<1x16x8xf32>
    %84 = vector.shape_cast %83 : vector<1x16x8xf32> to vector<16x8xf32>
    %cst_44 = arith.constant dense<0.000000e+00> : vector<16x8xf32>
    %85 = tpu.matmul %82, %84, %cst_44 {dimension_numbers = #tpu.dot_dimension_numbers<[1], [0], [0], [1], [0, 0, 1, 1], [], []>} : vector<16x16xf32>, vector<16x8xf32>, vector<16x8xf32> -> vector<16x8xf32>
    %c0_45 = arith.constant 0 : index
    %c0_46 = arith.constant 0 : index
    %c16 = arith.constant 16 : index
    %86 = vector.load %arg10[%c0_45, %c0_46, %c16] : memref<1x16x128xf32, #tpu.memory_space<vmem>>, vector<1x16x8xf32>
    %87 = vector.shape_cast %86 : vector<1x16x8xf32> to vector<16x8xf32>
    %88 = vector.shape_cast %85 : vector<16x8xf32> to vector<1x16x8xf32>
    tpu.vector_store %arg10[%c0_45, %c0_46, %c16], %88 {strides = array<i32>} : memref<1x16x128xf32, #tpu.memory_space<vmem>>, vector<1x16x8xf32>,
    %89 = vector.extract_strided_slice %10 {offsets = [3, 0, 0], sizes = [1, 16, 8], strides = [1, 1, 1]} : vector<4x16x8xf32> to vector<1x16x8xf32>
    %90 = vector.shape_cast %89 : vector<1x16x8xf32> to vector<16x8xf32>
    %91 = vector.extract_strided_slice %13 {offsets = [3, 0, 0], sizes = [1, 16, 8], strides = [1, 1, 1]} : vector<4x16x8xf32> to vector<1x16x8xf32>
    %92 = vector.shape_cast %91 : vector<1x16x8xf32> to vector<16x8xf32>
    %cst_47 = arith.constant dense<0.000000e+00> : vector<16x16xf32>
    %93 = tpu.matmul %90, %92, %cst_47 {dimension_numbers = #tpu.dot_dimension_numbers<[1], [1], [0], [0], [0, 0, 1, 0], [], []>} : vector<16x8xf32>, vector<16x8xf32>, vector<16x16xf32> -> vector<16x16xf32>
    %94 = vector.broadcast %19 : vector<1x16xf32> to vector<16x16xf32>
    %95 = arith.addf %93, %94 : vector<16x16xf32>
    %cst_48 = arith.constant dense<0xFF800000> : vector<16xf32>
    %96 = vector.multi_reduction <maximumf>, %95, %cst_48 [1] : vector<16x16xf32> to vector<16xf32>
    %97 = vector.shape_cast %96 : vector<16xf32> to vector<16x1xf32>
    %98 = vector.broadcast %97 : vector<16x1xf32> to vector<16x16xf32>
    %99 = arith.subf %95, %98 : vector<16x16xf32>
    %100 = math.exp %99 : vector<16x16xf32>
    %cst_49 = arith.constant dense<0.000000e+00> : vector<16xf32>
    %101 = vector.multi_reduction <add>, %100, %cst_49 [1] : vector<16x16xf32> to vector<16xf32>
    %102 = vector.shape_cast %101 : vector<16xf32> to vector<16x1xf32>
    %103 = tpu.reciprocal %102 : vector<16x1xf32> -> vector<16x1xf32>
    %104 = vector.broadcast %103 : vector<16x1xf32> to vector<16x16xf32>
    %105 = arith.mulf %100, %104 : vector<16x16xf32>
    %106 = vector.extract_strided_slice %16 {offsets = [3, 0, 0], sizes = [1, 16, 8], strides = [1, 1, 1]} : vector<4x16x8xf32> to vector<1x16x8xf32>
    %107 = vector.shape_cast %106 : vector<1x16x8xf32> to vector<16x8xf32>
    %cst_50 = arith.constant dense<0.000000e+00> : vector<16x8xf32>
    %108 = tpu.matmul %105, %107, %cst_50 {dimension_numbers = #tpu.dot_dimension_numbers<[1], [0], [0], [1], [0, 0, 1, 1], [], []>} : vector<16x16xf32>, vector<16x8xf32>, vector<16x8xf32> -> vector<16x8xf32>
    %c0_51 = arith.constant 0 : index
    %c0_52 = arith.constant 0 : index
    %c24 = arith.constant 24 : index
    %109 = vector.load %arg10[%c0_51, %c0_52, %c24] : memref<1x16x128xf32, #tpu.memory_space<vmem>>, vector<1x16x8xf32>
    %110 = vector.shape_cast %109 : vector<1x16x8xf32> to vector<16x8xf32>
    %111 = vector.shape_cast %108 : vector<16x8xf32> to vector<1x16x8xf32>
    tpu.vector_store %arg10[%c0_51, %c0_52, %c24], %111 {strides = array<i32>} : memref<1x16x128xf32, #tpu.memory_space<vmem>>, vector<1x16x8xf32>,
    %c1 = arith.constant 1 : index
    %c0_53 = arith.constant 0 : index
    %c0_54 = arith.constant 0 : index
    %c0_55 = arith.constant 0 : index
    %112 = vector.load %arg5[%c1, %c0_53, %c0_54, %c0_55] : memref<4x4x8x8xf32, #tpu.memory_space<vmem>>, vector<1x4x8x8xf32>
    %113 = vector.shape_cast %112 : vector<1x4x8x8xf32> to vector<4x8x8xf32>
    %114 = tpu.concatenate %1, %113 in 1 : vector<4x8x8xf32>, vector<4x8x8xf32> -> vector<4x16x8xf32>
    %c1_56 = arith.constant 1 : index
    %c0_57 = arith.constant 0 : index
    %c0_58 = arith.constant 0 : index
    %c0_59 = arith.constant 0 : index
    %115 = vector.load %arg6[%c1_56, %c0_57, %c0_58, %c0_59] : memref<4x4x8x8xf32, #tpu.memory_space<vmem>>, vector<1x4x8x8xf32>
    %116 = vector.shape_cast %115 : vector<1x4x8x8xf32> to vector<4x8x8xf32>
    %117 = tpu.concatenate %3, %116 in 1 : vector<4x8x8xf32>, vector<4x8x8xf32> -> vector<4x16x8xf32>
    %c1_60 = arith.constant 1 : index
    %c0_61 = arith.constant 0 : index
    %c0_62 = arith.constant 0 : index
    %c0_63 = arith.constant 0 : index
    %118 = vector.load %arg7[%c1_60, %c0_61, %c0_62, %c0_63] : memref<4x4x8x8xf32, #tpu.memory_space<vmem>>, vector<1x4x8x8xf32>
    %119 = vector.shape_cast %118 : vector<1x4x8x8xf32> to vector<4x8x8xf32>
    %120 = tpu.concatenate %5, %119 in 1 : vector<4x8x8xf32>, vector<4x8x8xf32> -> vector<4x16x8xf32>
    %c1_64 = arith.constant 1 : index
    %c0_65 = arith.constant 0 : index
    %c0_66 = arith.constant 0 : index
    %121 = vector.load %arg9[%c1_64, %c0_65, %c0_66] : memref<4x1x8xf32, #tpu.memory_space<vmem>>, vector<1x1x8xf32>
    %122 = vector.shape_cast %121 : vector<1x1x8xf32> to vector<1x8xf32>
    %123 = tpu.concatenate %7, %122 in 1 : vector<1x8xf32>, vector<1x8xf32> -> vector<1x16xf32>
    %124 = vector.extract_strided_slice %114 {offsets = [0, 0, 0], sizes = [1, 16, 8], strides = [1, 1, 1]} : vector<4x16x8xf32> to vector<1x16x8xf32>
    %125 = vector.shape_cast %124 : vector<1x16x8xf32> to vector<16x8xf32>
    %126 = vector.extract_strided_slice %117 {offsets = [0, 0, 0], sizes = [1, 16, 8], strides = [1, 1, 1]} : vector<4x16x8xf32> to vector<1x16x8xf32>
    %127 = vector.shape_cast %126 : vector<1x16x8xf32> to vector<16x8xf32>
    %cst_67 = arith.constant dense<0.000000e+00> : vector<16x16xf32>
    %128 = tpu.matmul %125, %127, %cst_67 {dimension_numbers = #tpu.dot_dimension_numbers<[1], [1], [0], [0], [0, 0, 1, 0], [], []>} : vector<16x8xf32>, vector<16x8xf32>, vector<16x16xf32> -> vector<16x16xf32>
    %129 = vector.broadcast %123 : vector<1x16xf32> to vector<16x16xf32>
    %130 = arith.addf %128, %129 : vector<16x16xf32>
    %cst_68 = arith.constant dense<0xFF800000> : vector<16xf32>
    %131 = vector.multi_reduction <maximumf>, %130, %cst_68 [1] : vector<16x16xf32> to vector<16xf32>
    %132 = vector.shape_cast %131 : vector<16xf32> to vector<16x1xf32>
    %133 = vector.broadcast %132 : vector<16x1xf32> to vector<16x16xf32>
    %134 = arith.subf %130, %133 : vector<16x16xf32>
    %135 = math.exp %134 : vector<16x16xf32>
    %cst_69 = arith.constant dense<0.000000e+00> : vector<16xf32>
    %136 = vector.multi_reduction <add>, %135, %cst_69 [1] : vector<16x16xf32> to vector<16xf32>
    %137 = vector.shape_cast %136 : vector<16xf32> to vector<16x1xf32>
    %138 = tpu.reciprocal %137 : vector<16x1xf32> -> vector<16x1xf32>
    %139 = vector.broadcast %138 : vector<16x1xf32> to vector<16x16xf32>
    %140 = arith.mulf %135, %139 : vector<16x16xf32>
    %141 = vector.extract_strided_slice %120 {offsets = [0, 0, 0], sizes = [1, 16, 8], strides = [1, 1, 1]} : vector<4x16x8xf32> to vector<1x16x8xf32>
    %142 = vector.shape_cast %141 : vector<1x16x8xf32> to vector<16x8xf32>
    %cst_70 = arith.constant dense<0.000000e+00> : vector<16x8xf32>
    %143 = tpu.matmul %140, %142, %cst_70 {dimension_numbers = #tpu.dot_dimension_numbers<[1], [0], [0], [1], [0, 0, 1, 1], [], []>} : vector<16x16xf32>, vector<16x8xf32>, vector<16x8xf32> -> vector<16x8xf32>
    %c0_71 = arith.constant 0 : index
    %c0_72 = arith.constant 0 : index
    %c32 = arith.constant 32 : index
    %144 = vector.load %arg10[%c0_71, %c0_72, %c32] : memref<1x16x128xf32, #tpu.memory_space<vmem>>, vector<1x16x8xf32>
    %145 = vector.shape_cast %144 : vector<1x16x8xf32> to vector<16x8xf32>
    %146 = vector.shape_cast %143 : vector<16x8xf32> to vector<1x16x8xf32>
    tpu.vector_store %arg10[%c0_71, %c0_72, %c32], %146 {strides = array<i32>} : memref<1x16x128xf32, #tpu.memory_space<vmem>>, vector<1x16x8xf32>,
    %147 = vector.extract_strided_slice %114 {offsets = [1, 0, 0], sizes = [1, 16, 8], strides = [1, 1, 1]} : vector<4x16x8xf32> to vector<1x16x8xf32>
    %148 = vector.shape_cast %147 : vector<1x16x8xf32> to vector<16x8xf32>
    %149 = vector.extract_strided_slice %117 {offsets = [1, 0, 0], sizes = [1, 16, 8], strides = [1, 1, 1]} : vector<4x16x8xf32> to vector<1x16x8xf32>
    %150 = vector.shape_cast %149 : vector<1x16x8xf32> to vector<16x8xf32>
    %cst_73 = arith.constant dense<0.000000e+00> : vector<16x16xf32>
    %151 = tpu.matmul %148, %150, %cst_73 {dimension_numbers = #tpu.dot_dimension_numbers<[1], [1], [0], [0], [0, 0, 1, 0], [], []>} : vector<16x8xf32>, vector<16x8xf32>, vector<16x16xf32> -> vector<16x16xf32>
    %152 = vector.broadcast %123 : vector<1x16xf32> to vector<16x16xf32>
    %153 = arith.addf %151, %152 : vector<16x16xf32>
    %cst_74 = arith.constant dense<0xFF800000> : vector<16xf32>
    %154 = vector.multi_reduction <maximumf>, %153, %cst_74 [1] : vector<16x16xf32> to vector<16xf32>
    %155 = vector.shape_cast %154 : vector<16xf32> to vector<16x1xf32>
    %156 = vector.broadcast %155 : vector<16x1xf32> to vector<16x16xf32>
    %157 = arith.subf %153, %156 : vector<16x16xf32>
    %158 = math.exp %157 : vector<16x16xf32>
    %cst_75 = arith.constant dense<0.000000e+00> : vector<16xf32>
    %159 = vector.multi_reduction <add>, %158, %cst_75 [1] : vector<16x16xf32> to vector<16xf32>
    %160 = vector.shape_cast %159 : vector<16xf32> to vector<16x1xf32>
    %161 = tpu.reciprocal %160 : vector<16x1xf32> -> vector<16x1xf32>
    %162 = vector.broadcast %161 : vector<16x1xf32> to vector<16x16xf32>
    %163 = arith.mulf %158, %162 : vector<16x16xf32>
    %164 = vector.extract_strided_slice %120 {offsets = [1, 0, 0], sizes = [1, 16, 8], strides = [1, 1, 1]} : vector<4x16x8xf32> to vector<1x16x8xf32>
    %165 = vector.shape_cast %164 : vector<1x16x8xf32> to vector<16x8xf32>
    %cst_76 = arith.constant dense<0.000000e+00> : vector<16x8xf32>
    %166 = tpu.matmul %163, %165, %cst_76 {dimension_numbers = #tpu.dot_dimension_numbers<[1], [0], [0], [1], [0, 0, 1, 1], [], []>} : vector<16x16xf32>, vector<16x8xf32>, vector<16x8xf32> -> vector<16x8xf32>
    %c0_77 = arith.constant 0 : index
    %c0_78 = arith.constant 0 : index
    %c40 = arith.constant 40 : index
    %167 = vector.load %arg10[%c0_77, %c0_78, %c40] : memref<1x16x128xf32, #tpu.memory_space<vmem>>, vector<1x16x8xf32>
    %168 = vector.shape_cast %167 : vector<1x16x8xf32> to vector<16x8xf32>
    %169 = vector.shape_cast %166 : vector<16x8xf32> to vector<1x16x8xf32>
    tpu.vector_store %arg10[%c0_77, %c0_78, %c40], %169 {strides = array<i32>} : memref<1x16x128xf32, #tpu.memory_space<vmem>>, vector<1x16x8xf32>,
    %170 = vector.extract_strided_slice %114 {offsets = [2, 0, 0], sizes = [1, 16, 8], strides = [1, 1, 1]} : vector<4x16x8xf32> to vector<1x16x8xf32>
    %171 = vector.shape_cast %170 : vector<1x16x8xf32> to vector<16x8xf32>
    %172 = vector.extract_strided_slice %117 {offsets = [2, 0, 0], sizes = [1, 16, 8], strides = [1, 1, 1]} : vector<4x16x8xf32> to vector<1x16x8xf32>
    %173 = vector.shape_cast %172 : vector<1x16x8xf32> to vector<16x8xf32>
    %cst_79 = arith.constant dense<0.000000e+00> : vector<16x16xf32>
    %174 = tpu.matmul %171, %173, %cst_79 {dimension_numbers = #tpu.dot_dimension_numbers<[1], [1], [0], [0], [0, 0, 1, 0], [], []>} : vector<16x8xf32>, vector<16x8xf32>, vector<16x16xf32> -> vector<16x16xf32>
    %175 = vector.broadcast %123 : vector<1x16xf32> to vector<16x16xf32>
    %176 = arith.addf %174, %175 : vector<16x16xf32>
    %cst_80 = arith.constant dense<0xFF800000> : vector<16xf32>
    %177 = vector.multi_reduction <maximumf>, %176, %cst_80 [1] : vector<16x16xf32> to vector<16xf32>
    %178 = vector.shape_cast %177 : vector<16xf32> to vector<16x1xf32>
    %179 = vector.broadcast %178 : vector<16x1xf32> to vector<16x16xf32>
    %180 = arith.subf %176, %179 : vector<16x16xf32>
    %181 = math.exp %180 : vector<16x16xf32>
    %cst_81 = arith.constant dense<0.000000e+00> : vector<16xf32>
    %182 = vector.multi_reduction <add>, %181, %cst_81 [1] : vector<16x16xf32> to vector<16xf32>
    %183 = vector.shape_cast %182 : vector<16xf32> to vector<16x1xf32>
    %184 = tpu.reciprocal %183 : vector<16x1xf32> -> vector<16x1xf32>
    %185 = vector.broadcast %184 : vector<16x1xf32> to vector<16x16xf32>
    %186 = arith.mulf %181, %185 : vector<16x16xf32>
    %187 = vector.extract_strided_slice %120 {offsets = [2, 0, 0], sizes = [1, 16, 8], strides = [1, 1, 1]} : vector<4x16x8xf32> to vector<1x16x8xf32>
    %188 = vector.shape_cast %187 : vector<1x16x8xf32> to vector<16x8xf32>
    %cst_82 = arith.constant dense<0.000000e+00> : vector<16x8xf32>
    %189 = tpu.matmul %186, %188, %cst_82 {dimension_numbers = #tpu.dot_dimension_numbers<[1], [0], [0], [1], [0, 0, 1, 1], [], []>} : vector<16x16xf32>, vector<16x8xf32>, vector<16x8xf32> -> vector<16x8xf32>
    %c0_83 = arith.constant 0 : index
    %c0_84 = arith.constant 0 : index
    %c48 = arith.constant 48 : index
    %190 = vector.load %arg10[%c0_83, %c0_84, %c48] : memref<1x16x128xf32, #tpu.memory_space<vmem>>, vector<1x16x8xf32>
    %191 = vector.shape_cast %190 : vector<1x16x8xf32> to vector<16x8xf32>
    %192 = vector.shape_cast %189 : vector<16x8xf32> to vector<1x16x8xf32>
    tpu.vector_store %arg10[%c0_83, %c0_84, %c48], %192 {strides = array<i32>} : memref<1x16x128xf32, #tpu.memory_space<vmem>>, vector<1x16x8xf32>,
    %193 = vector.extract_strided_slice %114 {offsets = [3, 0, 0], sizes = [1, 16, 8], strides = [1, 1, 1]} : vector<4x16x8xf32> to vector<1x16x8xf32>
    %194 = vector.shape_cast %193 : vector<1x16x8xf32> to vector<16x8xf32>
    %195 = vector.extract_strided_slice %117 {offsets = [3, 0, 0], sizes = [1, 16, 8], strides = [1, 1, 1]} : vector<4x16x8xf32> to vector<1x16x8xf32>
    %196 = vector.shape_cast %195 : vector<1x16x8xf32> to vector<16x8xf32>
    %cst_85 = arith.constant dense<0.000000e+00> : vector<16x16xf32>
    %197 = tpu.matmul %194, %196, %cst_85 {dimension_numbers = #tpu.dot_dimension_numbers<[1], [1], [0], [0], [0, 0, 1, 0], [], []>} : vector<16x8xf32>, vector<16x8xf32>, vector<16x16xf32> -> vector<16x16xf32>
    %198 = vector.broadcast %123 : vector<1x16xf32> to vector<16x16xf32>
    %199 = arith.addf %197, %198 : vector<16x16xf32>
    %cst_86 = arith.constant dense<0xFF800000> : vector<16xf32>
    %200 = vector.multi_reduction <maximumf>, %199, %cst_86 [1] : vector<16x16xf32> to vector<16xf32>
    %201 = vector.shape_cast %200 : vector<16xf32> to vector<16x1xf32>
    %202 = vector.broadcast %201 : vector<16x1xf32> to vector<16x16xf32>
    %203 = arith.subf %199, %202 : vector<16x16xf32>
    %204 = math.exp %203 : vector<16x16xf32>
    %cst_87 = arith.constant dense<0.000000e+00> : vector<16xf32>
    %205 = vector.multi_reduction <add>, %204, %cst_87 [1] : vector<16x16xf32> to vector<16xf32>
    %206 = vector.shape_cast %205 : vector<16xf32> to vector<16x1xf32>
    %207 = tpu.reciprocal %206 : vector<16x1xf32> -> vector<16x1xf32>
    %208 = vector.broadcast %207 : vector<16x1xf32> to vector<16x16xf32>
    %209 = arith.mulf %204, %208 : vector<16x16xf32>
    %210 = vector.extract_strided_slice %120 {offsets = [3, 0, 0], sizes = [1, 16, 8], strides = [1, 1, 1]} : vector<4x16x8xf32> to vector<1x16x8xf32>
    %211 = vector.shape_cast %210 : vector<1x16x8xf32> to vector<16x8xf32>
    %cst_88 = arith.constant dense<0.000000e+00> : vector<16x8xf32>
    %212 = tpu.matmul %209, %211, %cst_88 {dimension_numbers = #tpu.dot_dimension_numbers<[1], [0], [0], [1], [0, 0, 1, 1], [], []>} : vector<16x16xf32>, vector<16x8xf32>, vector<16x8xf32> -> vector<16x8xf32>
    %c0_89 = arith.constant 0 : index
    %c0_90 = arith.constant 0 : index
    %c56 = arith.constant 56 : index
    %213 = vector.load %arg10[%c0_89, %c0_90, %c56] : memref<1x16x128xf32, #tpu.memory_space<vmem>>, vector<1x16x8xf32>
    %214 = vector.shape_cast %213 : vector<1x16x8xf32> to vector<16x8xf32>
    %215 = vector.shape_cast %212 : vector<16x8xf32> to vector<1x16x8xf32>
    tpu.vector_store %arg10[%c0_89, %c0_90, %c56], %215 {strides = array<i32>} : memref<1x16x128xf32, #tpu.memory_space<vmem>>, vector<1x16x8xf32>,
    %c2 = arith.constant 2 : index
    %c0_91 = arith.constant 0 : index
    %c0_92 = arith.constant 0 : index
    %c0_93 = arith.constant 0 : index
    %216 = vector.load %arg5[%c2, %c0_91, %c0_92, %c0_93] : memref<4x4x8x8xf32, #tpu.memory_space<vmem>>, vector<1x4x8x8xf32>
    %217 = vector.shape_cast %216 : vector<1x4x8x8xf32> to vector<4x8x8xf32>
    %218 = tpu.concatenate %1, %217 in 1 : vector<4x8x8xf32>, vector<4x8x8xf32> -> vector<4x16x8xf32>
    %c2_94 = arith.constant 2 : index
    %c0_95 = arith.constant 0 : index
    %c0_96 = arith.constant 0 : index
    %c0_97 = arith.constant 0 : index
    %219 = vector.load %arg6[%c2_94, %c0_95, %c0_96, %c0_97] : memref<4x4x8x8xf32, #tpu.memory_space<vmem>>, vector<1x4x8x8xf32>
    %220 = vector.shape_cast %219 : vector<1x4x8x8xf32> to vector<4x8x8xf32>
    %221 = tpu.concatenate %3, %220 in 1 : vector<4x8x8xf32>, vector<4x8x8xf32> -> vector<4x16x8xf32>
    %c2_98 = arith.constant 2 : index
    %c0_99 = arith.constant 0 : index
    %c0_100 = arith.constant 0 : index
    %c0_101 = arith.constant 0 : index
    %222 = vector.load %arg7[%c2_98, %c0_99, %c0_100, %c0_101] : memref<4x4x8x8xf32, #tpu.memory_space<vmem>>, vector<1x4x8x8xf32>
    %223 = vector.shape_cast %222 : vector<1x4x8x8xf32> to vector<4x8x8xf32>
    %224 = tpu.concatenate %5, %223 in 1 : vector<4x8x8xf32>, vector<4x8x8xf32> -> vector<4x16x8xf32>
    %c2_102 = arith.constant 2 : index
    %c0_103 = arith.constant 0 : index
    %c0_104 = arith.constant 0 : index
    %225 = vector.load %arg9[%c2_102, %c0_103, %c0_104] : memref<4x1x8xf32, #tpu.memory_space<vmem>>, vector<1x1x8xf32>
    %226 = vector.shape_cast %225 : vector<1x1x8xf32> to vector<1x8xf32>
    %227 = tpu.concatenate %7, %226 in 1 : vector<1x8xf32>, vector<1x8xf32> -> vector<1x16xf32>
    %228 = vector.extract_strided_slice %218 {offsets = [0, 0, 0], sizes = [1, 16, 8], strides = [1, 1, 1]} : vector<4x16x8xf32> to vector<1x16x8xf32>
    %229 = vector.shape_cast %228 : vector<1x16x8xf32> to vector<16x8xf32>
    %230 = vector.extract_strided_slice %221 {offsets = [0, 0, 0], sizes = [1, 16, 8], strides = [1, 1, 1]} : vector<4x16x8xf32> to vector<1x16x8xf32>
    %231 = vector.shape_cast %230 : vector<1x16x8xf32> to vector<16x8xf32>
    %cst_105 = arith.constant dense<0.000000e+00> : vector<16x16xf32>
    %232 = tpu.matmul %229, %231, %cst_105 {dimension_numbers = #tpu.dot_dimension_numbers<[1], [1], [0], [0], [0, 0, 1, 0], [], []>} : vector<16x8xf32>, vector<16x8xf32>, vector<16x16xf32> -> vector<16x16xf32>
    %233 = vector.broadcast %227 : vector<1x16xf32> to vector<16x16xf32>
    %234 = arith.addf %232, %233 : vector<16x16xf32>
    %cst_106 = arith.constant dense<0xFF800000> : vector<16xf32>
    %235 = vector.multi_reduction <maximumf>, %234, %cst_106 [1] : vector<16x16xf32> to vector<16xf32>
    %236 = vector.shape_cast %235 : vector<16xf32> to vector<16x1xf32>
    %237 = vector.broadcast %236 : vector<16x1xf32> to vector<16x16xf32>
    %238 = arith.subf %234, %237 : vector<16x16xf32>
    %239 = math.exp %238 : vector<16x16xf32>
    %cst_107 = arith.constant dense<0.000000e+00> : vector<16xf32>
    %240 = vector.multi_reduction <add>, %239, %cst_107 [1] : vector<16x16xf32> to vector<16xf32>
    %241 = vector.shape_cast %240 : vector<16xf32> to vector<16x1xf32>
    %242 = tpu.reciprocal %241 : vector<16x1xf32> -> vector<16x1xf32>
    %243 = vector.broadcast %242 : vector<16x1xf32> to vector<16x16xf32>
    %244 = arith.mulf %239, %243 : vector<16x16xf32>
    %245 = vector.extract_strided_slice %224 {offsets = [0, 0, 0], sizes = [1, 16, 8], strides = [1, 1, 1]} : vector<4x16x8xf32> to vector<1x16x8xf32>
    %246 = vector.shape_cast %245 : vector<1x16x8xf32> to vector<16x8xf32>
    %cst_108 = arith.constant dense<0.000000e+00> : vector<16x8xf32>
    %247 = tpu.matmul %244, %246, %cst_108 {dimension_numbers = #tpu.dot_dimension_numbers<[1], [0], [0], [1], [0, 0, 1, 1], [], []>} : vector<16x16xf32>, vector<16x8xf32>, vector<16x8xf32> -> vector<16x8xf32>
    %c0_109 = arith.constant 0 : index
    %c0_110 = arith.constant 0 : index
    %c64 = arith.constant 64 : index
    %248 = vector.load %arg10[%c0_109, %c0_110, %c64] : memref<1x16x128xf32, #tpu.memory_space<vmem>>, vector<1x16x8xf32>
    %249 = vector.shape_cast %248 : vector<1x16x8xf32> to vector<16x8xf32>
    %250 = vector.shape_cast %247 : vector<16x8xf32> to vector<1x16x8xf32>
    tpu.vector_store %arg10[%c0_109, %c0_110, %c64], %250 {strides = array<i32>} : memref<1x16x128xf32, #tpu.memory_space<vmem>>, vector<1x16x8xf32>,
    %251 = vector.extract_strided_slice %218 {offsets = [1, 0, 0], sizes = [1, 16, 8], strides = [1, 1, 1]} : vector<4x16x8xf32> to vector<1x16x8xf32>
    %252 = vector.shape_cast %251 : vector<1x16x8xf32> to vector<16x8xf32>
    %253 = vector.extract_strided_slice %221 {offsets = [1, 0, 0], sizes = [1, 16, 8], strides = [1, 1, 1]} : vector<4x16x8xf32> to vector<1x16x8xf32>
    %254 = vector.shape_cast %253 : vector<1x16x8xf32> to vector<16x8xf32>
    %cst_111 = arith.constant dense<0.000000e+00> : vector<16x16xf32>
    %255 = tpu.matmul %252, %254, %cst_111 {dimension_numbers = #tpu.dot_dimension_numbers<[1], [1], [0], [0], [0, 0, 1, 0], [], []>} : vector<16x8xf32>, vector<16x8xf32>, vector<16x16xf32> -> vector<16x16xf32>
    %256 = vector.broadcast %227 : vector<1x16xf32> to vector<16x16xf32>
    %257 = arith.addf %255, %256 : vector<16x16xf32>
    %cst_112 = arith.constant dense<0xFF800000> : vector<16xf32>
    %258 = vector.multi_reduction <maximumf>, %257, %cst_112 [1] : vector<16x16xf32> to vector<16xf32>
    %259 = vector.shape_cast %258 : vector<16xf32> to vector<16x1xf32>
    %260 = vector.broadcast %259 : vector<16x1xf32> to vector<16x16xf32>
    %261 = arith.subf %257, %260 : vector<16x16xf32>
    %262 = math.exp %261 : vector<16x16xf32>
    %cst_113 = arith.constant dense<0.000000e+00> : vector<16xf32>
    %263 = vector.multi_reduction <add>, %262, %cst_113 [1] : vector<16x16xf32> to vector<16xf32>
    %264 = vector.shape_cast %263 : vector<16xf32> to vector<16x1xf32>
    %265 = tpu.reciprocal %264 : vector<16x1xf32> -> vector<16x1xf32>
    %266 = vector.broadcast %265 : vector<16x1xf32> to vector<16x16xf32>
    %267 = arith.mulf %262, %266 : vector<16x16xf32>
    %268 = vector.extract_strided_slice %224 {offsets = [1, 0, 0], sizes = [1, 16, 8], strides = [1, 1, 1]} : vector<4x16x8xf32> to vector<1x16x8xf32>
    %269 = vector.shape_cast %268 : vector<1x16x8xf32> to vector<16x8xf32>
    %cst_114 = arith.constant dense<0.000000e+00> : vector<16x8xf32>
    %270 = tpu.matmul %267, %269, %cst_114 {dimension_numbers = #tpu.dot_dimension_numbers<[1], [0], [0], [1], [0, 0, 1, 1], [], []>} : vector<16x16xf32>, vector<16x8xf32>, vector<16x8xf32> -> vector<16x8xf32>
    %c0_115 = arith.constant 0 : index
    %c0_116 = arith.constant 0 : index
    %c72 = arith.constant 72 : index
    %271 = vector.load %arg10[%c0_115, %c0_116, %c72] : memref<1x16x128xf32, #tpu.memory_space<vmem>>, vector<1x16x8xf32>
    %272 = vector.shape_cast %271 : vector<1x16x8xf32> to vector<16x8xf32>
    %273 = vector.shape_cast %270 : vector<16x8xf32> to vector<1x16x8xf32>
    tpu.vector_store %arg10[%c0_115, %c0_116, %c72], %273 {strides = array<i32>} : memref<1x16x128xf32, #tpu.memory_space<vmem>>, vector<1x16x8xf32>,
    %274 = vector.extract_strided_slice %218 {offsets = [2, 0, 0], sizes = [1, 16, 8], strides = [1, 1, 1]} : vector<4x16x8xf32> to vector<1x16x8xf32>
    %275 = vector.shape_cast %274 : vector<1x16x8xf32> to vector<16x8xf32>
    %276 = vector.extract_strided_slice %221 {offsets = [2, 0, 0], sizes = [1, 16, 8], strides = [1, 1, 1]} : vector<4x16x8xf32> to vector<1x16x8xf32>
    %277 = vector.shape_cast %276 : vector<1x16x8xf32> to vector<16x8xf32>
    %cst_117 = arith.constant dense<0.000000e+00> : vector<16x16xf32>
    %278 = tpu.matmul %275, %277, %cst_117 {dimension_numbers = #tpu.dot_dimension_numbers<[1], [1], [0], [0], [0, 0, 1, 0], [], []>} : vector<16x8xf32>, vector<16x8xf32>, vector<16x16xf32> -> vector<16x16xf32>
    %279 = vector.broadcast %227 : vector<1x16xf32> to vector<16x16xf32>
    %280 = arith.addf %278, %279 : vector<16x16xf32>
    %cst_118 = arith.constant dense<0xFF800000> : vector<16xf32>
    %281 = vector.multi_reduction <maximumf>, %280, %cst_118 [1] : vector<16x16xf32> to vector<16xf32>
    %282 = vector.shape_cast %281 : vector<16xf32> to vector<16x1xf32>
    %283 = vector.broadcast %282 : vector<16x1xf32> to vector<16x16xf32>
    %284 = arith.subf %280, %283 : vector<16x16xf32>
    %285 = math.exp %284 : vector<16x16xf32>
    %cst_119 = arith.constant dense<0.000000e+00> : vector<16xf32>
    %286 = vector.multi_reduction <add>, %285, %cst_119 [1] : vector<16x16xf32> to vector<16xf32>
    %287 = vector.shape_cast %286 : vector<16xf32> to vector<16x1xf32>
    %288 = tpu.reciprocal %287 : vector<16x1xf32> -> vector<16x1xf32>
    %289 = vector.broadcast %288 : vector<16x1xf32> to vector<16x16xf32>
    %290 = arith.mulf %285, %289 : vector<16x16xf32>
    %291 = vector.extract_strided_slice %224 {offsets = [2, 0, 0], sizes = [1, 16, 8], strides = [1, 1, 1]} : vector<4x16x8xf32> to vector<1x16x8xf32>
    %292 = vector.shape_cast %291 : vector<1x16x8xf32> to vector<16x8xf32>
    %cst_120 = arith.constant dense<0.000000e+00> : vector<16x8xf32>
    %293 = tpu.matmul %290, %292, %cst_120 {dimension_numbers = #tpu.dot_dimension_numbers<[1], [0], [0], [1], [0, 0, 1, 1], [], []>} : vector<16x16xf32>, vector<16x8xf32>, vector<16x8xf32> -> vector<16x8xf32>
    %c0_121 = arith.constant 0 : index
    %c0_122 = arith.constant 0 : index
    %c80 = arith.constant 80 : index
    %294 = vector.load %arg10[%c0_121, %c0_122, %c80] : memref<1x16x128xf32, #tpu.memory_space<vmem>>, vector<1x16x8xf32>
    %295 = vector.shape_cast %294 : vector<1x16x8xf32> to vector<16x8xf32>
    %296 = vector.shape_cast %293 : vector<16x8xf32> to vector<1x16x8xf32>
    tpu.vector_store %arg10[%c0_121, %c0_122, %c80], %296 {strides = array<i32>} : memref<1x16x128xf32, #tpu.memory_space<vmem>>, vector<1x16x8xf32>,
    %297 = vector.extract_strided_slice %218 {offsets = [3, 0, 0], sizes = [1, 16, 8], strides = [1, 1, 1]} : vector<4x16x8xf32> to vector<1x16x8xf32>
    %298 = vector.shape_cast %297 : vector<1x16x8xf32> to vector<16x8xf32>
    %299 = vector.extract_strided_slice %221 {offsets = [3, 0, 0], sizes = [1, 16, 8], strides = [1, 1, 1]} : vector<4x16x8xf32> to vector<1x16x8xf32>
    %300 = vector.shape_cast %299 : vector<1x16x8xf32> to vector<16x8xf32>
    %cst_123 = arith.constant dense<0.000000e+00> : vector<16x16xf32>
    %301 = tpu.matmul %298, %300, %cst_123 {dimension_numbers = #tpu.dot_dimension_numbers<[1], [1], [0], [0], [0, 0, 1, 0], [], []>} : vector<16x8xf32>, vector<16x8xf32>, vector<16x16xf32> -> vector<16x16xf32>
    %302 = vector.broadcast %227 : vector<1x16xf32> to vector<16x16xf32>
    %303 = arith.addf %301, %302 : vector<16x16xf32>
    %cst_124 = arith.constant dense<0xFF800000> : vector<16xf32>
    %304 = vector.multi_reduction <maximumf>, %303, %cst_124 [1] : vector<16x16xf32> to vector<16xf32>
    %305 = vector.shape_cast %304 : vector<16xf32> to vector<16x1xf32>
    %306 = vector.broadcast %305 : vector<16x1xf32> to vector<16x16xf32>
    %307 = arith.subf %303, %306 : vector<16x16xf32>
    %308 = math.exp %307 : vector<16x16xf32>
    %cst_125 = arith.constant dense<0.000000e+00> : vector<16xf32>
    %309 = vector.multi_reduction <add>, %308, %cst_125 [1] : vector<16x16xf32> to vector<16xf32>
    %310 = vector.shape_cast %309 : vector<16xf32> to vector<16x1xf32>
    %311 = tpu.reciprocal %310 : vector<16x1xf32> -> vector<16x1xf32>
    %312 = vector.broadcast %311 : vector<16x1xf32> to vector<16x16xf32>
    %313 = arith.mulf %308, %312 : vector<16x16xf32>
    %314 = vector.extract_strided_slice %224 {offsets = [3, 0, 0], sizes = [1, 16, 8], strides = [1, 1, 1]} : vector<4x16x8xf32> to vector<1x16x8xf32>
    %315 = vector.shape_cast %314 : vector<1x16x8xf32> to vector<16x8xf32>
    %cst_126 = arith.constant dense<0.000000e+00> : vector<16x8xf32>
    %316 = tpu.matmul %313, %315, %cst_126 {dimension_numbers = #tpu.dot_dimension_numbers<[1], [0], [0], [1], [0, 0, 1, 1], [], []>} : vector<16x16xf32>, vector<16x8xf32>, vector<16x8xf32> -> vector<16x8xf32>
    %c0_127 = arith.constant 0 : index
    %c0_128 = arith.constant 0 : index
    %c88 = arith.constant 88 : index
    %317 = vector.load %arg10[%c0_127, %c0_128, %c88] : memref<1x16x128xf32, #tpu.memory_space<vmem>>, vector<1x16x8xf32>
    %318 = vector.shape_cast %317 : vector<1x16x8xf32> to vector<16x8xf32>
    %319 = vector.shape_cast %316 : vector<16x8xf32> to vector<1x16x8xf32>
    tpu.vector_store %arg10[%c0_127, %c0_128, %c88], %319 {strides = array<i32>} : memref<1x16x128xf32, #tpu.memory_space<vmem>>, vector<1x16x8xf32>,
    %c3 = arith.constant 3 : index
    %c0_129 = arith.constant 0 : index
    %c0_130 = arith.constant 0 : index
    %c0_131 = arith.constant 0 : index
    %320 = vector.load %arg5[%c3, %c0_129, %c0_130, %c0_131] : memref<4x4x8x8xf32, #tpu.memory_space<vmem>>, vector<1x4x8x8xf32>
    %321 = vector.shape_cast %320 : vector<1x4x8x8xf32> to vector<4x8x8xf32>
    %322 = tpu.concatenate %1, %321 in 1 : vector<4x8x8xf32>, vector<4x8x8xf32> -> vector<4x16x8xf32>
    %c3_132 = arith.constant 3 : index
    %c0_133 = arith.constant 0 : index
    %c0_134 = arith.constant 0 : index
    %c0_135 = arith.constant 0 : index
    %323 = vector.load %arg6[%c3_132, %c0_133, %c0_134, %c0_135] : memref<4x4x8x8xf32, #tpu.memory_space<vmem>>, vector<1x4x8x8xf32>
    %324 = vector.shape_cast %323 : vector<1x4x8x8xf32> to vector<4x8x8xf32>
    %325 = tpu.concatenate %3, %324 in 1 : vector<4x8x8xf32>, vector<4x8x8xf32> -> vector<4x16x8xf32>
    %c3_136 = arith.constant 3 : index
    %c0_137 = arith.constant 0 : index
    %c0_138 = arith.constant 0 : index
    %c0_139 = arith.constant 0 : index
    %326 = vector.load %arg7[%c3_136, %c0_137, %c0_138, %c0_139] : memref<4x4x8x8xf32, #tpu.memory_space<vmem>>, vector<1x4x8x8xf32>
    %327 = vector.shape_cast %326 : vector<1x4x8x8xf32> to vector<4x8x8xf32>
    %328 = tpu.concatenate %5, %327 in 1 : vector<4x8x8xf32>, vector<4x8x8xf32> -> vector<4x16x8xf32>
    %c3_140 = arith.constant 3 : index
    %c0_141 = arith.constant 0 : index
    %c0_142 = arith.constant 0 : index
    %329 = vector.load %arg9[%c3_140, %c0_141, %c0_142] : memref<4x1x8xf32, #tpu.memory_space<vmem>>, vector<1x1x8xf32>
    %330 = vector.shape_cast %329 : vector<1x1x8xf32> to vector<1x8xf32>
    %331 = tpu.concatenate %7, %330 in 1 : vector<1x8xf32>, vector<1x8xf32> -> vector<1x16xf32>
    %332 = vector.extract_strided_slice %322 {offsets = [0, 0, 0], sizes = [1, 16, 8], strides = [1, 1, 1]} : vector<4x16x8xf32> to vector<1x16x8xf32>
    %333 = vector.shape_cast %332 : vector<1x16x8xf32> to vector<16x8xf32>
    %334 = vector.extract_strided_slice %325 {offsets = [0, 0, 0], sizes = [1, 16, 8], strides = [1, 1, 1]} : vector<4x16x8xf32> to vector<1x16x8xf32>
    %335 = vector.shape_cast %334 : vector<1x16x8xf32> to vector<16x8xf32>
    %cst_143 = arith.constant dense<0.000000e+00> : vector<16x16xf32>
    %336 = tpu.matmul %333, %335, %cst_143 {dimension_numbers = #tpu.dot_dimension_numbers<[1], [1], [0], [0], [0, 0, 1, 0], [], []>} : vector<16x8xf32>, vector<16x8xf32>, vector<16x16xf32> -> vector<16x16xf32>
    %337 = vector.broadcast %331 : vector<1x16xf32> to vector<16x16xf32>
    %338 = arith.addf %336, %337 : vector<16x16xf32>
    %cst_144 = arith.constant dense<0xFF800000> : vector<16xf32>
    %339 = vector.multi_reduction <maximumf>, %338, %cst_144 [1] : vector<16x16xf32> to vector<16xf32>
    %340 = vector.shape_cast %339 : vector<16xf32> to vector<16x1xf32>
    %341 = vector.broadcast %340 : vector<16x1xf32> to vector<16x16xf32>
    %342 = arith.subf %338, %341 : vector<16x16xf32>
    %343 = math.exp %342 : vector<16x16xf32>
    %cst_145 = arith.constant dense<0.000000e+00> : vector<16xf32>
    %344 = vector.multi_reduction <add>, %343, %cst_145 [1] : vector<16x16xf32> to vector<16xf32>
    %345 = vector.shape_cast %344 : vector<16xf32> to vector<16x1xf32>
    %346 = tpu.reciprocal %345 : vector<16x1xf32> -> vector<16x1xf32>
    %347 = vector.broadcast %346 : vector<16x1xf32> to vector<16x16xf32>
    %348 = arith.mulf %343, %347 : vector<16x16xf32>
    %349 = vector.extract_strided_slice %328 {offsets = [0, 0, 0], sizes = [1, 16, 8], strides = [1, 1, 1]} : vector<4x16x8xf32> to vector<1x16x8xf32>
    %350 = vector.shape_cast %349 : vector<1x16x8xf32> to vector<16x8xf32>
    %cst_146 = arith.constant dense<0.000000e+00> : vector<16x8xf32>
    %351 = tpu.matmul %348, %350, %cst_146 {dimension_numbers = #tpu.dot_dimension_numbers<[1], [0], [0], [1], [0, 0, 1, 1], [], []>} : vector<16x16xf32>, vector<16x8xf32>, vector<16x8xf32> -> vector<16x8xf32>
    %c0_147 = arith.constant 0 : index
    %c0_148 = arith.constant 0 : index
    %c96 = arith.constant 96 : index
    %352 = vector.load %arg10[%c0_147, %c0_148, %c96] : memref<1x16x128xf32, #tpu.memory_space<vmem>>, vector<1x16x8xf32>
    %353 = vector.shape_cast %352 : vector<1x16x8xf32> to vector<16x8xf32>
    %354 = vector.shape_cast %351 : vector<16x8xf32> to vector<1x16x8xf32>
    tpu.vector_store %arg10[%c0_147, %c0_148, %c96], %354 {strides = array<i32>} : memref<1x16x128xf32, #tpu.memory_space<vmem>>, vector<1x16x8xf32>,
    %355 = vector.extract_strided_slice %322 {offsets = [1, 0, 0], sizes = [1, 16, 8], strides = [1, 1, 1]} : vector<4x16x8xf32> to vector<1x16x8xf32>
    %356 = vector.shape_cast %355 : vector<1x16x8xf32> to vector<16x8xf32>
    %357 = vector.extract_strided_slice %325 {offsets = [1, 0, 0], sizes = [1, 16, 8], strides = [1, 1, 1]} : vector<4x16x8xf32> to vector<1x16x8xf32>
    %358 = vector.shape_cast %357 : vector<1x16x8xf32> to vector<16x8xf32>
    %cst_149 = arith.constant dense<0.000000e+00> : vector<16x16xf32>
    %359 = tpu.matmul %356, %358, %cst_149 {dimension_numbers = #tpu.dot_dimension_numbers<[1], [1], [0], [0], [0, 0, 1, 0], [], []>} : vector<16x8xf32>, vector<16x8xf32>, vector<16x16xf32> -> vector<16x16xf32>
    %360 = vector.broadcast %331 : vector<1x16xf32> to vector<16x16xf32>
    %361 = arith.addf %359, %360 : vector<16x16xf32>
    %cst_150 = arith.constant dense<0xFF800000> : vector<16xf32>
    %362 = vector.multi_reduction <maximumf>, %361, %cst_150 [1] : vector<16x16xf32> to vector<16xf32>
    %363 = vector.shape_cast %362 : vector<16xf32> to vector<16x1xf32>
    %364 = vector.broadcast %363 : vector<16x1xf32> to vector<16x16xf32>
    %365 = arith.subf %361, %364 : vector<16x16xf32>
    %366 = math.exp %365 : vector<16x16xf32>
    %cst_151 = arith.constant dense<0.000000e+00> : vector<16xf32>
    %367 = vector.multi_reduction <add>, %366, %cst_151 [1] : vector<16x16xf32> to vector<16xf32>
    %368 = vector.shape_cast %367 : vector<16xf32> to vector<16x1xf32>
    %369 = tpu.reciprocal %368 : vector<16x1xf32> -> vector<16x1xf32>
    %370 = vector.broadcast %369 : vector<16x1xf32> to vector<16x16xf32>
    %371 = arith.mulf %366, %370 : vector<16x16xf32>
    %372 = vector.extract_strided_slice %328 {offsets = [1, 0, 0], sizes = [1, 16, 8], strides = [1, 1, 1]} : vector<4x16x8xf32> to vector<1x16x8xf32>
    %373 = vector.shape_cast %372 : vector<1x16x8xf32> to vector<16x8xf32>
    %cst_152 = arith.constant dense<0.000000e+00> : vector<16x8xf32>
    %374 = tpu.matmul %371, %373, %cst_152 {dimension_numbers = #tpu.dot_dimension_numbers<[1], [0], [0], [1], [0, 0, 1, 1], [], []>} : vector<16x16xf32>, vector<16x8xf32>, vector<16x8xf32> -> vector<16x8xf32>
    %c0_153 = arith.constant 0 : index
    %c0_154 = arith.constant 0 : index
    %c104 = arith.constant 104 : index
    %375 = vector.load %arg10[%c0_153, %c0_154, %c104] : memref<1x16x128xf32, #tpu.memory_space<vmem>>, vector<1x16x8xf32>
    %376 = vector.shape_cast %375 : vector<1x16x8xf32> to vector<16x8xf32>
    %377 = vector.shape_cast %374 : vector<16x8xf32> to vector<1x16x8xf32>
    tpu.vector_store %arg10[%c0_153, %c0_154, %c104], %377 {strides = array<i32>} : memref<1x16x128xf32, #tpu.memory_space<vmem>>, vector<1x16x8xf32>,
    %378 = vector.extract_strided_slice %322 {offsets = [2, 0, 0], sizes = [1, 16, 8], strides = [1, 1, 1]} : vector<4x16x8xf32> to vector<1x16x8xf32>
    %379 = vector.shape_cast %378 : vector<1x16x8xf32> to vector<16x8xf32>
    %380 = vector.extract_strided_slice %325 {offsets = [2, 0, 0], sizes = [1, 16, 8], strides = [1, 1, 1]} : vector<4x16x8xf32> to vector<1x16x8xf32>
    %381 = vector.shape_cast %380 : vector<1x16x8xf32> to vector<16x8xf32>
    %cst_155 = arith.constant dense<0.000000e+00> : vector<16x16xf32>
    %382 = tpu.matmul %379, %381, %cst_155 {dimension_numbers = #tpu.dot_dimension_numbers<[1], [1], [0], [0], [0, 0, 1, 0], [], []>} : vector<16x8xf32>, vector<16x8xf32>, vector<16x16xf32> -> vector<16x16xf32>
    %383 = vector.broadcast %331 : vector<1x16xf32> to vector<16x16xf32>
    %384 = arith.addf %382, %383 : vector<16x16xf32>
    %cst_156 = arith.constant dense<0xFF800000> : vector<16xf32>
    %385 = vector.multi_reduction <maximumf>, %384, %cst_156 [1] : vector<16x16xf32> to vector<16xf32>
    %386 = vector.shape_cast %385 : vector<16xf32> to vector<16x1xf32>
    %387 = vector.broadcast %386 : vector<16x1xf32> to vector<16x16xf32>
    %388 = arith.subf %384, %387 : vector<16x16xf32>
    %389 = math.exp %388 : vector<16x16xf32>
    %cst_157 = arith.constant dense<0.000000e+00> : vector<16xf32>
    %390 = vector.multi_reduction <add>, %389, %cst_157 [1] : vector<16x16xf32> to vector<16xf32>
    %391 = vector.shape_cast %390 : vector<16xf32> to vector<16x1xf32>
    %392 = tpu.reciprocal %391 : vector<16x1xf32> -> vector<16x1xf32>
    %393 = vector.broadcast %392 : vector<16x1xf32> to vector<16x16xf32>
    %394 = arith.mulf %389, %393 : vector<16x16xf32>
    %395 = vector.extract_strided_slice %328 {offsets = [2, 0, 0], sizes = [1, 16, 8], strides = [1, 1, 1]} : vector<4x16x8xf32> to vector<1x16x8xf32>
    %396 = vector.shape_cast %395 : vector<1x16x8xf32> to vector<16x8xf32>
    %cst_158 = arith.constant dense<0.000000e+00> : vector<16x8xf32>
    %397 = tpu.matmul %394, %396, %cst_158 {dimension_numbers = #tpu.dot_dimension_numbers<[1], [0], [0], [1], [0, 0, 1, 1], [], []>} : vector<16x16xf32>, vector<16x8xf32>, vector<16x8xf32> -> vector<16x8xf32>
    %c0_159 = arith.constant 0 : index
    %c0_160 = arith.constant 0 : index
    %c112 = arith.constant 112 : index
    %398 = vector.load %arg10[%c0_159, %c0_160, %c112] : memref<1x16x128xf32, #tpu.memory_space<vmem>>, vector<1x16x8xf32>
    %399 = vector.shape_cast %398 : vector<1x16x8xf32> to vector<16x8xf32>
    %400 = vector.shape_cast %397 : vector<16x8xf32> to vector<1x16x8xf32>
    tpu.vector_store %arg10[%c0_159, %c0_160, %c112], %400 {strides = array<i32>} : memref<1x16x128xf32, #tpu.memory_space<vmem>>, vector<1x16x8xf32>,
    %401 = vector.extract_strided_slice %322 {offsets = [3, 0, 0], sizes = [1, 16, 8], strides = [1, 1, 1]} : vector<4x16x8xf32> to vector<1x16x8xf32>
    %402 = vector.shape_cast %401 : vector<1x16x8xf32> to vector<16x8xf32>
    %403 = vector.extract_strided_slice %325 {offsets = [3, 0, 0], sizes = [1, 16, 8], strides = [1, 1, 1]} : vector<4x16x8xf32> to vector<1x16x8xf32>
    %404 = vector.shape_cast %403 : vector<1x16x8xf32> to vector<16x8xf32>
    %cst_161 = arith.constant dense<0.000000e+00> : vector<16x16xf32>
    %405 = tpu.matmul %402, %404, %cst_161 {dimension_numbers = #tpu.dot_dimension_numbers<[1], [1], [0], [0], [0, 0, 1, 0], [], []>} : vector<16x8xf32>, vector<16x8xf32>, vector<16x16xf32> -> vector<16x16xf32>
    %406 = vector.broadcast %331 : vector<1x16xf32> to vector<16x16xf32>
    %407 = arith.addf %405, %406 : vector<16x16xf32>
    %cst_162 = arith.constant dense<0xFF800000> : vector<16xf32>
    %408 = vector.multi_reduction <maximumf>, %407, %cst_162 [1] : vector<16x16xf32> to vector<16xf32>
    %409 = vector.shape_cast %408 : vector<16xf32> to vector<16x1xf32>
    %410 = vector.broadcast %409 : vector<16x1xf32> to vector<16x16xf32>
    %411 = arith.subf %407, %410 : vector<16x16xf32>
    %412 = math.exp %411 : vector<16x16xf32>
    %cst_163 = arith.constant dense<0.000000e+00> : vector<16xf32>
    %413 = vector.multi_reduction <add>, %412, %cst_163 [1] : vector<16x16xf32> to vector<16xf32>
    %414 = vector.shape_cast %413 : vector<16xf32> to vector<16x1xf32>
    %415 = tpu.reciprocal %414 : vector<16x1xf32> -> vector<16x1xf32>
    %416 = vector.broadcast %415 : vector<16x1xf32> to vector<16x16xf32>
    %417 = arith.mulf %412, %416 : vector<16x16xf32>
    %418 = vector.extract_strided_slice %328 {offsets = [3, 0, 0], sizes = [1, 16, 8], strides = [1, 1, 1]} : vector<4x16x8xf32> to vector<1x16x8xf32>
    %419 = vector.shape_cast %418 : vector<1x16x8xf32> to vector<16x8xf32>
    %cst_164 = arith.constant dense<0.000000e+00> : vector<16x8xf32>
    %420 = tpu.matmul %417, %419, %cst_164 {dimension_numbers = #tpu.dot_dimension_numbers<[1], [0], [0], [1], [0, 0, 1, 1], [], []>} : vector<16x16xf32>, vector<16x8xf32>, vector<16x8xf32> -> vector<16x8xf32>
    %c0_165 = arith.constant 0 : index
    %c0_166 = arith.constant 0 : index
    %c120 = arith.constant 120 : index
    %421 = vector.load %arg10[%c0_165, %c0_166, %c120] : memref<1x16x128xf32, #tpu.memory_space<vmem>>, vector<1x16x8xf32>
    %422 = vector.shape_cast %421 : vector<1x16x8xf32> to vector<16x8xf32>
    %423 = vector.shape_cast %420 : vector<16x8xf32> to vector<1x16x8xf32>
    tpu.vector_store %arg10[%c0_165, %c0_166, %c120], %423 {strides = array<i32>} : memref<1x16x128xf32, #tpu.memory_space<vmem>>, vector<1x16x8xf32>,
    return
  }
  func.func @transform_0(%arg0: i32, %arg1: i32) -> (i32, i32, i32, i32) {
    %c0_i32 = arith.constant 0 : i32
    %c0_i32_0 = arith.constant 0 : i32
    %c0_i32_1 = arith.constant 0 : i32
    %c0_i32_2 = arith.constant 0 : i32
    return %arg0, %c0_i32, %c0_i32_0, %c0_i32_1 : i32, i32, i32, i32
  }
  func.func @transform_1(%arg0: i32, %arg1: i32) -> (i32, i32, i32, i32) {
    %c0_i32 = arith.constant 0 : i32
    %c0_i32_0 = arith.constant 0 : i32
    %c0_i32_1 = arith.constant 0 : i32
    %c0_i32_2 = arith.constant 0 : i32
    return %arg0, %c0_i32, %c0_i32_0, %c0_i32_1 : i32, i32, i32, i32
  }
  func.func @transform_2(%arg0: i32, %arg1: i32) -> (i32, i32, i32, i32) {
    %c0_i32 = arith.constant 0 : i32
    %c0_i32_0 = arith.constant 0 : i32
    %c0_i32_1 = arith.constant 0 : i32
    %c0_i32_2 = arith.constant 0 : i32
    return %arg0, %c0_i32, %c0_i32_0, %c0_i32_1 : i32, i32, i32, i32
  }
  func.func @transform_3(%arg0: i32, %arg1: i32) -> (i32, i32, i32, i32) {
    %c0_i32 = arith.constant 0 : i32
    %c0_i32_0 = arith.constant 0 : i32
    %c0_i32_1 = arith.constant 0 : i32
    %c0_i32_2 = arith.constant 0 : i32
    return %arg1, %c0_i32, %c0_i32_0, %c0_i32_1 : i32, i32, i32, i32
  }
  func.func @transform_4(%arg0: i32, %arg1: i32) -> (i32, i32, i32, i32) {
    %c0_i32 = arith.constant 0 : i32
    %c0_i32_0 = arith.constant 0 : i32
    %c0_i32_1 = arith.constant 0 : i32
    %c0_i32_2 = arith.constant 0 : i32
    return %arg1, %c0_i32, %c0_i32_0, %c0_i32_1 : i32, i32, i32, i32
  }
  func.func @transform_5(%arg0: i32, %arg1: i32) -> (i32, i32, i32, i32) {
    %c0_i32 = arith.constant 0 : i32
    %c0_i32_0 = arith.constant 0 : i32
    %c0_i32_1 = arith.constant 0 : i32
    %c0_i32_2 = arith.constant 0 : i32
    return %arg1, %c0_i32, %c0_i32_0, %c0_i32_1 : i32, i32, i32, i32
  }
  func.func @transform_6(%arg0: i32, %arg1: i32) -> (i32, i32, i32) {
    %c0_i32 = arith.constant 0 : i32
    %c0_i32_0 = arith.constant 0 : i32
    %c0_i32_1 = arith.constant 0 : i32
    return %arg0, %c0_i32, %c0_i32_0 : i32, i32, i32
  }
  func.func @transform_7(%arg0: i32, %arg1: i32) -> (i32, i32, i32) {
    %c0_i32 = arith.constant 0 : i32
    %c0_i32_0 = arith.constant 0 : i32
    %c0_i32_1 = arith.constant 0 : i32
    return %arg1, %c0_i32, %c0_i32_0 : i32, i32, i32
  }
  func.func @transform_8(%arg0: i32, %arg1: i32) -> (i32, i32, i32) {
    %c0_i32 = arith.constant 0 : i32
    %c0_i32_0 = arith.constant 0 : i32
    return %arg0, %c0_i32, %arg1 : i32, i32, i32
  }
}

</mosaic_0001>

<bundles_post_ra>
// kernel: tpu_custom_call.1
= control target key start
LH: loop header
LB: loop body
LE: loop exit
PB: predicated region body
PF: predicated region fallthrough
CT: control target
= control target key end

     0   :  { %s6138_s0 = inlined_call_operand.hbm [shape: f32[2,4,8,8], index: 0, kind: input, shape index: {}]   ;;  %s6139_s1 = inlined_call_operand.hbm [shape: f32[2,4,8,8], index: 1, kind: input, shape index: {}]   ;;  %s6140_s2 = inlined_call_operand.hbm [shape: f32[2,4,8,8], index: 2, kind: input, shape index: {}]   ;;  %s6141_s3 = inlined_call_operand.hbm [shape: f32[4,4,8,8], index: 3, kind: input, shape index: {}]   ;;  %s6142_s4 = inlined_call_operand.hbm [shape: f32[4,4,8,8], index: 4, kind: input, shape index: {}]   ;;  %s6143_s5 = inlined_call_operand.hbm [shape: f32[4,4,8,8], index: 5, kind: input, shape index: {}]   ;;  %s6144_s6 = inlined_call_operand.vmem [shape: f32[2,1,8], index: 6, kind: input, shape index: {}]   ;;  %s6145_s7 = inlined_call_operand.vmem [shape: f32[4,1,8], index: 7, kind: input, shape index: {}]   ;;  %s6146_s8 = inlined_call_operand.hbm [shape: f32[2,16,128], index: 8, kind: output, shape index: {}]  }
   0x1   :  { %6174 = sst [smem:[#allocation26_spill]] %s6139_s1 }
   0x2   :  { %6175 = sst [smem:[#allocation27_spill]] %s6141_s3 }
   0x3   :  { %6176 = sst [smem:[#allocation28_spill]] %s6144_s6 }
   0x4   :  { %6177 = sst [smem:[#allocation29_spill]] %s6145_s7 }
   0x5   :  { %6178 = sst [smem:[#allocation30_spill]] %s6146_s8 }
   0x6   :  { %13 = vsyncpa [#allocation3], 0 }
   0x7   :  { %15 = vsyncpa [#allocation3 + $0x1], 0 }
   0x8   :  { %16 = vsyncpa [#allocation6], 0 }
   0x9   :  { %18 = vsyncpa [#allocation6 + $0x1], 0 }
   0xa   :  { %19 = vsyncpa [#allocation9], 0 }
   0xb   :  { %20 = vsyncpa [#allocation12], 0 }
   0xc   :  { %21 = vsyncpa [#allocation4], 0 }
   0xd   :  { %23 = vsyncpa [#allocation4 + $0x1], 0  ;;  %s5236_s27 = smov 0   ;;  %s5238_s28 = smov 0  }
   0xe   :  { %s5240_s29 = smov 0   ;;  %s5242_s30 = smov 0  }
   0xf   :  { %s5244_s9 = smov 0   ;;  %s5246_s10 = smov 0  }
  0x10 LB: > { %6179 = sst [smem:[#allocation19_spill]] %s5144_s27  ;;  %s5267_s11 = sadd.s32 4294967295, %s5164_s10   ;;  %s5164_s10 = sphi %s5246_s10, %s29_s10   ;;  %s5160_s9 = sphi %s5244_s9, %s6226_s9   ;;  %s5156_s30 = sphi %s5242_s30, %s6225_s30   ;;  %s5152_s29 = sphi %s5240_s29, %s6229_s29   ;;  %s5148_s28 = sphi %s5238_s28, %s6228_s28   ;;  %s5144_s27 = sphi %s5236_s27, %s6227_s27  }
  0x11   : > { %6180 = sst [smem:[#allocation20_spill]] %s5160_s9  ;;  %s3986_s12 = sadd.s32 4294967294, %s5164_s10  }
  0x12   : > { %6181 = sst [smem:[#allocation21_spill]] %s5164_s10  ;;  %p55_p0 = scmp.ne.s32.totalorder %s5152_s29, %s5148_s28 }
  0x13   : > { %p56_p1 = scmp.eq.s32.totalorder %s5164_s10, 0  ;;  %p61_p2 = scmp.ne.s32.totalorder %s5148_s28, %s5144_s27 }
  0x14   : > { %p6149_p3 = scmp.eq.s32.totalorder %s5267_s11, 0  ;;  %p269_p5 = scmp.eq.s32.totalorder %s5267_s11, 1 }
  0x15   : > { %p5276_p4 = por %p56_p1, %p55_p0  ;;  %p275_p7 = scmp.eq.s32.totalorder %s3986_s12, 1 }
  0x16   : > { %p5283_p6 = por %p6149_p3, %p61_p2  ;;  %p5287_p8 = por %p269_p5, %p55_p0 }
  0x17   : > { %p3987_p9 = scmp.ge.s32.totalorder %s5164_s10, 1  ;;  %p5292_p10 = por %p275_p7, %p61_p2 }
  0x18   : > { %s6183_s14 = scalar_select %p5283_p6, 1, 0 }
  0x19   : > { %s6184_s15 = scalar_select %p5287_p8, 1, 0 }
  0x1a   : > { %s6186_s16 = scalar_select %p5292_p10, 1, 0 }
  0x1b   : > { %6185 = sst [smem:[#allocation22_spill]] %s6184_s15  ;;  %p282_p11 = scmp.lt.s32.totalorder %s5164_s10, 3 }
  0x1c   : > { %6187 = sst [smem:[#allocation23_spill]] %s6186_s16  ;;  %s5166_s18 = smov [#allocation8]  }
  0x1d   : > { %p5297_p12 = pnand %p3987_p9, %p282_p11  ;;  %s298_s19 = sshll.u32 %s5166_s18, 4  ;;  %s5301_s19 = int_to_ptr.vmem [resolvable:$true] %s298_s19 }
  0x1e   : > { %s41_s21 = sadd.s32 1, %s5160_s9  ;;  %s6191_s3 = sld [smem:[#allocation27_spill]] }
  0x1f   : > { %s6188_s17 = scalar_select %p5297_p12, 1, 0 }
  0x20   : > { %p4654_p13 = pneg %p5297_p12  ;;  %p5314_p2 = scmp.ge.s32.totalorder %s41_s21, 2 }
  0x22   : > { %p5308_p1 = pnand %p4654_p13, %p6149_p3 }
  0x24   : > { %s6189_s20 = scalar_select %p5308_p1, 1, 0 }
  0x25   : > { %s4896_s26 = scalar_lea.hbm %s6191_s3, 2048  ;;  %p5326_p7 = pneg %p5308_p1 }
  0x26   : > { %p4897_p5 = scmp.ne.s32.totalorder %s6191_s3, %s4896_s26  ;;  %p4903_p13 = scmp.lt.u32.totalorder %s4896_s26, %s6191_s3 }
  0x27   : > { %s6192_s16 = scalar_select %p5326_p7, 1, 0 }
  0x28   : > { %p4899_p9 = pnand %p5326_p7, %p4897_p5 }
  0x2a   : > { %p4900_p11 = pneg %p4899_p9 }
  0x2c   : > { %p4905_p0 = pnand %p4903_p13, %p4900_p11 }
  0x2e   : > { %4908 = shalt.err (!%p4905_p0)
}
  0x2f   : > { %s4909_s24 = scalar_lea.vmem %s5301_s19, 2048  ;;  %p4917_p6 = scmp.lt.s32.totalorder %s5301_s19, %s5301_s19 }
  0x30   : > { %p4910_p3 = scmp.ne.s32.totalorder %s5301_s19, %s4909_s24  ;;  %p4918_p12 = scmp.lt.s32.totalorder %s4909_s24, %s4909_s24 }
  0x32   : > { %p4912_p10 = pnand %p4910_p3, %p5326_p7  ;;  %p4919_p5 = por %p4918_p12, %p4917_p6 }
  0x34   : > { %p4913_p8 = pneg %p4912_p10 }
  0x36   : > { %p4920_p9 = pnand %p4919_p5, %p4913_p8 }
  0x38   : > { %4923 = shalt.err (!%p4920_p9)
}
  0x39   : > { %s6156_s25 = smov 128   ;;  %s6159_s27 = smov 8  }
  0x3a   : > { %4657 = dma.hbm_to_vmem [thread:$0]  (!%p5308_p1), %s6191_s3, 2048, %s5301_s19, [#allocation9], %s6156_s25, %s6156_s25, %s6159_s27  }
  0x3b   : > { %s6231_s21 = smov (%p5314_p2, %s41_s21), 0  ;;  %p4681_p3 = scmp.lt.s32.totalorder %s5164_s10, 2 }
  0x3c   : > { %6193 = sst [smem:[#allocation24_spill]] %s6231_s21  ;;  %s6158_s12 = sand.u32 1, %s5152_s29  }
  0x3d   : > { %s45_s18 = ssub.s32 %s5160_s9, %s6231_s21  ;;  %s5360_s24 = sshll.u32 %s6158_s12, 5 }
  0x3e   : > { %p46_p6 = scmp.eq.s32.totalorder %s45_s18, 0  ;;  %s5363_s8 = sshll.u32 %s5160_s9, 9 }
  0x3f   : > { %p5367_p8 = pnand %p4681_p3, %p5276_p4  ;;  %s375_s19 = sand.u32 1, %s5164_s10  }
  0x40   : > { %s6195_s23 = sadd.s32 1, %s5152_s29  ;;  %s6197_s1 = sld [smem:[#allocation26_spill]] }
  0x41   : > { %s6194_s15 = scalar_select %p5367_p8, 1, 0 }
  0x42   : > { %s5375_s22 = scalar_select %p46_p6, %s5152_s29, %s6195_s23  }
  0x43   : > { %s379_s13 = scalar_lea.vmem [#allocation5], %s5360_s24  ;;  %s5169_s27 = smov [#allocation10]  }
  0x44   : > { %6196 = sst [smem:[#allocation25_spill]] %s5375_s22  ;;  %s386_s18 = sshll.u32 %s379_s13, 4  ;;  %s5384_s18 = int_to_ptr.vmem [resolvable:$true] %s386_s18 }
  0x45   : > { %s5386_s3 = sshll.u32 %s5169_s27, 4  ;;  %s5388_s21 = scalar_lea.sflag [#allocation6], %s375_s19  ;;  %s316_s3 = int_to_ptr.vmem [resolvable:$true] %s5386_s3 }
  0x46   : > { %s5381_s12 = scalar_lea.hbm %s6197_s1, %s5363_s8  ;;  %p5394_p10 = pneg %p5367_p8 }
  0x47   : > { %s4924_s23 = scalar_lea.hbm %s5381_s12, 512  ;;  %s4929_s9 = scalar_lea.hbm %s6197_s1, 1024 }
  0x48   : > { %p4925_p4 = scmp.ne.s32.totalorder %s5381_s12, %s4924_s23  ;;  %p4930_p2 = scmp.lt.u32.totalorder %s5381_s12, %s6197_s1 }
  0x49   : > { %s6198_s25 = scalar_select %p5394_p10, 1, 0 }
  0x4a   : > { %p4927_p12 = pnand %p5394_p10, %p4925_p4  ;;  %p4931_p11 = scmp.lt.u32.totalorder %s4929_s9, %s4924_s23 }
  0x4b   : > { %p4933_p5 = scmp.lt.u32.totalorder %s4924_s23, %s5381_s12 }
  0x4c   : > { %p4928_p0 = pneg %p4927_p12  ;;  %p4932_p13 = por %p4931_p11, %p4930_p2 }
  0x4e   : > { %p4934_p9 = por %p4933_p5, %p4932_p13 }
  0x50   : > { %p4935_p3 = pnand %p4934_p9, %p4928_p0 }
  0x52   : > { %4938 = shalt.err (!%p4935_p3)
}
  0x53   : > { %s4939_s19 = scalar_lea.vmem %s5384_s18, 512  ;;  %s5170_s26 = smov [#allocation5]  }
  0x54   : > { %p4940_p6 = scmp.ne.s32.totalorder %s5384_s18, %s4939_s19  ;;  %s4944_s13 = sshll.u32 %s5170_s26, 4  ;;  %s4945_s13 = int_to_ptr.vmem [resolvable:$false] %s4944_s13 }
  0x55   : > { %s4946_s22 = scalar_lea.vmem %s4945_s13, 1024  ;;  %p4947_p1 = scmp.lt.s32.totalorder %s5384_s18, %s4945_s13 }
  0x56   : > { %p4942_p4 = pnand %p4940_p6, %p5394_p10  ;;  %p4948_p7 = scmp.lt.s32.totalorder %s4946_s22, %s4939_s19 }
  0x58   : > { %p4943_p12 = pneg %p4942_p4  ;;  %p4949_p2 = por %p4948_p7, %p4947_p1 }
  0x5a   : > { %p4950_p11 = pnand %p4949_p2, %p4943_p12 }
  0x5c   : > { %4953 = shalt.err (!%p4950_p11)
}
  0x5d   : > { %s6199_s9 = smov 8   ;;  %s6200_s23 = smov 128  }
  0x5e   : > { %4670 = dma.hbm_to_vmem [thread:$0]  (!%p5367_p8), %s5381_s12, 512, %s5384_s18, %s5388_s21, %s6200_s23, %s6200_s23, %s6199_s9  }
  0x5f   : > { %s4954_s13 = scalar_lea.hbm %s6142_s4, 2048  ;;  %p6201_p7 = scmp.ne.s32.totalorder %s6192_s16, 0 }
  0x60   : > { %p4955_p1 = scmp.ne.s32.totalorder %s6142_s4, %s4954_s13  ;;  %p4961_p5 = scmp.lt.u32.totalorder %s4954_s13, %s6142_s4 }
  0x62   : > { %p4957_p0 = pnand %p4955_p1, %p6201_p7 }
  0x64   : > { %p4958_p13 = pneg %p4957_p0 }
  0x66   : > { %p4963_p9 = pnand %p4961_p5, %p4958_p13 }
  0x68   : > { %4966 = shalt.err (!%p4963_p9)
}
  0x69   : > { %s4967_s6 = scalar_lea.vmem %s316_s3, 2048  ;;  %p4975_p12 = scmp.lt.s32.totalorder %s316_s3, %s316_s3 }
  0x6a   : > { %p4968_p3 = scmp.ne.s32.totalorder %s316_s3, %s4967_s6  ;;  %p4976_p2 = scmp.lt.s32.totalorder %s4967_s6, %s4967_s6 }
  0x6c   : > { %p4970_p6 = pnand %p4968_p3, %p6201_p7  ;;  %p4977_p11 = por %p4976_p2, %p4975_p12 }
  0x6e   : > { %p4971_p4 = pneg %p4970_p6 }
  0x70   : > { %p4978_p8 = pnand %p4977_p11, %p4971_p4 }
  0x72   : > { %4981 = shalt.err (!%p4978_p8)
}
  0x73   : > { %p6202_p1 = scmp.ne.s32.totalorder %s6189_s20, 0  ;;  %s5171_s12 = smov [#allocation11]  }
  0x74   : > { %s332_s18 = sshll.u32 %s5171_s12, 4  ;;  %s4982_s6 = scalar_lea.hbm %s6143_s5, 2048  ;;  %s333_s18 = int_to_ptr.vmem [resolvable:$true] %s332_s18 }
  0x75   : > { %4660 = dma.hbm_to_vmem [thread:$0]  (!%p6202_p1), %s6142_s4, 2048, %s316_s3, [#allocation9], %s6200_s23, %s6200_s23, %s6199_s9  }
  0x76   : > { %p4983_p8 = scmp.ne.s32.totalorder %s6143_s5, %s4982_s6  ;;  %p4989_p5 = scmp.lt.u32.totalorder %s4982_s6, %s6143_s5 }
  0x78   : > { %p4985_p0 = pnand %p4983_p8, %p6201_p7 }
  0x7a   : > { %p4986_p13 = pneg %p4985_p0 }
  0x7c   : > { %p4991_p9 = pnand %p4989_p5, %p4986_p13 }
  0x7e   : > { %4994 = shalt.err (!%p4991_p9)
}
  0x7f   : > { %s4995_s3 = scalar_lea.vmem %s333_s18, 2048  ;;  %p5003_p12 = scmp.lt.s32.totalorder %s333_s18, %s333_s18 }
  0x80   : > { %p4996_p3 = scmp.ne.s32.totalorder %s333_s18, %s4995_s3  ;;  %p5004_p2 = scmp.lt.s32.totalorder %s4995_s3, %s4995_s3 }
  0x82   : > { %p4998_p6 = pnand %p4996_p3, %p6201_p7  ;;  %p5005_p11 = por %p5004_p2, %p5003_p12 }
  0x84   : > { %p4999_p4 = pneg %p4998_p6 }
  0x86   : > { %p5006_p10 = pnand %p5005_p11, %p4999_p4 }
  0x88   : > { %5009 = shalt.err (!%p5006_p10)
}
  0x89   : > { %4663 = dma.hbm_to_vmem [thread:$0]  (!%p6202_p1), %s6143_s5, 2048, %s333_s18, [#allocation12], %s6200_s23, %s6200_s23, %s6199_s9  }
  0x8a   : > { %s5468_s12 = scalar_lea.hbm %s6138_s0, %s5363_s8  ;;  %s358_s20 = scalar_lea.vmem [#allocation2], %s5360_s24 }
  0x8b   : > { %s365_s27 = sshll.u32 %s358_s20, 4  ;;  %s6203_s26 = sand.u32 1, %s5152_s29   ;;  %s5471_s27 = int_to_ptr.vmem [resolvable:$true] %s365_s27 }
  0x8c   : > { %s5475_s6 = scalar_lea.sflag [#allocation3], %s6203_s26  ;;  %s5010_s13 = scalar_lea.hbm %s5468_s12, 512 }
  0x8d   : > { %p5011_p10 = scmp.ne.s32.totalorder %s5468_s12, %s5010_s13  ;;  %p6204_p7 = scmp.ne.s32.totalorder %s6198_s25, 0 }
  0x8e   : > { %s5015_s22 = scalar_lea.hbm %s6138_s0, 1024  ;;  %p5016_p0 = scmp.lt.u32.totalorder %s5468_s12, %s6138_s0 }
  0x8f   : > { %p5013_p1 = pnand %p5011_p10, %p6204_p7  ;;  %p5017_p13 = scmp.lt.u32.totalorder %s5015_s22, %s5010_s13 }
  0x90   : > { %p5019_p9 = scmp.lt.u32.totalorder %s5010_s13, %s5468_s12 }
  0x91   : > { %p5014_p8 = pneg %p5013_p1  ;;  %p5018_p5 = por %p5017_p13, %p5016_p0 }
  0x93   : > { %p5020_p3 = por %p5019_p9, %p5018_p5 }
  0x95   : > { %p5021_p6 = pnand %p5020_p3, %p5014_p8 }
  0x97   : > { %5024 = shalt.err (!%p5021_p6)
}
  0x98   : > { %s5025_s1 = scalar_lea.vmem %s5471_s27, 512  ;;  %s5172_s16 = smov [#allocation2]  }
  0x99   : > { %p5026_p4 = scmp.ne.s32.totalorder %s5471_s27, %s5025_s1  ;;  %s5030_s10 = sshll.u32 %s5172_s16, 4  ;;  %s5031_s10 = int_to_ptr.vmem [resolvable:$false] %s5030_s10 }
  0x9a   : > { %s5032_s20 = scalar_lea.vmem %s5031_s10, 1024  ;;  %p5033_p11 = scmp.lt.s32.totalorder %s5471_s27, %s5031_s10 }
  0x9b   : > { %p5028_p12 = pnand %p5026_p4, %p6204_p7  ;;  %p5034_p10 = scmp.lt.s32.totalorder %s5032_s20, %s5025_s1 }
  0x9d   : > { %p5029_p2 = pneg %p5028_p12  ;;  %p5035_p1 = por %p5034_p10, %p5033_p11 }
  0x9f   : > { %p5036_p0 = pnand %p5035_p1, %p5029_p2 }
  0xa1   : > { %5039 = shalt.err (!%p5036_p0)
}
  0xa2   : > { %p6205_p8 = scmp.ne.s32.totalorder %s6194_s15, 0  ;;  %s5506_s18 = scalar_lea.hbm %s6140_s2, %s5363_s8 }
  0xa3   : > { %s400_s19 = scalar_lea.vmem [#allocation7], %s5360_s24  ;;  %s5040_s3 = scalar_lea.hbm %s5506_s18, 512 }
  0xa4   : > { %4667 = dma.hbm_to_vmem [thread:$0]  (!%p6205_p8), %s5468_s12, 512, %s5471_s27, %s5475_s6, %s6200_s23, %s6200_s23, %s6199_s9  }
  0xa5   : > { %s407_s22 = sshll.u32 %s400_s19, 4  ;;  %p5041_p13 = scmp.ne.s32.totalorder %s5506_s18, %s5040_s3  ;;  %s5509_s22 = int_to_ptr.vmem [resolvable:$true] %s407_s22 }
  0xa6   : > { %s5045_s27 = scalar_lea.hbm %s6140_s2, 1024  ;;  %p5046_p3 = scmp.lt.u32.totalorder %s5506_s18, %s6140_s2 }
  0xa7   : > { %p5043_p5 = pnand %p5041_p13, %p6204_p7  ;;  %p5047_p6 = scmp.lt.u32.totalorder %s5045_s27, %s5040_s3 }
  0xa8   : > { %p5049_p12 = scmp.lt.u32.totalorder %s5040_s3, %s5506_s18 }
  0xa9   : > { %p5044_p9 = pneg %p5043_p5  ;;  %p5048_p4 = por %p5047_p6, %p5046_p3 }
  0xab   : > { %p5050_p2 = por %p5049_p12, %p5048_p4 }
  0xad   : > { %p5051_p11 = pnand %p5050_p2, %p5044_p9 }
  0xaf   : > { %5054 = shalt.err (!%p5051_p11)
}
  0xb0   : > { %s5055_s24 = scalar_lea.vmem %s5509_s22, 512  ;;  %s5173_s1 = smov [#allocation7]  }
  0xb1   : > { %p5056_p10 = scmp.ne.s32.totalorder %s5509_s22, %s5055_s24  ;;  %s5060_s16 = sshll.u32 %s5173_s1, 4  ;;  %s5061_s16 = int_to_ptr.vmem [resolvable:$false] %s5060_s16 }
  0xb2   : > { %s5062_s10 = scalar_lea.vmem %s5061_s16, 1024  ;;  %p5063_p13 = scmp.lt.s32.totalorder %s5509_s22, %s5061_s16 }
  0xb3   : > { %p5058_p1 = pnand %p5056_p10, %p6204_p7  ;;  %p5064_p5 = scmp.lt.s32.totalorder %s5062_s10, %s5055_s24 }
  0xb5   : > { %p5059_p0 = pneg %p5058_p1  ;;  %p5065_p3 = por %p5064_p5, %p5063_p13 }
  0xb7   : > { %p5066_p6 = pnand %p5065_p3, %p5059_p0 }
  0xb9   : > { %5069 = shalt.err (!%p5066_p6)
}
  0xba   : > { %4673 = dma.hbm_to_vmem [thread:$0]  (!%p6205_p8), %s5506_s18, 512, %s5509_s22, %s5388_s21, %s6200_s23, %s6200_s23, %s6199_s9  }
  0xbb   : > { %p6206_p7 = scmp.ne.s32.totalorder %s6188_s17, 0 }
  0xbc   : > { %s5539_s25 = sand.u32 (!%p6206_p7), 1, %s5148_s28   ;;  %p6207_p9 = scmp.ne.s32.totalorder (!%p6206_p7), %s6183_s14, 0 }
  0xbd   : > { %425 = sbr.rel (%p6206_p7) target bundleno = 9207 (0x23f7), region = 52  ;;  %s4003_s20 = sshll.u32 (!%p6206_p7), %s5539_s25, 5 }
  0xbe   : > { %s428_s26 = scalar_lea.sflag (!%p6206_p7), [#allocation3], %s5539_s25  ;;  %s5543_s13 = scalar_lea.vmem (!%p6206_p7), [#allocation2], %s4003_s20 }
  0xc4   : > { %5123 = dma.done.wait (%p6207_p9), %s428_s26, 512  }
  0xc5   : > { %5125 = vsyncadd (%p6207_p9), %s428_s26, 4294966784  ;;  %s436_s15 = sand.u32 1, %s5267_s11   ;;  %s5550_s21 = scalar_lea.vmem [#allocation5], %s4003_s20 }
  0xc6   : > { %s437_s17 = scalar_lea.sflag [#allocation6], %s436_s15 }
  0xc7   : > { %5127 = dma.done.wait (%p6207_p9), %s437_s17, 1024  }
  0xc8   : > { %5129 = vsyncadd (%p6207_p9), %s437_s17, 4294966272  ;;  %s5556_s9 = scalar_lea.vmem [#allocation7], %s4003_s20  ;;  %p6208_p8 = scmp.eq.s32.totalorder %s5267_s11, 0 }
  0xca   : > { %5131 = dma.done.wait (%p6208_p8), [#allocation9], 4096   ;;  %p6209_p4 = pmov %p6208_p8 }
  0xcc   : > { %5133 = vsyncadd (%p6209_p4), [#allocation9], 4294963200  ;;  %p6210_p12 = pmov %p6209_p4 }
  0xcd   : > { %p6211_p2 = pmov %p6209_p4 }
  0xce   : > { %5135 = dma.done.wait (%p6210_p12), [#allocation12], 2048  }
  0xcf   : > { %5137 = vsyncadd (%p6211_p2), [#allocation12], 4294965248  ;;  %vm556_vm0 = vcmask 64512   ;;  %v5573_v1 = vld [vmem:[%s5550_s21] sm:$0xff]  ;;  %s6214_s23 = sld [smem:[#allocation29_spill]]  ;;  %s5174_s18 = smov 8   ;;  %v558_v7 = vlaneseq }
  0xd0   : > { %vm5568_vm1 = vmpackc.low %vm556_vm0, %vm556_vm0  ;;  %v539_v2 = vld [vmem:[#allocation10] sm:$0xff]  ;;  %p514_p11 = scmp.lt.s32.totalorder %s5156_s30, 1  ;;  %s6215_s7 = sld [smem:[#allocation28_spill]]  ;;  %vm649_vm2 = vcmask 130048   ;;  %v5618_v33 = vld [vmem:[%s5550_s21 + $0x8] sm:$0xff]  ;;  %vm953_vm3 = vcmask 130112  }
  0xd1   : > { %v5576_v3 = vld [vmem:[%s5543_s13] sm:$0xff]  ;;  %v4474_v4 = vpack.c.bf16 %v539_v2, %v5573_v1  ;;  %v559_v8 = vshrl.u32 %v558_v7, 7  ;;  %v540_v34 = vld [vmem:[#allocation10 + $0x8] sm:$0xff]  ;;  %s4009_s27 = sshll.u32 %s5539_s25, 4  ;;  %s5175_s26 = smov 16   ;;  %vm1154_vm4 = vcmask 195712  }
  0xd2   : > { %4254 = vmatprep.mubr.msk.f32.mxu0 %vm556_vm0, %v5576_v3  ;;  %v535_v6 = vld [vmem:[#allocation8] sm:$0xff]  ;;  %s515_s19 = scalar_select %p514_p11, %s5156_s30, 1  ;;  %v4484_v35 = vpack.c.bf16 %v540_v34, %v5618_v33  ;;  %v5625_v42 = vld [vmem:[%s5543_s13 + $0x8] sm:$0xff]  ;;  %vm1355_vm5 = vcmask 261312   ;;  %vm1580_vm6 = vcmask 326912   ;;  %vm1775_vm7 = vcmask 392512  }
  0xd3   : > { %4476 = vmatprep.subr.msk.bf16.mxu0 %vm5568_vm1, %v4474_v4  ;;  %v5600_v11 = vsub.s32 0, %v559_v8  ;;  %v5614_v30 = vld [vmem:[%s5556_s9] sm:$0xff]  ;;  %v536_v43 = vld [vmem:[#allocation8 + $0x8] sm:$0xff]  ;;  %s5634_s6 = scalar_lea.vmem [#allocation13], %s4009_s27  ;;  %s5177_s15 = smov 32   ;;  %vm1970_vm8 = vcmask 458112  }
  0xd4   : > { %4479 = vmatpush3.bf16.xpose.msk.msra.mxu0 %vm5568_vm1, %v4474_v4  ;;  %v543_v31 = vld [vmem:[#allocation11] sm:$0xff]  ;;  %v5647_v62 = vld [vmem:[%s5556_s9 + $0x8] sm:$0xff]  ;;  %v5651_v4 = vld [vmem:[%s5550_s21 + $0x10] sm:$0xff]  ;;  %s5178_s17 = smov 40   ;;  %s5181_s11 = smov 64   ;;  %vm2165_vm9 = vcmask 523712  }
  0xd5   : > { %v4010_v5 = vld [vmem:[%s6214_s23] ss:$0 sm:$0xff]  ;;  %v4480_v32 = vpack.c.bf16 %v543_v31, %v5614_v30  ;;  %v544_v63 = vld [vmem:[#allocation11 + $0x8] sm:$0xff]  ;;  %s5182_s14 = smov 72   ;;  %s5184_s22 = smov 88   ;;  %vm2390_vm10 = vcmask 589312  }
  0xd6   : > { %553 = vrot.lane.b32.xlu0 %v4010_v5, %s5174_s18  ;;  %s5595_s12 = scalar_lea.vmem %s6215_s7, %s515_s19  ;;  %v4490_v2 = vpack.c.bf16 %v544_v63, %v5647_v62  ;;  %v541_v5 = vld [vmem:[#allocation10 + $0x10] sm:$0xff]  ;;  %s5183_s19 = smov 80   ;;  %vm2585_vm11 = vcmask 654912   ;;  %vm2780_vm12 = vcmask 720512   ;;  %vm2975_vm13 = vcmask 786112  }
  0xd7   : > { %v5598_v10 = vld [vmem:[%s5595_s12] sm:$0x1]  ;;  %4481 = vmatprep.subr.bf16.mxu1 %v4480_v32  ;;  %s5185_s3 = smov 96   ;;  %s5186_s7 = smov 104   ;;  %vm3200_vm14 = vcmask 851712   ;;  %vm3395_vm15 = vcmask 917312  }
  0xd8   : > { %4483 = vmatpush3.bf16.msra.mxu1 %v4480_v32  ;;  %4491 = vmatprep.subr.bf16.mxu0 %v4490_v2  ;;  %s5188_s27 = smov 120   ;;  %s6216_s8 = sld [smem:[#allocation22_spill]] }
  0xd9   : > { %4486 = vmatprep.subr.msk.bf16.mxu1 %vm5568_vm1, %v4484_v35  ;;  %s4121_s24 = sshll.u32 %s5156_s30, 8  ;;  %s3803_s1 = sshll.u32 %s5634_s6, 4  ;;  %s6086_s1 = int_to_ptr.vmem [resolvable:$true] %s3803_s1 }
  0xda   : > { %s6217_s20 = sld [smem:[#allocation30_spill]]  ;;  %s5189_s30 = smov [#allocation13]  }
  0xdb   : > { %4255 = vmatmul.mubr.msk.f32.vlgmr.msra.gmra.mrb[0].mxu0 %vm556_vm0, %v535_v6  ;;  %v4494_v6 = vpack.c.bf16 %v541_v5, %v5651_v4 }
  0xdc   : > { %4493 = vmatpush3.bf16.msra.mxu0 %v4490_v2 }
  0xdd   : > { %4496 = vmatprep.subr.msk.bf16.mxu0 %vm5568_vm1, %v4494_v6 }
  0xde   : > { %p6218_p1 = scmp.ne.s32.totalorder %s6216_s8, 0 }
 0x148   : > { %v554_v9 = vpop.permute.xlu0 %553 }
 0x149   : > { %v557_v12 = vsel %vm556_vm0, %v5598_v10, %v554_v9 }
 0x14a   : > { %v5605_v13 = vrot.slane %v557_v12, %v5600_v11 }
 0x1ae   : > { %v4256_v14 = vpop.f32.mrb[0].mxu0 }
 0x1af   : > { %v646_v15 = vadd.f32 %v4256_v14, %v5605_v13  ;;  %v640_v16 = vpop.f32.mrb[1].mxu0 }
 0x1b0   : > { %v641_v17 = vadd.f32 %v640_v16, %v5605_v13  ;;  %v5658_v16 = vld [vmem:[%s5543_s13 + $0x10] sm:$0xff] }
 0x1b1   : > { %v653_v18 = vsel %vm649_vm2, %v646_v15, -inf }
 0x1b2   : > { %654 = vmax.xlane.f32.xlu1 %v653_v18  ;;  %v650_v19 = vsel %vm649_vm2, %v641_v17, -inf }
 0x1b3   : > { %651 = vmax.xlane.f32.xlu0 %v650_v19 }
 0x23f   : > { %v655_v20 = vpop.xlane.xlu1 %654 }
 0x240   : > { %v657_v21 = vsub.f32 %v646_v15, %v655_v20  ;;  %v652_v22 = vpop.xlane.xlu0 %651 }
 0x241   : > { %v656_v23 = vsub.f32 %v641_v17, %v652_v22  ;;  %v537_v17 = vld [vmem:[#allocation8 + $0x10] sm:$0xff] }
 0x242   : > { %v660_v24 = vmul.f32 1.442695, %v657_v21 }
 0x243   : > { %v658_v25 = vmul.f32 1.442695, %v656_v23 }
 0x245   : > { %4755 = vpow2.f32 %v658_v25 }
 0x246   : > { %4757 = vpow2.f32 %v660_v24 }
 0x24f   : > { %v4756_v26 = vpop.eup %4755 }
 0x250   : > { %v662_v27 = vsel %vm649_vm2, %v4756_v26, 0.0  ;;  %v4758_v28 = vpop.eup %4757 }
 0x251   : > { %663 = vadd.xlane.f32.xlu1 %v662_v27  ;;  %v665_v29 = vsel %vm649_vm2, %v4758_v28, 0.0 }
 0x255   : > { %666 = vadd.xlane.f32.xlu1 %v665_v29 }
 0x2de   : > { %v664_v36 = vpop.xlane.xlu1 %663 }
 0x2df   : > { %4759 = vrcp.f32 %v664_v36 }
 0x2e2   : > { %v667_v37 = vpop.xlane.xlu1 %666 }
 0x2e3   : > { %4761 = vrcp.f32 %v667_v37 }
 0x2e9   : > { %v4760_v38 = vpop.eup %4759 }
 0x2ea   : > { %v670_v39 = vmul.f32 %v4760_v38, %v4756_v26  ;;  %v5677_v38 = vld [vmem:[%s5556_s9 + $0x10] sm:$0xff] }
 0x2ec   : > { %4261 = vmatprep.mubr.msk.f32.mxu1 %vm649_vm2, %v670_v39  ;;  %v545_v39 = vld [vmem:[#allocation11 + $0x10] sm:$0xff] }
 0x2ed   : > { %v4762_v40 = vpop.eup %4761 }
 0x2ee   : > { %v671_v41 = vmul.f32 %v4762_v40, %v4758_v28  ;;  %v4500_v40 = vpack.c.bf16 %v545_v39, %v5677_v38 }
 0x2f0   : > { %4262 = vmatmul.mubr.msk.f32.vlgmr.msra.gmra.mrb[0].mxu1 %vm649_vm2, %v671_v41  ;;  %v5681_v41 = vld [vmem:[%s5550_s21 + $0x18] sm:$0xff] }
 0x2f1   : > { %4489 = vmatpush3.bf16.xpose.msk.msra.mxu1 %vm5568_vm1, %v4484_v35  ;;  %4268 = vmatprep.mubr.msk.f32.mxu1 %vm556_vm0, %v5625_v42 }
 0x2f2   : > { %4501 = vmatprep.subr.bf16.mxu1 %v4500_v40 }
 0x2f8   : > { %4269 = vmatmul.mubr.msk.f32.vlgmr.msra.gmra.mrb[2].mxu1 %vm556_vm0, %v536_v43  ;;  %v542_v43 = vld [vmem:[#allocation10 + $0x18] sm:$0xff] }
 0x2f9   : > { %4503 = vmatpush3.bf16.msra.mxu1 %v4500_v40 }
 0x3c3   : > { %v4263_v44 = vpop.f32.mrb[0].mxu1 }
 0x3c4   : > { %754 = vst.msk [vmem:[%s5634_s6 + $0x8] sm:$0xff] %vm556_vm0, %v4263_v44  ;;  %v744_v45 = vpop.f32.mrb[1].mxu1  ;;  %v4504_v44 = vpack.c.bf16 %v542_v43, %v5681_v41 }
 0x3c5   : > { %753 = vst.msk [vmem:[%s5634_s6] sm:$0xff] %vm556_vm0, %v744_v45 }
 0x3c6   : > { %4506 = vmatprep.subr.msk.bf16.mxu1 %vm5568_vm1, %v4504_v44 }
 0x3cb   : > { %v4270_v46 = vpop.f32.mrb[2].mxu1 }
 0x3cc   : > { %v833_v47 = vpop.f32.mrb[3].mxu1  ;;  %v839_v49 = vadd.f32 %v4270_v46, %v5605_v13 }
 0x3cd   : > { %v834_v48 = vadd.f32 %v833_v47, %v5605_v13 }
 0x3ce   : > { %v845_v51 = vsel %vm649_vm2, %v839_v49, -inf }
 0x3cf   : > { %v842_v50 = vsel %vm649_vm2, %v834_v48, -inf }
 0x3d0   : > { %843 = vmax.xlane.f32.xlu1 %v842_v50 }
 0x3d4   : > { %846 = vmax.xlane.f32.xlu1 %v845_v51  ;;  %v5688_v51 = vld [vmem:[%s5543_s13 + $0x18] sm:$0xff] }
 0x45d   : > { %v844_v52 = vpop.xlane.xlu1 %843 }
 0x45e   : > { %v848_v53 = vsub.f32 %v834_v48, %v844_v52  ;;  %v538_v52 = vld [vmem:[#allocation8 + $0x18] sm:$0xff] }
 0x460   : > { %v850_v54 = vmul.f32 1.442695, %v848_v53 }
 0x461   : > { %v847_v55 = vpop.xlane.xlu1 %846 }
 0x462   : > { %4763 = vpow2.f32 %v850_v54  ;;  %v849_v56 = vsub.f32 %v839_v49, %v847_v55 }
 0x464   : > { %v852_v57 = vmul.f32 1.442695, %v849_v56 }
 0x466   : > { %4765 = vpow2.f32 %v852_v57 }
 0x46c   : > { %v4764_v58 = vpop.eup %4763 }
 0x46d   : > { %v854_v59 = vsel %vm649_vm2, %v4764_v58, 0.0 }
 0x46e   : > { %855 = vadd.xlane.f32.xlu1 %v854_v59 }
 0x470   : > { %v4766_v60 = vpop.eup %4765 }
 0x471   : > { %v857_v61 = vsel %vm649_vm2, %v4766_v60, 0.0 }
 0x472   : > { %858 = vadd.xlane.f32.xlu1 %v857_v61 }
 0x4fb   : > { %v856_v7 = vpop.xlane.xlu1 %855 }
 0x4fc   : > { %4767 = vrcp.f32 %v856_v7 }
 0x4ff   : > { %v859_v8 = vpop.xlane.xlu1 %858 }
 0x500   : > { %4769 = vrcp.f32 %v859_v8 }
 0x506   : > { %v4768_v9 = vpop.eup %4767 }
 0x507   : > { %v862_v12 = vmul.f32 %v4768_v9, %v4764_v58 }
 0x509   : > { %4275 = vmatprep.mubr.msk.f32.mxu0 %vm649_vm2, %v862_v12 }
 0x50a   : > { %v4770_v14 = vpop.eup %4769 }
 0x50b   : > { %v863_v15 = vmul.f32 %v4770_v14, %v4766_v60  ;;  %v5707_v14 = vld [vmem:[%s5556_s9 + $0x18] sm:$0xff] }
 0x50d   : > { %4276 = vmatmul.mubr.msk.f32.vlgmr.msra.gmra.mrb[2].mxu0 %vm649_vm2, %v863_v15  ;;  %v546_v15 = vld [vmem:[#allocation11 + $0x18] sm:$0xff] }
 0x50e   : > { %4499 = vmatpush3.bf16.xpose.msk.msra.mxu0 %vm5568_vm1, %v4494_v6  ;;  %4282 = vmatprep.mubr.msk.f32.mxu0 %vm556_vm0, %v5658_v16 }
 0x515   : > { %4283 = vmatmul.mubr.msk.f32.vlgmr.msra.gmra.mrb[4].mxu0 %vm556_vm0, %v537_v17  ;;  %v4510_v17 = vpack.c.bf16 %v546_v15, %v5707_v14 }
 0x517   : > { %4511 = vmatprep.subr.bf16.mxu0 %v4510_v17 }
 0x518   : > { %4513 = vmatpush3.bf16.msra.mxu0 %v4510_v17 }
 0x5e0   : > { %v5666_v18 = vpop.f32.mrb[2].mxu0 }
 0x5e1   : > { %v5668_v19 = vpop.f32.mrb[3].mxu0 }
 0x5e8   : > { %v4284_v20 = vpop.f32.mrb[4].mxu0 }
 0x5e9   : > { %v1034_v21 = vpop.f32.mrb[5].mxu0  ;;  %v1040_v23 = vadd.f32 %v4284_v20, %v5605_v13  ;;  %v1364_v20 = vld [vmem:[#allocation10 + $0x20] sm:$0xff] }
 0x5ea   : > { %v1035_v22 = vadd.f32 %v1034_v21, %v5605_v13  ;;  %v4514_v21 = vpack.c.bf16 %v1364_v20, %v5573_v1 }
 0x5eb   : > { %v1046_v25 = vsel %vm649_vm2, %v1040_v23, -inf }
 0x5ec   : > { %v1043_v24 = vsel %vm649_vm2, %v1035_v22, -inf  ;;  %4516 = vmatprep.subr.msk.bf16.mxu0 %vm5568_vm1, %v4514_v21 }
 0x5ed   : > { %1044 = vmax.xlane.f32.xlu1 %v1043_v24 }
 0x5f1   : > { %1047 = vmax.xlane.f32.xlu1 %v1046_v25 }
 0x67a   : > { %v1045_v26 = vpop.xlane.xlu1 %1044 }
 0x67b   : > { %v1049_v27 = vsub.f32 %v1035_v22, %v1045_v26  ;;  %v4036_v22 = vld [vmem:[%s6214_s23 + $0x1] ss:$0 sm:$0xff] }
 0x67d   : > { %v1051_v28 = vmul.f32 1.442695, %v1049_v27 }
 0x67e   : > { %v1048_v29 = vpop.xlane.xlu1 %1047 }
 0x67f   : > { %4771 = vpow2.f32 %v1051_v28  ;;  %v1050_v31 = vsub.f32 %v1040_v23, %v1048_v29  ;;  %v1359_v29 = vld [vmem:[#allocation8 + $0x20] sm:$0xff] }
 0x681   : > { %v1053_v32 = vmul.f32 1.442695, %v1050_v31 }
 0x683   : > { %4773 = vpow2.f32 %v1053_v32 }
 0x689   : > { %v4772_v34 = vpop.eup %4771 }
 0x68a   : > { %v1055_v35 = vsel %vm649_vm2, %v4772_v34, 0.0 }
 0x68b   : > { %1056 = vadd.xlane.f32.xlu0 %v1055_v35 }
 0x68d   : > { %v4774_v36 = vpop.eup %4773 }
 0x68e   : > { %v1058_v37 = vsel %vm649_vm2, %v4774_v36, 0.0 }
 0x68f   : > { %1059 = vadd.xlane.f32.xlu1 %v1058_v37 }
 0x718   : > { %v1057_v45 = vpop.xlane.xlu0 %1056 }
 0x719   : > { %4775 = vrcp.f32 %v1057_v45 }
 0x71c   : > { %v1060_v46 = vpop.xlane.xlu1 %1059 }
 0x71d   : > { %4777 = vrcp.f32 %v1060_v46 }
 0x723   : > { %v4776_v47 = vpop.eup %4775 }
 0x724   : > { %v1063_v48 = vmul.f32 %v4776_v47, %v4772_v34 }
 0x726   : > { %4289 = vmatprep.mubr.msk.f32.mxu1 %vm649_vm2, %v1063_v48 }
 0x727   : > { %v4778_v49 = vpop.eup %4777 }
 0x728   : > { %v1064_v50 = vmul.f32 %v4778_v49, %v4774_v36 }
 0x72a   : > { %4290 = vmatmul.mubr.msk.f32.vlgmr.msra.gmra.mrb[4].mxu1 %vm649_vm2, %v1064_v50 }
 0x72b   : > { %4509 = vmatpush3.bf16.xpose.msk.msra.mxu1 %vm5568_vm1, %v4504_v44  ;;  %4296 = vmatprep.mubr.msk.f32.mxu1 %vm556_vm0, %v5688_v51 }
 0x732   : > { %4297 = vmatmul.mubr.msk.f32.vlgmr.msra.gmra.mrb[6].mxu1 %vm556_vm0, %v538_v52 }
 0x7fd   : > { %v5696_v53 = vpop.f32.mrb[4].mxu1 }
 0x7fe   : > { %v5698_v54 = vpop.f32.mrb[5].mxu1 }
 0x805   : > { %v4298_v55 = vpop.f32.mrb[6].mxu1 }
 0x806   : > { %v1241_v56 = vadd.f32 %v4298_v55, %v5605_v13  ;;  %v1235_v57 = vpop.f32.mrb[7].mxu1 }
 0x807   : > { %v1236_v58 = vadd.f32 %v1235_v57, %v5605_v13 }
 0x808   : > { %v1247_v59 = vsel %vm649_vm2, %v1241_v56, -inf }
 0x809   : > { %1248 = vmax.xlane.f32.xlu1 %v1247_v59  ;;  %v1244_v60 = vsel %vm649_vm2, %v1236_v58, -inf  ;;  %v1369_v59 = vld [vmem:[#allocation11 + $0x20] sm:$0xff] }
 0x80a   : > { %1245 = vmax.xlane.f32.xlu0 %v1244_v60  ;;  %v4520_v60 = vpack.c.bf16 %v1369_v59, %v5614_v30 }
 0x80c   : > { %4521 = vmatprep.subr.bf16.mxu1 %v4520_v60 }
 0x80d   : > { %4523 = vmatpush3.bf16.msra.mxu1 %v4520_v60 }
 0x896   : > { %v1249_v61 = vpop.xlane.xlu1 %1248 }
 0x897   : > { %v1251_v63 = vsub.f32 %v1241_v56, %v1249_v61  ;;  %v1246_v2 = vpop.xlane.xlu0 %1245  ;;  %v1365_v61 = vld [vmem:[#allocation10 + $0x28] sm:$0xff] }
 0x898   : > { %v1250_v5 = vsub.f32 %v1236_v58, %v1246_v2 }
 0x899   : > { %v1254_v6 = vmul.f32 1.442695, %v1251_v63  ;;  %v4524_v63 = vpack.c.bf16 %v1365_v61, %v5618_v33 }
 0x89a   : > { %v1252_v7 = vmul.f32 1.442695, %v1250_v5 }
 0x89b   : > { %4779 = vpow2.f32 %v1254_v6  ;;  %4526 = vmatprep.subr.msk.bf16.mxu1 %vm5568_vm1, %v4524_v63 }
 0x89c   : > { %4781 = vpow2.f32 %v1252_v7 }
 0x8a5   : > { %v4780_v8 = vpop.eup %4779 }
 0x8a6   : > { %v4782_v9 = vpop.eup %4781  ;;  %v1259_v12 = vsel %vm649_vm2, %v4780_v8, 0.0 }
 0x8a7   : > { %1260 = vadd.xlane.f32.xlu1 %v1259_v12  ;;  %v1256_v13 = vsel %vm649_vm2, %v4782_v9, 0.0  ;;  %v1360_v12 = vld [vmem:[#allocation8 + $0x28] sm:$0xff] }
 0x8a8   : > { %1257 = vadd.xlane.f32.xlu0 %v1256_v13 }
 0x8be   : > { %1380 = vrot.lane.b32.xlu0 %v4036_v22, %s5174_s18 }
 0x934   : > { %v1261_v23 = vpop.xlane.xlu1 %1260 }
 0x935   : > { %4783 = vrcp.f32 %v1261_v23  ;;  %v1258_v24 = vpop.xlane.xlu0 %1257 }
 0x936   : > { %4785 = vrcp.f32 %v1258_v24 }
 0x939   : > { %v1381_v32 = vpop.permute.xlu0 %1380 }
 0x93a   : > { %v1383_v35 = vsel %vm556_vm0, %v5598_v10, %v1381_v32 }
 0x93b   : > { %v5731_v36 = vrot.slane %v1383_v35, %v5600_v11 }
 0x93f   : > { %v4784_v25 = vpop.eup %4783 }
 0x940   : > { %v4786_v26 = vpop.eup %4785  ;;  %v1265_v28 = vmul.f32 %v4784_v25, %v4780_v8 }
 0x941   : > { %v1264_v27 = vmul.f32 %v4786_v26, %v4782_v9 }
 0x943   : > { %4303 = vmatprep.mubr.msk.f32.mxu0 %vm649_vm2, %v1264_v27 }
 0x944   : > { %4304 = vmatmul.mubr.msk.f32.vlgmr.msra.gmra.mrb[6].mxu0 %vm649_vm2, %v1265_v28 }
 0x945   : > { %4519 = vmatpush3.bf16.xpose.msk.msra.mxu0 %vm5568_vm1, %v4514_v21  ;;  %4310 = vmatprep.mubr.msk.f32.mxu0 %vm556_vm0, %v5576_v3 }
 0x94c   : > { %4311 = vmatmul.mubr.msk.f32.vlgmr.msra.gmra.mrb[8].mxu0 %vm556_vm0, %v1359_v29 }
 0xa17   : > { %v5724_v31 = vpop.f32.mrb[6].mxu0 }
 0xa18   : > { %v5726_v34 = vpop.f32.mrb[7].mxu0 }
 0xa1f   : > { %v4312_v37 = vpop.f32.mrb[8].mxu0 }
 0xa20   : > { %v1460_v39 = vpop.f32.mrb[9].mxu0  ;;  %v1466_v43 = vadd.f32 %v4312_v37, %v5731_v36 }
 0xa21   : > { %v1461_v40 = vadd.f32 %v1460_v39, %v5731_v36 }
 0xa22   : > { %v1472_v45 = vsel %vm649_vm2, %v1466_v43, -inf }
 0xa23   : > { %v1469_v44 = vsel %vm649_vm2, %v1461_v40, -inf }
 0xa24   : > { %1470 = vmax.xlane.f32.xlu1 %v1469_v44 }
 0xa28   : > { %1473 = vmax.xlane.f32.xlu1 %v1472_v45  ;;  %v1366_v45 = vld [vmem:[#allocation10 + $0x30] sm:$0xff] }
 0xab1   : > { %v1471_v46 = vpop.xlane.xlu1 %1470 }
 0xab2   : > { %v1475_v47 = vsub.f32 %v1461_v40, %v1471_v46  ;;  %v4534_v46 = vpack.c.bf16 %v1366_v45, %v5651_v4 }
 0xab4   : > { %v1477_v48 = vmul.f32 1.442695, %v1475_v47 }
 0xab5   : > { %v1474_v49 = vpop.xlane.xlu1 %1473 }
 0xab6   : > { %4787 = vpow2.f32 %v1477_v48  ;;  %v1476_v50 = vsub.f32 %v1466_v43, %v1474_v49  ;;  %v1370_v43 = vld [vmem:[#allocation11 + $0x28] sm:$0xff] }
 0xab7   : > { %v4530_v44 = vpack.c.bf16 %v1370_v43, %v5647_v62 }
 0xab8   : > { %v1479_v52 = vmul.f32 1.442695, %v1476_v50 }
 0xab9   : > { %4531 = vmatprep.subr.bf16.mxu0 %v4530_v44 }
 0xaba   : > { %4789 = vpow2.f32 %v1479_v52  ;;  %4533 = vmatpush3.bf16.msra.mxu0 %v4530_v44 }
 0xabb   : > { %4536 = vmatprep.subr.msk.bf16.mxu0 %vm5568_vm1, %v4534_v46 }
 0xac0   : > { %v4788_v55 = vpop.eup %4787 }
 0xac1   : > { %v1481_v56 = vsel %vm649_vm2, %v4788_v55, 0.0 }
 0xac2   : > { %1482 = vadd.xlane.f32.xlu1 %v1481_v56  ;;  %v1361_v56 = vld [vmem:[#allocation8 + $0x30] sm:$0xff] }
 0xac4   : > { %v4790_v57 = vpop.eup %4789 }
 0xac5   : > { %v1484_v58 = vsel %vm649_vm2, %v4790_v57, 0.0 }
 0xac6   : > { %1485 = vadd.xlane.f32.xlu1 %v1484_v58 }
 0xb4f   : > { %v1483_v2 = vpop.xlane.xlu1 %1482 }
 0xb50   : > { %4791 = vrcp.f32 %v1483_v2 }
 0xb53   : > { %v1486_v5 = vpop.xlane.xlu1 %1485 }
 0xb54   : > { %4793 = vrcp.f32 %v1486_v5 }
 0xb5a   : > { %v4792_v6 = vpop.eup %4791 }
 0xb5b   : > { %v1489_v7 = vmul.f32 %v4792_v6, %v4788_v55 }
 0xb5d   : > { %4317 = vmatprep.mubr.msk.f32.mxu1 %vm649_vm2, %v1489_v7 }
 0xb5e   : > { %v4794_v8 = vpop.eup %4793 }
 0xb5f   : > { %v1490_v9 = vmul.f32 %v4794_v8, %v4790_v57 }
 0xb61   : > { %4318 = vmatmul.mubr.msk.f32.vlgmr.msra.gmra.mrb[8].mxu1 %vm649_vm2, %v1490_v9 }
 0xb62   : > { %4529 = vmatpush3.bf16.xpose.msk.msra.mxu1 %vm5568_vm1, %v4524_v63  ;;  %4324 = vmatprep.mubr.msk.f32.mxu1 %vm556_vm0, %v5625_v42 }
 0xb69   : > { %4325 = vmatmul.mubr.msk.f32.vlgmr.msra.gmra.mrb[10].mxu1 %vm556_vm0, %v1360_v12 }
 0xc34   : > { %v5750_v13 = vpop.f32.mrb[8].mxu1 }
 0xc35   : > { %v5752_v15 = vpop.f32.mrb[9].mxu1 }
 0xc3c   : > { %v4326_v17 = vpop.f32.mrb[10].mxu1 }
 0xc3d   : > { %v1655_v20 = vpop.f32.mrb[11].mxu1  ;;  %v1661_v22 = vadd.f32 %v4326_v17, %v5731_v36 }
 0xc3e   : > { %v1656_v21 = vadd.f32 %v1655_v20, %v5731_v36 }
 0xc3f   : > { %v1667_v24 = vsel %vm649_vm2, %v1661_v22, -inf }
 0xc40   : > { %v1664_v23 = vsel %vm649_vm2, %v1656_v21, -inf }
 0xc41   : > { %1665 = vmax.xlane.f32.xlu1 %v1664_v23 }
 0xc45   : > { %1668 = vmax.xlane.f32.xlu1 %v1667_v24  ;;  %v1371_v24 = vld [vmem:[#allocation11 + $0x30] sm:$0xff] }
 0xcce   : > { %v1666_v25 = vpop.xlane.xlu1 %1665 }
 0xccf   : > { %v1670_v26 = vsub.f32 %v1656_v21, %v1666_v25  ;;  %v4540_v25 = vpack.c.bf16 %v1371_v24, %v5677_v38 }
 0xcd1   : > { %v1672_v27 = vmul.f32 1.442695, %v1670_v26  ;;  %4541 = vmatprep.subr.bf16.mxu1 %v4540_v25  ;;  %v1367_v26 = vld [vmem:[#allocation10 + $0x38] sm:$0xff] }
 0xcd2   : > { %v1669_v28 = vpop.xlane.xlu1 %1668  ;;  %4543 = vmatpush3.bf16.msra.mxu1 %v4540_v25 }
 0xcd3   : > { %4795 = vpow2.f32 %v1672_v27  ;;  %v1671_v29 = vsub.f32 %v1661_v22, %v1669_v28  ;;  %v4544_v27 = vpack.c.bf16 %v1367_v26, %v5681_v41 }
 0xcd5   : > { %v1674_v32 = vmul.f32 1.442695, %v1671_v29  ;;  %4546 = vmatprep.subr.msk.bf16.mxu1 %vm5568_vm1, %v4544_v27 }
 0xcd7   : > { %4797 = vpow2.f32 %v1674_v32 }
 0xcdd   : > { %v4796_v35 = vpop.eup %4795 }
 0xcde   : > { %v1676_v37 = vsel %vm649_vm2, %v4796_v35, 0.0 }
 0xcdf   : > { %1677 = vadd.xlane.f32.xlu0 %v1676_v37 }
 0xce1   : > { %v4798_v39 = vpop.eup %4797 }
 0xce2   : > { %v1679_v40 = vsel %vm649_vm2, %v4798_v39, 0.0 }
 0xce3   : > { %1680 = vadd.xlane.f32.xlu1 %v1679_v40  ;;  %v1362_v40 = vld [vmem:[#allocation8 + $0x38] sm:$0xff] }
 0xd6c   : > { %v1678_v47 = vpop.xlane.xlu0 %1677 }
 0xd6d   : > { %4799 = vrcp.f32 %v1678_v47 }
 0xd70   : > { %v1681_v48 = vpop.xlane.xlu1 %1680 }
 0xd71   : > { %4801 = vrcp.f32 %v1681_v48 }
 0xd77   : > { %v4800_v49 = vpop.eup %4799 }
 0xd78   : > { %v1684_v50 = vmul.f32 %v4800_v49, %v4796_v35 }
 0xd7a   : > { %4331 = vmatprep.mubr.msk.f32.mxu0 %vm649_vm2, %v1684_v50 }
 0xd7b   : > { %v4802_v52 = vpop.eup %4801 }
 0xd7c   : > { %v1685_v55 = vmul.f32 %v4802_v52, %v4798_v39 }
 0xd7e   : > { %4332 = vmatmul.mubr.msk.f32.vlgmr.msra.gmra.mrb[10].mxu0 %vm649_vm2, %v1685_v55 }
 0xd7f   : > { %4539 = vmatpush3.bf16.xpose.msk.msra.mxu0 %vm5568_vm1, %v4534_v46  ;;  %4338 = vmatprep.mubr.msk.f32.mxu0 %vm556_vm0, %v5658_v16 }
 0xd86   : > { %4339 = vmatmul.mubr.msk.f32.vlgmr.msra.gmra.mrb[12].mxu0 %vm556_vm0, %v1361_v56 }
 0xe51   : > { %v5771_v57 = vpop.f32.mrb[10].mxu0 }
 0xe52   : > { %v5773_v58 = vpop.f32.mrb[11].mxu0 }
 0xe59   : > { %v4340_v59 = vpop.f32.mrb[12].mxu0 }
 0xe5a   : > { %v1850_v60 = vpop.f32.mrb[13].mxu0  ;;  %v1856_v63 = vadd.f32 %v4340_v59, %v5731_v36 }
 0xe5b   : > { %v1851_v61 = vadd.f32 %v1850_v60, %v5731_v36 }
 0xe5c   : > { %v1862_v5 = vsel %vm649_vm2, %v1856_v63, -inf }
 0xe5d   : > { %v1859_v2 = vsel %vm649_vm2, %v1851_v61, -inf }
 0xe5e   : > { %1860 = vmax.xlane.f32.xlu1 %v1859_v2 }
 0xe62   : > { %1863 = vmax.xlane.f32.xlu1 %v1862_v5 }
 0xeeb   : > { %v1861_v6 = vpop.xlane.xlu1 %1860 }
 0xeec   : > { %v1865_v7 = vsub.f32 %v1851_v61, %v1861_v6  ;;  %v1372_v6 = vld [vmem:[#allocation11 + $0x38] sm:$0xff] }
 0xeee   : > { %v1867_v8 = vmul.f32 1.442695, %v1865_v7  ;;  %v4550_v7 = vpack.c.bf16 %v1372_v6, %v5707_v14 }
 0xeef   : > { %v1864_v9 = vpop.xlane.xlu1 %1863 }
 0xef0   : > { %4803 = vpow2.f32 %v1867_v8  ;;  %v1866_v12 = vsub.f32 %v1856_v63, %v1864_v9  ;;  %4551 = vmatprep.subr.bf16.mxu0 %v4550_v7  ;;  %v2174_v8 = vld [vmem:[#allocation10 + $0x40] sm:$0xff] }
 0xef1   : > { %4553 = vmatpush3.bf16.msra.mxu0 %v4550_v7  ;;  %v4554_v9 = vpack.c.bf16 %v2174_v8, %v5573_v1  ;;  %v2169_v1 = vld [vmem:[#allocation8 + $0x40] sm:$0xff] }
 0xef2   : > { %v1869_v17 = vmul.f32 1.442695, %v1866_v12  ;;  %v4062_v12 = vld [vmem:[%s6214_s23 + $0x2] ss:$0 sm:$0xff] }
 0xef3   : > { %4556 = vmatprep.subr.msk.bf16.mxu0 %vm5568_vm1, %v4554_v9 }
 0xef4   : > { %4805 = vpow2.f32 %v1869_v17 }
 0xefa   : > { %v4804_v20 = vpop.eup %4803 }
 0xefb   : > { %v1871_v21 = vsel %vm649_vm2, %v4804_v20, 0.0 }
 0xefc   : > { %1872 = vadd.xlane.f32.xlu1 %v1871_v21 }
 0xefe   : > { %v4806_v22 = vpop.eup %4805 }
 0xeff   : > { %v1874_v23 = vsel %vm649_vm2, %v4806_v22, 0.0 }
 0xf00   : > { %1875 = vadd.xlane.f32.xlu1 %v1874_v23 }
 0xf89   : > { %v1873_v28 = vpop.xlane.xlu1 %1872 }
 0xf8a   : > { %4807 = vrcp.f32 %v1873_v28 }
 0xf8d   : > { %v1876_v29 = vpop.xlane.xlu1 %1875 }
 0xf8e   : > { %4809 = vrcp.f32 %v1876_v29 }
 0xf94   : > { %v4808_v32 = vpop.eup %4807 }
 0xf95   : > { %v1879_v35 = vmul.f32 %v4808_v32, %v4804_v20 }
 0xf97   : > { %4345 = vmatprep.mubr.msk.f32.mxu1 %vm649_vm2, %v1879_v35 }
 0xf98   : > { %v4810_v37 = vpop.eup %4809 }
 0xf99   : > { %v1880_v39 = vmul.f32 %v4810_v37, %v4806_v22 }
 0xf9b   : > { %4346 = vmatmul.mubr.msk.f32.vlgmr.msra.gmra.mrb[12].mxu1 %vm649_vm2, %v1880_v39 }
 0xf9c   : > { %4549 = vmatpush3.bf16.xpose.msk.msra.mxu1 %vm5568_vm1, %v4544_v27  ;;  %4352 = vmatprep.mubr.msk.f32.mxu1 %vm556_vm0, %v5688_v51 }
 0xfa3   : > { %4353 = vmatmul.mubr.msk.f32.vlgmr.msra.gmra.mrb[14].mxu1 %vm556_vm0, %v1362_v40 }
0x106e   : > { %v5792_v43 = vpop.f32.mrb[12].mxu1 }
0x106f   : > { %v5794_v44 = vpop.f32.mrb[13].mxu1 }
0x1076   : > { %v4354_v45 = vpop.f32.mrb[14].mxu1 }
0x1077   : > { %v2045_v46 = vpop.f32.mrb[15].mxu1  ;;  %v2051_v48 = vadd.f32 %v4354_v45, %v5731_v36 }
0x1078   : > { %v2046_v47 = vadd.f32 %v2045_v46, %v5731_v36 }
0x1079   : > { %v2057_v50 = vsel %vm649_vm2, %v2051_v48, -inf }
0x107a   : > { %v2054_v49 = vsel %vm649_vm2, %v2046_v47, -inf }
0x107b   : > { %2055 = vmax.xlane.f32.xlu1 %v2054_v49 }
0x107f   : > { %2058 = vmax.xlane.f32.xlu1 %v2057_v50 }
0x1108   : > { %v2056_v52 = vpop.xlane.xlu1 %2055 }
0x1109   : > { %v2060_v55 = vsub.f32 %v2046_v47, %v2056_v52 }
0x110b   : > { %v2062_v56 = vmul.f32 1.442695, %v2060_v55 }
0x110c   : > { %v2059_v59 = vpop.xlane.xlu1 %2058 }
0x110d   : > { %4811 = vpow2.f32 %v2062_v56  ;;  %v2061_v60 = vsub.f32 %v2051_v48, %v2059_v59  ;;  %v2179_v59 = vld [vmem:[#allocation11 + $0x40] sm:$0xff] }
0x110f   : > { %v2064_v61 = vmul.f32 1.442695, %v2061_v60  ;;  %v4560_v60 = vpack.c.bf16 %v2179_v59, %v5614_v30  ;;  %v2170_v30 = vld [vmem:[#allocation8 + $0x48] sm:$0xff] }
0x1111   : > { %4813 = vpow2.f32 %v2064_v61  ;;  %4561 = vmatprep.subr.bf16.mxu1 %v4560_v60  ;;  %v2175_v61 = vld [vmem:[#allocation10 + $0x48] sm:$0xff] }
0x1112   : > { %4563 = vmatpush3.bf16.msra.mxu1 %v4560_v60 }
0x1117   : > { %v4812_v63 = vpop.eup %4811 }
0x1118   : > { %v2066_v2 = vsel %vm649_vm2, %v4812_v63, 0.0 }
0x1119   : > { %2067 = vadd.xlane.f32.xlu0 %v2066_v2 }
0x111b   : > { %v4814_v5 = vpop.eup %4813 }
0x111c   : > { %v2069_v36 = vsel %vm649_vm2, %v4814_v5, 0.0 }
0x111d   : > { %2070 = vadd.xlane.f32.xlu1 %v2069_v36 }
0x112f   : > { %2190 = vrot.lane.b32.xlu0 %v4062_v12, %s5174_s18 }
0x11a6   : > { %v2068_v17 = vpop.xlane.xlu0 %2067 }
0x11a7   : > { %4815 = vrcp.f32 %v2068_v17 }
0x11aa   : > { %v2071_v20 = vpop.xlane.xlu1 %2070  ;;  %v2191_v26 = vpop.permute.xlu0 %2190 }
0x11ab   : > { %4817 = vrcp.f32 %v2071_v20  ;;  %v2193_v28 = vsel %vm556_vm0, %v5598_v10, %v2191_v26 }
0x11ac   : > { %v5824_v29 = vrot.slane %v2193_v28, %v5600_v11 }
0x11b1   : > { %v4816_v21 = vpop.eup %4815 }
0x11b2   : > { %v2074_v22 = vmul.f32 %v4816_v21, %v4812_v63  ;;  %v4564_v63 = vpack.c.bf16 %v2175_v61, %v5618_v33 }
0x11b4   : > { %4359 = vmatprep.mubr.msk.f32.mxu0 %vm649_vm2, %v2074_v22  ;;  %4566 = vmatprep.subr.msk.bf16.mxu1 %vm5568_vm1, %v4564_v63 }
0x11b5   : > { %v4818_v23 = vpop.eup %4817 }
0x11b6   : > { %v2075_v24 = vmul.f32 %v4818_v23, %v4814_v5 }
0x11b8   : > { %4360 = vmatmul.mubr.msk.f32.vlgmr.msra.gmra.mrb[14].mxu0 %vm649_vm2, %v2075_v24 }
0x11b9   : > { %4559 = vmatpush3.bf16.xpose.msk.msra.mxu0 %vm5568_vm1, %v4554_v9  ;;  %4366 = vmatprep.mubr.msk.f32.mxu0 %vm556_vm0, %v5576_v3 }
0x11c0   : > { %4367 = vmatmul.mubr.msk.f32.vlgmr.msra.gmra.mrb[16].mxu0 %vm556_vm0, %v2169_v1 }
0x128b   : > { %v5817_v25 = vpop.f32.mrb[14].mxu0 }
0x128c   : > { %v5819_v27 = vpop.f32.mrb[15].mxu0 }
0x1293   : > { %v4368_v32 = vpop.f32.mrb[16].mxu0 }
0x1294   : > { %v2270_v35 = vpop.f32.mrb[17].mxu0  ;;  %v2276_v3 = vadd.f32 %v4368_v32, %v5824_v29 }
0x1295   : > { %v2271_v37 = vadd.f32 %v2270_v35, %v5824_v29 }
0x1296   : > { %v2282_v40 = vsel %vm649_vm2, %v2276_v3, -inf }
0x1297   : > { %v2279_v39 = vsel %vm649_vm2, %v2271_v37, -inf }
0x1298   : > { %2280 = vmax.xlane.f32.xlu1 %v2279_v39 }
0x129c   : > { %2283 = vmax.xlane.f32.xlu1 %v2282_v40  ;;  %v2180_v40 = vld [vmem:[#allocation11 + $0x48] sm:$0xff] }
0x1325   : > { %v2281_v45 = vpop.xlane.xlu1 %2280 }
0x1326   : > { %v2285_v46 = vsub.f32 %v2271_v37, %v2281_v45  ;;  %v4570_v45 = vpack.c.bf16 %v2180_v40, %v5647_v62  ;;  %v2171_v62 = vld [vmem:[#allocation8 + $0x50] sm:$0xff] }
0x1328   : > { %v2287_v47 = vmul.f32 1.442695, %v2285_v46  ;;  %4571 = vmatprep.subr.bf16.mxu0 %v4570_v45  ;;  %v2176_v46 = vld [vmem:[#allocation10 + $0x50] sm:$0xff] }
0x1329   : > { %v2284_v48 = vpop.xlane.xlu1 %2283  ;;  %4573 = vmatpush3.bf16.msra.mxu0 %v4570_v45 }
0x132a   : > { %4819 = vpow2.f32 %v2287_v47  ;;  %v2286_v10 = vsub.f32 %v2276_v3, %v2284_v48  ;;  %v4574_v47 = vpack.c.bf16 %v2176_v46, %v5651_v4 }
0x132c   : > { %v2289_v49 = vmul.f32 1.442695, %v2286_v10  ;;  %4576 = vmatprep.subr.msk.bf16.mxu0 %vm5568_vm1, %v4574_v47 }
0x132e   : > { %4821 = vpow2.f32 %v2289_v49 }
0x1334   : > { %v4820_v50 = vpop.eup %4819 }
0x1335   : > { %v2291_v52 = vsel %vm649_vm2, %v4820_v50, 0.0 }
0x1336   : > { %2292 = vadd.xlane.f32.xlu1 %v2291_v52 }
0x1338   : > { %v4822_v55 = vpop.eup %4821 }
0x1339   : > { %v2294_v56 = vsel %vm649_vm2, %v4822_v55, 0.0 }
0x133a   : > { %2295 = vadd.xlane.f32.xlu1 %v2294_v56 }
0x13c3   : > { %v2293_v2 = vpop.xlane.xlu1 %2292 }
0x13c4   : > { %4823 = vrcp.f32 %v2293_v2 }
0x13c7   : > { %v2296_v5 = vpop.xlane.xlu1 %2295 }
0x13c8   : > { %4825 = vrcp.f32 %v2296_v5 }
0x13ce   : > { %v4824_v36 = vpop.eup %4823 }
0x13cf   : > { %v2299_v6 = vmul.f32 %v4824_v36, %v4820_v50 }
0x13d1   : > { %4373 = vmatprep.mubr.msk.f32.mxu1 %vm649_vm2, %v2299_v6 }
0x13d2   : > { %v4826_v7 = vpop.eup %4825 }
0x13d3   : > { %v2300_v8 = vmul.f32 %v4826_v7, %v4822_v55 }
0x13d5   : > { %4374 = vmatmul.mubr.msk.f32.vlgmr.msra.gmra.mrb[16].mxu1 %vm649_vm2, %v2300_v8 }
0x13d6   : > { %4569 = vmatpush3.bf16.xpose.msk.msra.mxu1 %vm5568_vm1, %v4564_v63  ;;  %4380 = vmatprep.mubr.msk.f32.mxu1 %vm556_vm0, %v5625_v42 }
0x13dd   : > { %4381 = vmatmul.mubr.msk.f32.vlgmr.msra.gmra.mrb[18].mxu1 %vm556_vm0, %v2170_v30 }
0x14a8   : > { %v5843_v33 = vpop.f32.mrb[16].mxu1 }
0x14a9   : > { %v5845_v9 = vpop.f32.mrb[17].mxu1 }
0x14b0   : > { %v4382_v12 = vpop.f32.mrb[18].mxu1 }
0x14b1   : > { %v2465_v17 = vpop.f32.mrb[19].mxu1  ;;  %v2471_v21 = vadd.f32 %v4382_v12, %v5824_v29 }
0x14b2   : > { %v2466_v20 = vadd.f32 %v2465_v17, %v5824_v29 }
0x14b3   : > { %v2477_v23 = vsel %vm649_vm2, %v2471_v21, -inf }
0x14b4   : > { %v2474_v22 = vsel %vm649_vm2, %v2466_v20, -inf }
0x14b5   : > { %2475 = vmax.xlane.f32.xlu1 %v2474_v22  ;;  %v2181_v22 = vld [vmem:[#allocation11 + $0x50] sm:$0xff] }
0x14b9   : > { %2478 = vmax.xlane.f32.xlu1 %v2477_v23  ;;  %v4580_v23 = vpack.c.bf16 %v2181_v22, %v5677_v38  ;;  %v2172_v38 = vld [vmem:[#allocation8 + $0x58] sm:$0xff] }
0x14bb   : > { %4581 = vmatprep.subr.bf16.mxu1 %v4580_v23 }
0x14bc   : > { %4583 = vmatpush3.bf16.msra.mxu1 %v4580_v23 }
0x1542   : > { %v2476_v42 = vpop.xlane.xlu1 %2475 }
0x1543   : > { %v2480_v24 = vsub.f32 %v2466_v20, %v2476_v42  ;;  %v2177_v42 = vld [vmem:[#allocation10 + $0x58] sm:$0xff] }
0x1545   : > { %v2482_v1 = vmul.f32 1.442695, %v2480_v24  ;;  %v4584_v24 = vpack.c.bf16 %v2177_v42, %v5681_v41  ;;  %v4885_v42 = vld [vmem:[%s5595_s12] sm:$0x1]  ;;  %s5187_s12 = smov 112  }
0x1546   : > { %v2479_v26 = vpop.xlane.xlu1 %2478 }
0x1547   : > { %4827 = vpow2.f32 %v2482_v1  ;;  %v2481_v28 = vsub.f32 %v2471_v21, %v2479_v26  ;;  %4586 = vmatprep.subr.msk.bf16.mxu1 %vm5568_vm1, %v4584_v24 }
0x1549   : > { %v2484_v32 = vmul.f32 1.442695, %v2481_v28 }
0x154b   : > { %4829 = vpow2.f32 %v2484_v32 }
0x1551   : > { %v4828_v35 = vpop.eup %4827 }
0x1552   : > { %v2486_v37 = vsel %vm649_vm2, %v4828_v35, 0.0 }
0x1553   : > { %2487 = vadd.xlane.f32.xlu0 %v2486_v37 }
0x1555   : > { %v4830_v3 = vpop.eup %4829 }
0x1556   : > { %v2489_v39 = vsel %vm649_vm2, %v4830_v3, 0.0 }
0x1557   : > { %2490 = vadd.xlane.f32.xlu1 %v2489_v39 }
0x15e0   : > { %v2488_v48 = vpop.xlane.xlu0 %2487 }
0x15e1   : > { %4831 = vrcp.f32 %v2488_v48 }
0x15e4   : > { %v2491_v10 = vpop.xlane.xlu1 %2490 }
0x15e5   : > { %4833 = vrcp.f32 %v2491_v10 }
0x15eb   : > { %v4832_v49 = vpop.eup %4831 }
0x15ec   : > { %v2494_v50 = vmul.f32 %v4832_v49, %v4828_v35 }
0x15ee   : > { %4387 = vmatprep.mubr.msk.f32.mxu0 %vm649_vm2, %v2494_v50 }
0x15ef   : > { %v4834_v52 = vpop.eup %4833 }
0x15f0   : > { %v2495_v55 = vmul.f32 %v4834_v52, %v4830_v3 }
0x15f2   : > { %4388 = vmatmul.mubr.msk.f32.vlgmr.msra.gmra.mrb[18].mxu0 %vm649_vm2, %v2495_v55 }
0x15f3   : > { %4579 = vmatpush3.bf16.xpose.msk.msra.mxu0 %vm5568_vm1, %v4574_v47  ;;  %4394 = vmatprep.mubr.msk.f32.mxu0 %vm556_vm0, %v5658_v16 }
0x15fa   : > { %4395 = vmatmul.mubr.msk.f32.vlgmr.msra.gmra.mrb[20].mxu0 %vm556_vm0, %v2171_v62 }
0x16c5   : > { %v5864_v4 = vpop.f32.mrb[18].mxu0 }
0x16c6   : > { %v5866_v56 = vpop.f32.mrb[19].mxu0 }
0x16cd   : > { %v4396_v59 = vpop.f32.mrb[20].mxu0 }
0x16ce   : > { %v2660_v60 = vpop.f32.mrb[21].mxu0  ;;  %v2666_v63 = vadd.f32 %v4396_v59, %v5824_v29 }
0x16cf   : > { %v2661_v61 = vadd.f32 %v2660_v60, %v5824_v29 }
0x16d0   : > { %v2672_v5 = vsel %vm649_vm2, %v2666_v63, -inf }
0x16d1   : > { %v2669_v2 = vsel %vm649_vm2, %v2661_v61, -inf }
0x16d2   : > { %2670 = vmax.xlane.f32.xlu1 %v2669_v2  ;;  %v2984_v2 = vld [vmem:[#allocation10 + $0x60] sm:$0xff] }
0x16d6   : > { %2673 = vmax.xlane.f32.xlu1 %v2672_v5  ;;  %v4883_v5 = vld [vmem:[%s5550_s21] sm:$0xff] }
0x175f   : > { %v2671_v16 = vpop.xlane.xlu1 %2670 }
0x1760   : > { %v2675_v36 = vsub.f32 %v2661_v61, %v2671_v16  ;;  %v2182_v61 = vld [vmem:[#allocation11 + $0x58] sm:$0xff]  ;;  %v4594_v16 = vpack.c.bf16 %v2984_v2, %v4883_v5 }
0x1762   : > { %v2677_v6 = vmul.f32 1.442695, %v2675_v36  ;;  %v4088_v36 = vld [vmem:[%s6214_s23 + $0x3] ss:$0 sm:$0xff] }
0x1763   : > { %v2674_v7 = vpop.xlane.xlu1 %2673 }
0x1764   : > { %4835 = vpow2.f32 %v2677_v6  ;;  %v2676_v8 = vsub.f32 %v2666_v63, %v2674_v7  ;;  %v4590_v63 = vpack.c.bf16 %v2182_v61, %v5707_v14 }
0x1766   : > { %v2679_v30 = vmul.f32 1.442695, %v2676_v8  ;;  %4591 = vmatprep.subr.bf16.mxu0 %v4590_v63 }
0x1767   : > { %4593 = vmatpush3.bf16.msra.mxu0 %v4590_v63 }
0x1768   : > { %4837 = vpow2.f32 %v2679_v30  ;;  %4596 = vmatprep.subr.msk.bf16.mxu0 %vm5568_vm1, %v4594_v16 }
0x176e   : > { %v4836_v12 = vpop.eup %4835 }
0x176f   : > { %v2681_v17 = vsel %vm649_vm2, %v4836_v12, 0.0 }
0x1770   : > { %2682 = vadd.xlane.f32.xlu1 %v2681_v17  ;;  %v4884_v17 = vld [vmem:[%s5543_s13] sm:$0xff] }
0x1772   : > { %v4838_v20 = vpop.eup %4837 }
0x1773   : > { %v2684_v21 = vsel %vm649_vm2, %v4838_v20, 0.0 }
0x1774   : > { %2685 = vadd.xlane.f32.xlu1 %v2684_v21 }
0x17fd   : > { %v2683_v1 = vpop.xlane.xlu1 %2682 }
0x17fe   : > { %4839 = vrcp.f32 %v2683_v1 }
0x1801   : > { %v2686_v26 = vpop.xlane.xlu1 %2685 }
0x1802   : > { %4841 = vrcp.f32 %v2686_v26 }
0x1808   : > { %v4840_v28 = vpop.eup %4839 }
0x1809   : > { %v2689_v32 = vmul.f32 %v4840_v28, %v4836_v12 }
0x180b   : > { %4401 = vmatprep.mubr.msk.f32.mxu1 %vm649_vm2, %v2689_v32 }
0x180c   : > { %v4842_v35 = vpop.eup %4841 }
0x180d   : > { %v2690_v37 = vmul.f32 %v4842_v35, %v4838_v20  ;;  %v2979_v20 = vld [vmem:[#allocation8 + $0x60] sm:$0xff] }
0x180f   : > { %4402 = vmatmul.mubr.msk.f32.vlgmr.msra.gmra.mrb[20].mxu1 %vm649_vm2, %v2690_v37 }
0x1810   : > { %4589 = vmatpush3.bf16.xpose.msk.msra.mxu1 %vm5568_vm1, %v4584_v24  ;;  %4408 = vmatprep.mubr.msk.f32.mxu1 %vm556_vm0, %v5688_v51 }
0x1817   : > { %4409 = vmatmul.mubr.msk.f32.vlgmr.msra.gmra.mrb[22].mxu1 %vm556_vm0, %v2172_v38 }
0x18e2   : > { %v5885_v41 = vpop.f32.mrb[20].mxu1 }
0x18e3   : > { %v5887_v3 = vpop.f32.mrb[21].mxu1 }
0x18ea   : > { %v4410_v39 = vpop.f32.mrb[22].mxu1 }
0x18eb   : > { %v2855_v40 = vpop.f32.mrb[23].mxu1  ;;  %v2861_v46 = vadd.f32 %v4410_v39, %v5824_v29 }
0x18ec   : > { %v2856_v45 = vadd.f32 %v2855_v40, %v5824_v29 }
0x18ed   : > { %v2867_v48 = vsel %vm649_vm2, %v2861_v46, -inf }
0x18ee   : > { %v2864_v47 = vsel %vm649_vm2, %v2856_v45, -inf }
0x18ef   : > { %2865 = vmax.xlane.f32.xlu1 %v2864_v47 }
0x18f3   : > { %2868 = vmax.xlane.f32.xlu1 %v2867_v48 }
0x197c   : > { %v2866_v51 = vpop.xlane.xlu1 %2865 }
0x197d   : > { %v2870_v10 = vsub.f32 %v2856_v45, %v2866_v51 }
0x197f   : > { %v2872_v49 = vmul.f32 1.442695, %v2870_v10 }
0x1980   : > { %v2869_v50 = vpop.xlane.xlu1 %2868 }
0x1981   : > { %4843 = vpow2.f32 %v2872_v49  ;;  %v2871_v52 = vsub.f32 %v2861_v46, %v2869_v50  ;;  %v2989_v50 = vld [vmem:[#allocation11 + $0x60] sm:$0xff] }
0x1983   : > { %v2874_v55 = vmul.f32 1.442695, %v2871_v52  ;;  %v4886_v52 = vld [vmem:[%s5556_s9] sm:$0xff] }
0x1985   : > { %4845 = vpow2.f32 %v2874_v55  ;;  %v4600_v55 = vpack.c.bf16 %v2989_v50, %v4886_v52 }
0x1987   : > { %4601 = vmatprep.subr.bf16.mxu1 %v4600_v55 }
0x1988   : > { %4603 = vmatpush3.bf16.msra.mxu1 %v4600_v55 }
0x198b   : > { %v4844_v62 = vpop.eup %4843 }
0x198c   : > { %v2876_v59 = vsel %vm649_vm2, %v4844_v62, 0.0 }
0x198d   : > { %2877 = vadd.xlane.f32.xlu1 %v2876_v59  ;;  %v4887_v59 = vld [vmem:[%s5550_s21 + $0x8] sm:$0xff] }
0x198f   : > { %v4846_v29 = vpop.eup %4845 }
0x1990   : > { %v2879_v60 = vsel %vm649_vm2, %v4846_v29, 0.0 }
0x1991   : > { %2880 = vadd.xlane.f32.xlu0 %v2879_v60 }
0x199e   : > { %3000 = vrot.lane.b32.xlu1 %v4088_v36, %s5174_s18  ;;  %v4888_v36 = vld [vmem:[%s5543_s13 + $0x8] sm:$0xff] }
0x1a1a   : > { %v2878_v6 = vpop.xlane.xlu1 %2877 }
0x1a1b   : > { %4847 = vrcp.f32 %v2878_v6  ;;  %v2980_v6 = vld [vmem:[#allocation8 + $0x68] sm:$0xff] }
0x1a1e   : > { %v2881_v7 = vpop.xlane.xlu0 %2880  ;;  %v3001_v22 = vpop.permute.xlu1 %3000 }
0x1a1f   : > { %4849 = vrcp.f32 %v2881_v7  ;;  %v3003_v24 = vsel %vm556_vm0, %v4885_v42, %v3001_v22 }
0x1a20   : > { %v5917_v1 = vrot.slane %v3003_v24, %v5600_v11 }
0x1a25   : > { %v4848_v14 = vpop.eup %4847 }
0x1a26   : > { %v2884_v8 = vmul.f32 %v4848_v14, %v4844_v62  ;;  %v2985_v62 = vld [vmem:[#allocation10 + $0x68] sm:$0xff] }
0x1a28   : > { %4415 = vmatprep.mubr.msk.f32.mxu0 %vm649_vm2, %v2884_v8 }
0x1a29   : > { %v4850_v30 = vpop.eup %4849 }
0x1a2a   : > { %v2885_v12 = vmul.f32 %v4850_v30, %v4846_v29  ;;  %v4604_v29 = vpack.c.bf16 %v2985_v62, %v4887_v59  ;;  %v4891_v59 = vld [vmem:[%s5543_s13 + $0x10] sm:$0xff] }
0x1a2c   : > { %4416 = vmatmul.mubr.msk.f32.vlgmr.msra.gmra.mrb[22].mxu0 %vm649_vm2, %v2885_v12  ;;  %4606 = vmatprep.subr.msk.bf16.mxu1 %vm5568_vm1, %v4604_v29 }
0x1a2d   : > { %4599 = vmatpush3.bf16.xpose.msk.msra.mxu0 %vm5568_vm1, %v4594_v16  ;;  %4422 = vmatprep.mubr.msk.f32.mxu0 %vm556_vm0, %v4884_v17 }
0x1a34   : > { %4423 = vmatmul.mubr.msk.f32.vlgmr.msra.gmra.mrb[24].mxu0 %vm556_vm0, %v2979_v20 }
0x1aff   : > { %v5910_v21 = vpop.f32.mrb[22].mxu0 }
0x1b00   : > { %v5912_v23 = vpop.f32.mrb[23].mxu0 }
0x1b07   : > { %v4424_v26 = vpop.f32.mrb[24].mxu0 }
0x1b08   : > { %v3080_v28 = vpop.f32.mrb[25].mxu0  ;;  %v3086_v35 = vadd.f32 %v4424_v26, %v5917_v1 }
0x1b09   : > { %v3081_v32 = vadd.f32 %v3080_v28, %v5917_v1 }
0x1b0a   : > { %v3092_v38 = vsel %vm649_vm2, %v3086_v35, -inf }
0x1b0b   : > { %v3089_v37 = vsel %vm649_vm2, %v3081_v32, -inf }
0x1b0c   : > { %3090 = vmax.xlane.f32.xlu0 %v3089_v37 }
0x1b10   : > { %3093 = vmax.xlane.f32.xlu0 %v3092_v38 }
0x1b99   : > { %v3091_v39 = vpop.xlane.xlu0 %3090 }
0x1b9a   : > { %v3095_v40 = vsub.f32 %v3081_v32, %v3091_v39 }
0x1b9c   : > { %v3097_v45 = vmul.f32 1.442695, %v3095_v40 }
0x1b9d   : > { %v3094_v46 = vpop.xlane.xlu0 %3093 }
0x1b9e   : > { %4851 = vpow2.f32 %v3097_v45  ;;  %v3096_v11 = vsub.f32 %v3086_v35, %v3094_v46  ;;  %v2990_v45 = vld [vmem:[#allocation11 + $0x68] sm:$0xff] }
0x1b9f   : > { %v4889_v46 = vld [vmem:[%s5556_s9 + $0x8] sm:$0xff] }
0x1ba0   : > { %v3099_v47 = vmul.f32 1.442695, %v3096_v11  ;;  %v4610_v11 = vpack.c.bf16 %v2990_v45, %v4889_v46 }
0x1ba2   : > { %4853 = vpow2.f32 %v3099_v47  ;;  %4611 = vmatprep.subr.bf16.mxu0 %v4610_v11  ;;  %v2986_v47 = vld [vmem:[#allocation10 + $0x70] sm:$0xff] }
0x1ba3   : > { %4613 = vmatpush3.bf16.msra.mxu0 %v4610_v11 }
0x1ba8   : > { %v4852_v48 = vpop.eup %4851 }
0x1ba9   : > { %v3101_v51 = vsel %vm649_vm2, %v4852_v48, 0.0 }
0x1baa   : > { %3102 = vadd.xlane.f32.xlu0 %v3101_v51 }
0x1bac   : > { %v4854_v10 = vpop.eup %4853 }
0x1bad   : > { %v3104_v49 = vsel %vm649_vm2, %v4854_v10, 0.0 }
0x1bae   : > { %3105 = vadd.xlane.f32.xlu0 %v3104_v49 }
0x1c37   : > { %v3103_v60 = vpop.xlane.xlu0 %3102 }
0x1c38   : > { %4855 = vrcp.f32 %v3103_v60 }
0x1c3b   : > { %v3106_v61 = vpop.xlane.xlu0 %3105 }
0x1c3c   : > { %4857 = vrcp.f32 %v3106_v61 }
0x1c42   : > { %v4856_v63 = vpop.eup %4855 }
0x1c43   : > { %v3109_v2 = vmul.f32 %v4856_v63, %v4852_v48  ;;  %v4890_v48 = vld [vmem:[%s5550_s21 + $0x10] sm:$0xff] }
0x1c44   : > { %v4614_v51 = vpack.c.bf16 %v2986_v47, %v4890_v48 }
0x1c45   : > { %4429 = vmatprep.mubr.msk.f32.mxu1 %vm649_vm2, %v3109_v2 }
0x1c46   : > { %v4858_v5 = vpop.eup %4857  ;;  %4616 = vmatprep.subr.msk.bf16.mxu0 %vm5568_vm1, %v4614_v51 }
0x1c47   : > { %v3110_v16 = vmul.f32 %v4858_v5, %v4854_v10 }
0x1c49   : > { %4430 = vmatmul.mubr.msk.f32.vlgmr.msra.gmra.mrb[24].mxu1 %vm649_vm2, %v3110_v16 }
0x1c4a   : > { %4609 = vmatpush3.bf16.xpose.msk.msra.mxu1 %vm5568_vm1, %v4604_v29  ;;  %4436 = vmatprep.mubr.msk.f32.mxu1 %vm556_vm0, %v4888_v36  ;;  %v2981_v29 = vld [vmem:[#allocation8 + $0x70] sm:$0xff] }
0x1c51   : > { %4437 = vmatmul.mubr.msk.f32.vlgmr.msra.gmra.mrb[26].mxu1 %vm556_vm0, %v2980_v6 }
0x1d1c   : > { %v5936_v7 = vpop.f32.mrb[24].mxu1 }
0x1d1d   : > { %v5938_v14 = vpop.f32.mrb[25].mxu1 }
0x1d24   : > { %v4438_v8 = vpop.f32.mrb[26].mxu1 }
0x1d25   : > { %v3281_v30 = vadd.f32 %v4438_v8, %v5917_v1  ;;  %v3275_v12 = vpop.f32.mrb[27].mxu1 }
0x1d26   : > { %v3276_v17 = vadd.f32 %v3275_v12, %v5917_v1 }
0x1d27   : > { %v3287_v20 = vsel %vm649_vm2, %v3281_v30, -inf }
0x1d28   : > { %3288 = vmax.xlane.f32.xlu1 %v3287_v20  ;;  %v3284_v22 = vsel %vm649_vm2, %v3276_v17, -inf }
0x1d29   : > { %3285 = vmax.xlane.f32.xlu0 %v3284_v22 }
0x1db5   : > { %v3289_v42 = vpop.xlane.xlu1 %3288 }
0x1db6   : > { %v3291_v24 = vsub.f32 %v3281_v30, %v3289_v42  ;;  %v3286_v26 = vpop.xlane.xlu0 %3285 }
0x1db7   : > { %v3290_v28 = vsub.f32 %v3276_v17, %v3286_v26 }
0x1db8   : > { %v3294_v32 = vmul.f32 1.442695, %v3291_v24 }
0x1db9   : > { %v3292_v35 = vmul.f32 1.442695, %v3290_v28 }
0x1dbb   : > { %4859 = vpow2.f32 %v3292_v35  ;;  %v4892_v35 = vld [vmem:[%s5556_s9 + $0x10] sm:$0xff] }
0x1dbc   : > { %4861 = vpow2.f32 %v3294_v32  ;;  %v2991_v32 = vld [vmem:[#allocation11 + $0x70] sm:$0xff] }
0x1dc5   : > { %v4860_v37 = vpop.eup %4859 }
0x1dc6   : > { %v3296_v38 = vsel %vm649_vm2, %v4860_v37, 0.0  ;;  %v4862_v39 = vpop.eup %4861 }
0x1dc7   : > { %3297 = vadd.xlane.f32.xlu0 %v3296_v38  ;;  %v3299_v40 = vsel %vm649_vm2, %v4862_v39, 0.0  ;;  %v2987_v38 = vld [vmem:[#allocation10 + $0x78] sm:$0xff] }
0x1dcb   : > { %3300 = vadd.xlane.f32.xlu0 %v3299_v40 }
0x1e54   : > { %v3298_v10 = vpop.xlane.xlu0 %3297 }
0x1e55   : > { %4863 = vrcp.f32 %v3298_v10  ;;  %v4894_v10 = vld [vmem:[%s5543_s13 + $0x18] sm:$0xff]  ;;  %s5176_s13 = smov 24  }
0x1e58   : > { %v3301_v49 = vpop.xlane.xlu0 %3300 }
0x1e59   : > { %4865 = vrcp.f32 %v3301_v49  ;;  %v2982_v49 = vld [vmem:[#allocation8 + $0x78] sm:$0xff] }
0x1e5f   : > { %v4864_v50 = vpop.eup %4863 }
0x1e60   : > { %v3304_v52 = vmul.f32 %v4864_v50, %v4860_v37  ;;  %v4620_v37 = vpack.c.bf16 %v2991_v32, %v4892_v35 }
0x1e62   : > { %4443 = vmatprep.mubr.msk.f32.mxu0 %vm649_vm2, %v3304_v52  ;;  %4621 = vmatprep.subr.bf16.mxu1 %v4620_v37 }
0x1e63   : > { %v4866_v55 = vpop.eup %4865  ;;  %4623 = vmatpush3.bf16.msra.mxu1 %v4620_v37 }
0x1e64   : > { %v3305_v62 = vmul.f32 %v4866_v55, %v4862_v39  ;;  %v4893_v39 = vld [vmem:[%s5550_s21 + $0x18] sm:$0xff]  ;;  %s5179_s21 = smov 48  }
0x1e65   : > { %v4624_v40 = vpack.c.bf16 %v2987_v38, %v4893_v39 }
0x1e66   : > { %4444 = vmatmul.mubr.msk.f32.vlgmr.msra.gmra.mrb[26].mxu0 %vm649_vm2, %v3305_v62 }
0x1e67   : > { %4619 = vmatpush3.bf16.xpose.msk.msra.mxu0 %vm5568_vm1, %v4614_v51  ;;  %4450 = vmatprep.mubr.msk.f32.mxu0 %vm556_vm0, %v4891_v59 }
0x1e68   : > { %4626 = vmatprep.subr.msk.bf16.mxu1 %vm5568_vm1, %v4624_v40 }
0x1e6e   : > { %4451 = vmatmul.mubr.msk.f32.vlgmr.msra.gmra.mrb[28].mxu0 %vm556_vm0, %v2981_v29 }
0x1f39   : > { %v5957_v60 = vpop.f32.mrb[26].mxu0 }
0x1f3a   : > { %v5959_v61 = vpop.f32.mrb[27].mxu0 }
0x1f41   : > { %v4452_v63 = vpop.f32.mrb[28].mxu0 }
0x1f42   : > { %v3470_v2 = vpop.f32.mrb[29].mxu0  ;;  %v3476_v16 = vadd.f32 %v4452_v63, %v5917_v1 }
0x1f43   : > { %v3471_v5 = vadd.f32 %v3470_v2, %v5917_v1 }
0x1f44   : > { %v3482_v6 = vsel %vm649_vm2, %v3476_v16, -inf }
0x1f45   : > { %v3479_v36 = vsel %vm649_vm2, %v3471_v5, -inf }
0x1f46   : > { %3480 = vmax.xlane.f32.xlu0 %v3479_v36 }
0x1f4a   : > { %3483 = vmax.xlane.f32.xlu0 %v3482_v6 }
0x1fd3   : > { %v3481_v8 = vpop.xlane.xlu0 %3480 }
0x1fd4   : > { %v3485_v30 = vsub.f32 %v3471_v5, %v3481_v8 }
0x1fd6   : > { %v3487_v12 = vmul.f32 1.442695, %v3485_v30 }
0x1fd7   : > { %v3484_v17 = vpop.xlane.xlu0 %3483 }
0x1fd8   : > { %4867 = vpow2.f32 %v3487_v12  ;;  %v3486_v20 = vsub.f32 %v3476_v16, %v3484_v17 }
0x1fda   : > { %v3489_v22 = vmul.f32 1.442695, %v3486_v20  ;;  %v2992_v20 = vld [vmem:[#allocation11 + $0x78] sm:$0xff] }
0x1fdc   : > { %4869 = vpow2.f32 %v3489_v22  ;;  %v4895_v22 = vld [vmem:[%s5556_s9 + $0x18] sm:$0xff]  ;;  %s5180_s9 = smov 56  }
0x1fe2   : > { %v4868_v42 = vpop.eup %4867 }
0x1fe3   : > { %v3491_v24 = vsel %vm649_vm2, %v4868_v42, 0.0 }
0x1fe4   : > { %3492 = vadd.xlane.f32.xlu0 %v3491_v24 }
0x1fe6   : > { %v4870_v26 = vpop.eup %4869 }
0x1fe7   : > { %v3494_v28 = vsel %vm649_vm2, %v4870_v26, 0.0 }
0x1fe8   : > { %3495 = vadd.xlane.f32.xlu0 %v3494_v28 }
0x2071   : > { %v3493_v45 = vpop.xlane.xlu0 %3492 }
0x2072   : > { %4871 = vrcp.f32 %v3493_v45 }
0x2075   : > { %v3496_v46 = vpop.xlane.xlu0 %3495 }
0x2076   : > { %4873 = vrcp.f32 %v3496_v46 }
0x207c   : > { %v4872_v11 = vpop.eup %4871 }
0x207d   : > { %v3499_v47 = vmul.f32 %v4872_v11, %v4868_v42  ;;  %v4630_v42 = vpack.c.bf16 %v2992_v20, %v4895_v22 }
0x207f   : > { %4457 = vmatprep.mubr.msk.f32.mxu1 %vm649_vm2, %v3499_v47  ;;  %4631 = vmatprep.subr.bf16.mxu0 %v4630_v42 }
0x2080   : > { %v4874_v48 = vpop.eup %4873  ;;  %4633 = vmatpush3.bf16.msra.mxu0 %v4630_v42 }
0x2081   : > { %v3500_v51 = vmul.f32 %v4874_v48, %v4870_v26 }
0x2083   : > { %4458 = vmatmul.mubr.msk.f32.vlgmr.msra.gmra.mrb[28].mxu1 %vm649_vm2, %v3500_v51 }
0x2084   : > { %4629 = vmatpush3.bf16.xpose.msk.msra.mxu1 %vm5568_vm1, %v4624_v40  ;;  %4464 = vmatprep.mubr.msk.f32.mxu1 %vm556_vm0, %v4894_v10  ;;  %vm3785_vm1 = vcmask 1048512  }
0x208b   : > { %4465 = vmatmul.mubr.msk.f32.vlgmr.msra.gmra.mrb[30].mxu1 %vm556_vm0, %v2982_v49  ;;  %vm3590_vm0 = vcmask 982912  }
0x2156   : > { %v5978_v50 = vpop.f32.mrb[28].mxu1 }
0x2157   : > { %v5980_v52 = vpop.f32.mrb[29].mxu1 }
0x215e   : > { %v4466_v55 = vpop.f32.mrb[30].mxu1 }
0x215f   : > { %v3665_v62 = vpop.f32.mrb[31].mxu1  ;;  %v3671_v29 = vadd.f32 %v4466_v55, %v5917_v1 }
0x2160   : > { %v3666_v59 = vadd.f32 %v3665_v62, %v5917_v1 }
0x2161   : > { %v3677_v0 = vsel %vm649_vm2, %v3671_v29, -inf }
0x2162   : > { %v3674_v63 = vsel %vm649_vm2, %v3666_v59, -inf }
0x2163   : > { %3675 = vmax.xlane.f32.xlu0 %v3674_v63 }
0x2167   : > { %3678 = vmax.xlane.f32.xlu0 %v3677_v0 }
0x21f0   : > { %v3676_v2 = vpop.xlane.xlu0 %3675 }
0x21f1   : > { %v3680_v5 = vsub.f32 %v3666_v59, %v3676_v2 }
0x21f3   : > { %v3682_v16 = vmul.f32 1.442695, %v3680_v5 }
0x21f4   : > { %v3679_v36 = vpop.xlane.xlu0 %3678 }
0x21f5   : > { %4875 = vpow2.f32 %v3682_v16  ;;  %v3681_v6 = vsub.f32 %v3671_v29, %v3679_v36 }
0x21f7   : > { %v3684_v8 = vmul.f32 1.442695, %v3681_v6 }
0x21f9   : > { %4877 = vpow2.f32 %v3684_v8 }
0x21ff   : > { %v5986_v30 = vpop.eup %4875 }
0x2200   : > { %v3686_v1 = vsel %vm649_vm2, %v5986_v30, 0.0 }
0x2201   : > { %3687 = vadd.xlane.f32.xlu0 %v3686_v1 }
0x2203   : > { %v5990_v12 = vpop.eup %4877 }
0x2204   : > { %v3689_v17 = vsel %vm649_vm2, %v5990_v12, 0.0 }
0x2205   : > { %3690 = vadd.xlane.f32.xlu1 %v3689_v17 }
0x2216   : > { %949 = vrot.lane.b32.xlu1 %v5666_v18, %s5174_s18 }
0x2217   : > { %947 = vrot.lane.b32.xlu0 %v5668_v19, %s5174_s18 }
0x221a   : > { %1148 = vrot.lane.b32.xlu1 %v5698_v54, %s5175_s26 }
0x221b   : > { %1349 = vrot.lane.b32.xlu0 %v5726_v34, %s5176_s13 }
0x221e   : > { %1150 = vrot.lane.b32.xlu1 %v5696_v53, %s5175_s26  ;;  %s6084_s26 = scalar_lea.hbm %s6217_s20, %s4121_s24 }
0x221f   : > { %1574 = vrot.lane.b32.xlu0 %v5752_v15, %s5177_s15 }
0x2222   : > { %1351 = vrot.lane.b32.xlu1 %v5724_v31, %s5176_s13  ;;  %s3789_s13 = scalar_lea.sflag [#allocation4], %s5539_s25 }
0x2223   : > { %1769 = vrot.lane.b32.xlu0 %v5773_v58, %s5178_s17 }
0x2226   : > { %1576 = vrot.lane.b32.xlu1 %v5750_v13, %s5177_s15  ;;  %s5070_s15 = scalar_lea.vmem %s6086_s1, 256 }
0x2227   : > { %1964 = vrot.lane.b32.xlu0 %v5794_v44, %s5179_s21  ;;  %p5071_p10 = scmp.ne.s32.totalorder %s6086_s1, %s5070_s15 }
0x2229   : > { %p5072_p0 = pnand %p5071_p10, %p6218_p1 }
0x222a   : > { %1771 = vrot.lane.b32.xlu1 %v5771_v57, %s5178_s17  ;;  %s5074_s17 = sshll.u32 %s5189_s30, 4  ;;  %s5075_s17 = int_to_ptr.vmem [resolvable:$false] %s5074_s17 }
0x222b   : > { %2159 = vrot.lane.b32.xlu0 %v5819_v27, %s5180_s9  ;;  %p5073_p13 = pneg %p5072_p0  ;;  %p5077_p5 = scmp.lt.s32.totalorder %s6086_s1, %s5075_s17 }
0x222e   : > { %1966 = vrot.lane.b32.xlu1 %v5792_v43, %s5179_s21  ;;  %s5076_s21 = scalar_lea.vmem %s5075_s17, 512 }
0x222f   : > { %2384 = vrot.lane.b32.xlu0 %v5845_v9, %s5181_s11  ;;  %p5078_p3 = scmp.lt.s32.totalorder %s5076_s21, %s5070_s15 }
0x2231   : > { %p5079_p6 = por %p5078_p3, %p5077_p5 }
0x2232   : > { %2161 = vrot.lane.b32.xlu1 %v5817_v25, %s5180_s9 }
0x2233   : > { %2579 = vrot.lane.b32.xlu0 %v5866_v56, %s5182_s14  ;;  %p5080_p7 = pnand %p5079_p6, %p5073_p13 }
0x2236   : > { %2386 = vrot.lane.b32.xlu1 %v5843_v33, %s5181_s11 }
0x2237   : > { %2774 = vrot.lane.b32.xlu0 %v5887_v3, %s5183_s19 }
0x223a   : > { %2581 = vrot.lane.b32.xlu1 %v5864_v4, %s5182_s14 }
0x223b   : > { %2969 = vrot.lane.b32.xlu0 %v5912_v23, %s5184_s22 }
0x223e   : > { %2776 = vrot.lane.b32.xlu1 %v5885_v41, %s5183_s19 }
0x223f   : > { %3194 = vrot.lane.b32.xlu0 %v5938_v14, %s5185_s3 }
0x2242   : > { %2971 = vrot.lane.b32.xlu1 %v5910_v21, %s5184_s22 }
0x2243   : > { %3389 = vrot.lane.b32.xlu0 %v5959_v61, %s5186_s7 }
0x2246   : > { %3196 = vrot.lane.b32.xlu1 %v5936_v7, %s5185_s3 }
0x2247   : > { %3584 = vrot.lane.b32.xlu0 %v5980_v52, %s5187_s12 }
0x224a   : > { %3391 = vrot.lane.b32.xlu1 %v5957_v60, %s5186_s7 }
0x224e   : > { %3586 = vrot.lane.b32.xlu1 %v5978_v50, %s5187_s12 }
0x228e   : > { %v3688_v18 = vpop.xlane.xlu0 %3687 }
0x228f   : > { %4879 = vrcp.f32 %v3688_v18 }
0x2292   : > { %v3691_v19 = vpop.xlane.xlu1 %3690  ;;  %v948_v53 = vpop.permute.xlu0 %947 }
0x2293   : > { %4881 = vrcp.f32 %v3691_v19  ;;  %954 = vst.msk [vmem:[%s5634_s6] sm:$0xff] %vm953_vm3, %v948_v53 }
0x2296   : > { %v950_v54 = vpop.permute.xlu1 %949  ;;  %v1350_v31 = vpop.permute.xlu0 %1349 }
0x2297   : > { %955 = vst.msk [vmem:[%s5634_s6 + $0x8] sm:$0xff] %vm953_vm3, %v950_v54 }
0x2299   : > { %v4880_v34 = vpop.eup %4879 }
0x229a   : > { %v1149_v13 = vpop.permute.xlu1 %1148  ;;  %v1575_v15 = vpop.permute.xlu0 %1574  ;;  %v3694_v57 = vmul.f32 %v4880_v34, %v5986_v30 }
0x229b   : > { %1155 = vst.msk [vmem:[%s5634_s6] sm:$0xff] %vm1154_vm4, %v1149_v13 }
0x229c   : > { %1356 = vst.msk [vmem:[%s5634_s6] sm:$0xff] %vm1355_vm5, %v1350_v31  ;;  %4471 = vmatprep.mubr.msk.f32.mxu0 %vm649_vm2, %v3694_v57 }
0x229d   : > { %v4882_v58 = vpop.eup %4881  ;;  %1581 = vst.msk [vmem:[%s5634_s6] sm:$0xff] %vm1580_vm6, %v1575_v15 }
0x229e   : > { %v3695_v43 = vmul.f32 %v4882_v58, %v5990_v12  ;;  %v1151_v44 = vpop.permute.xlu1 %1150  ;;  %v1770_v25 = vpop.permute.xlu0 %1769 }
0x229f   : > { %1156 = vst.msk [vmem:[%s5634_s6 + $0x8] sm:$0xff] %vm1154_vm4, %v1151_v44 }
0x22a0   : > { %1776 = vst.msk [vmem:[%s5634_s6] sm:$0xff] %vm1775_vm7, %v1770_v25  ;;  %4472 = vmatmul.mubr.msk.f32.vlgmr.msra.gmra.mrb[30].mxu0 %vm649_vm2, %v3695_v43 }
0x22a2   : > { %v1352_v27 = vpop.permute.xlu1 %1351  ;;  %v1965_v33 = vpop.permute.xlu0 %1964 }
0x22a3   : > { %1357 = vst.msk [vmem:[%s5634_s6 + $0x8] sm:$0xff] %vm1355_vm5, %v1352_v27 }
0x22a4   : > { %1971 = vst.msk [vmem:[%s5634_s6] sm:$0xff] %vm1970_vm8, %v1965_v33 }
0x22a6   : > { %v1577_v9 = vpop.permute.xlu1 %1576  ;;  %v2160_v4 = vpop.permute.xlu0 %2159 }
0x22a7   : > { %1582 = vst.msk [vmem:[%s5634_s6 + $0x8] sm:$0xff] %vm1580_vm6, %v1577_v9 }
0x22a8   : > { %2166 = vst.msk [vmem:[%s5634_s6] sm:$0xff] %vm2165_vm9, %v2160_v4 }
0x22aa   : > { %v1772_v56 = vpop.permute.xlu1 %1771  ;;  %v2385_v41 = vpop.permute.xlu0 %2384 }
0x22ab   : > { %1777 = vst.msk [vmem:[%s5634_s6 + $0x8] sm:$0xff] %vm1775_vm7, %v1772_v56 }
0x22ac   : > { %2391 = vst.msk [vmem:[%s5634_s6] sm:$0xff] %vm2390_vm10, %v2385_v41 }
0x22ae   : > { %v1967_v3 = vpop.permute.xlu1 %1966  ;;  %v2580_v21 = vpop.permute.xlu0 %2579 }
0x22af   : > { %1972 = vst.msk [vmem:[%s5634_s6 + $0x8] sm:$0xff] %vm1970_vm8, %v1967_v3 }
0x22b0   : > { %2586 = vst.msk [vmem:[%s5634_s6] sm:$0xff] %vm2585_vm11, %v2580_v21 }
0x22b2   : > { %v2162_v23 = vpop.permute.xlu1 %2161  ;;  %v2775_v7 = vpop.permute.xlu0 %2774 }
0x22b3   : > { %2167 = vst.msk [vmem:[%s5634_s6 + $0x8] sm:$0xff] %vm2165_vm9, %v2162_v23 }
0x22b4   : > { %2781 = vst.msk [vmem:[%s5634_s6] sm:$0xff] %vm2780_vm12, %v2775_v7 }
0x22b6   : > { %v2387_v14 = vpop.permute.xlu1 %2386  ;;  %v2970_v60 = vpop.permute.xlu0 %2969 }
0x22b7   : > { %2392 = vst.msk [vmem:[%s5634_s6 + $0x8] sm:$0xff] %vm2390_vm10, %v2387_v14 }
0x22b8   : > { %2976 = vst.msk [vmem:[%s5634_s6] sm:$0xff] %vm2975_vm13, %v2970_v60 }
0x22ba   : > { %v2582_v61 = vpop.permute.xlu1 %2581  ;;  %v3195_v24 = vpop.permute.xlu0 %3194 }
0x22bb   : > { %2587 = vst.msk [vmem:[%s5634_s6 + $0x8] sm:$0xff] %vm2585_vm11, %v2582_v61 }
0x22bc   : > { %3201 = vst.msk [vmem:[%s5634_s6] sm:$0xff] %vm3200_vm14, %v3195_v24 }
0x22be   : > { %v2777_v26 = vpop.permute.xlu1 %2776  ;;  %v3390_v28 = vpop.permute.xlu0 %3389 }
0x22bf   : > { %2782 = vst.msk [vmem:[%s5634_s6 + $0x8] sm:$0xff] %vm2780_vm12, %v2777_v26 }
0x22c0   : > { %3396 = vst.msk [vmem:[%s5634_s6] sm:$0xff] %vm3395_vm15, %v3390_v28 }
0x22c2   : > { %v2972_v32 = vpop.permute.xlu1 %2971  ;;  %v3585_v35 = vpop.permute.xlu0 %3584 }
0x22c3   : > { %2977 = vst.msk [vmem:[%s5634_s6 + $0x8] sm:$0xff] %vm2975_vm13, %v2972_v32 }
0x22c4   : > { %3591 = vst.msk [vmem:[%s5634_s6] sm:$0xff] %vm3590_vm0, %v3585_v35 }
0x22c6   : > { %v3197_v37 = vpop.permute.xlu1 %3196 }
0x22c7   : > { %3202 = vst.msk [vmem:[%s5634_s6 + $0x8] sm:$0xff] %vm3200_vm14, %v3197_v37 }
0x22ca   : > { %v3392_v38 = vpop.permute.xlu1 %3391 }
0x22cb   : > { %3397 = vst.msk [vmem:[%s5634_s6 + $0x8] sm:$0xff] %vm3395_vm15, %v3392_v38 }
0x22ce   : > { %v3587_v39 = vpop.permute.xlu1 %3586 }
0x22cf   : > { %3592 = vst.msk [vmem:[%s5634_s6 + $0x8] sm:$0xff] %vm3590_vm0, %v3587_v39 }
0x2373   : > { %v4473_v40 = vpop.f32.mrb[30].mxu0 }
0x2374   : > { %3781 = vrot.lane.b32.xlu1 %v4473_v40, %s5188_s27  ;;  %v3768_v45 = vpop.f32.mrb[31].mxu0 }
0x2375   : > { %3779 = vrot.lane.b32.xlu0 %v3768_v45, %s5188_s27 }
0x23e6   : > { %v3782_v46 = vpop.permute.xlu1 %3781 }
0x23e7   : > { %3787 = vst.msk [vmem:[%s5634_s6 + $0x8] sm:$0xff] %vm3785_vm1, %v3782_v46  ;;  %v3780_v11 = vpop.permute.xlu0 %3779 }
0x23e8   : > { %3786 = vst.msk [vmem:[%s5634_s6] sm:$0xff] %vm3785_vm1, %v3780_v11 }
0x23e9   : > { %5083 = shalt.err (!%p5080_p7)
}
0x23ea   : > { %s5084_s6 = scalar_lea.hbm %s6084_s26, 256  ;;  %s5088_s14 = scalar_lea.hbm %s6217_s20, 512 }
0x23eb   : > { %p5085_p9 = scmp.ne.s32.totalorder %s6084_s26, %s5084_s6  ;;  %p5089_p12 = scmp.lt.u32.totalorder %s6084_s26, %s6217_s20 }
0x23ec   : > { %p5090_p2 = scmp.lt.u32.totalorder %s5088_s14, %s5084_s6  ;;  %p5092_p10 = scmp.lt.u32.totalorder %s5084_s6, %s6084_s26 }
0x23ed   : > { %p5086_p8 = pnand %p5085_p9, %p6218_p1 }
0x23ee   : > { %p5091_p11 = por %p5090_p2, %p5089_p12 }
0x23ef   : > { %p5087_p4 = pneg %p5086_p8 }
0x23f0   : > { %p5093_p0 = por %p5092_p10, %p5091_p11 }
0x23f2   : > { %p5094_p13 = pnand %p5093_p0, %p5087_p4 }
0x23f4   : > { %5097 = shalt.err (!%p5094_p13)
}
0x23f5   : > { %s5190_s3 = smov 128  }
0x23f6   : > { %4652 = dma.vmem_to_hbm [thread:$0]  (%p6218_p1), %s6086_s1, 256, %s6084_s26, %s3789_s13, %s5190_s3, %s5190_s3, %s5174_s18  }
0x23f7 PF: > { %s6219_s7 = sld [smem:[#allocation19_spill]]  ;;  %s6220_s12 = sld [smem:[#allocation23_spill]] }
0x23f8   : > { %s6221_s27 = sld [smem:[#allocation21_spill]] }
0x23fd   : > { %s3818_s24 = sand.u32 1, %s6219_s7   ;;  %p6222_p5 = scmp.ne.s32.totalorder %s6220_s12, 0 }
0x23fe   : > { %p6223_p3 = scmp.ge.s32.totalorder %s6221_s27, 2  ;;  %s3819_s16 = scalar_lea.sflag [#allocation4], %s3818_s24 }
0x2400   : > { %p4675_p6 = pnand %p6223_p3, %p6222_p5 }
0x2402   : > { %5139 = dma.done.wait (!%p4675_p6), %s3819_s16, 256  }
0x2403   : > { %5141 = vsyncadd (!%p4675_p6), %s3819_s16, 4294967040  ;;  %s29_s10 = sadd.s32 1, %s6221_s27   ;;  %s6224_s25 = sld [smem:[#allocation25_spill]] }
0x2404   : > { %p26_p7 = scmp.ge.s32.totalorder %s29_s10, 4   ;;  %s6225_s30 = sld [smem:[#allocation20_spill]] }
0x2405   : > { %s6226_s9 = sld [smem:[#allocation24_spill]]  ;;  %s6227_s27 = smov %s5148_s28 }
0x2406   : > { %s6228_s28 = smov %s5152_s29  ;;  %28 = sbr.rel (!%p26_p7) target bundleno = 16 (0x10), region = 154 }
0x2409   : > { %s6229_s29 = smov %s6224_s25 }
0x240d   :  { %3824 = vsyncpa [#allocation3], 1 }
0x240e   :  { %3826 = vsyncpa [#allocation3 + $0x1], 1 }
0x240f   :  { %3827 = vsyncpa [#allocation6], 1 }
0x2410   :  { %3829 = vsyncpa [#allocation6 + $0x1], 1 }
0x2411   :  { %3830 = vsyncpa [#allocation9], 1 }
0x2412   :  { %3831 = vsyncpa [#allocation12], 1 }
0x2413   :  { %3832 = vsyncpa [#allocation4], 1 }
0x2414   :  { %3834 = vsyncpa [#allocation4 + $0x1], 1 }

</bundles_post_ra>
